<compile_context>
chip_gen: v7x
topology: tpu7x:2x2x1
jax: 0.10.0
libtpu: 0.0.40
codegen_flags: <defaults>
</compile_context>

<pallas_src>
import functools

import jax
import jax.numpy as jnp
from jax.experimental import pallas as pl
from jax.experimental.pallas import tpu as pltpu

VGG16_BN_CFG = [64, 64, 'M', 128, 128, 'M', 256, 256, 256, 'M',
                512, 512, 512, 'M', 512, 512, 512, 'M']

_GUARD = 8                               # zero guard rows -> every in-kernel offset >= 0
_VMEM_LIMIT_BYTES = 48 * 1024 * 1024     # stay well under v7x's 64 MiB physical VMEM
_CONV_TILE_ROWS = 512                    # target flattened-row tile for the conv matmul
_POOL_TILE_ROWS = 1024                   # target row tile for the pooling kernel


# --------------------------------------------------------------------------- #
# Pallas kernels
# --------------------------------------------------------------------------- #
def _conv3x3_bn_relu_kernel(xp_ref, w_ref, s_ref, b_ref, o_ref, win_ref, acc_ref,
                            *, width, guard, tiled):
    # xp_ref : (1, (H+2)*W + 2*guard, Cin) bf16   zero-padded activation (flat H*W)
    # w_ref  : (9, Cin, Cout)              bf16   conv taps, index = kh*3 + kw
    # s_ref  : (1, Cout) f32   folded BN scale = gamma / sqrt(var + eps)
    # b_ref  : (1, Cout) f32   folded BN bias  = (conv_bias - mean) * scale + beta
    # o_ref  : (1, TM, Cout) f32   TM = whole image rows (multiple of `width`)
    # win_ref: (TM + 2*W + 2*guard, Cin) bf16 scratch (tile + 3x3 halo)
    # acc_ref: (TM, Cout) f32 VMEM accumulator scratch
    tm = o_ref.shape[1]
    wsz = win_ref.shape[0]

    if tiled:
        # flattened output-row offset of this tile; tm is a multiple of 8 when tiled
        base = pl.multiple_of(pl.program_id(1) * tm, 8)
    else:
        base = 0

    # One aligned dynamic slice copies the tile's input window (incl. halo) into
    # scratch; all per-tap reads below then use static offsets.
    win_ref[...] = xp_ref[0, pl.ds(base, wsz), :]

    # Column (w) coordinate of every output pixel in the tile (tiles start at w == 0).
    col = jax.lax.broadcasted_iota(jnp.int32, (tm, 1), 0) % width

    for idx in range(9):
        kh, kw = idx // 3, idx % 3
        off = guard + kh * width + (kw - 1)          # static offset inside the window
        lhs = win_ref[pl.ds(off, tm), :]             # (TM, Cin) bf16
        if kw == 0:                                  # left zero-padding column
            lhs = jnp.where(col > 0, lhs, jnp.zeros_like(lhs))
        elif kw == 2:                                # right zero-padding column
            lhs = jnp.where(col < width - 1, lhs, jnp.zeros_like(lhs))
        contrib = jnp.dot(lhs, w_ref[idx], preferred_element_type=jnp.float32)
        if idx == 0:
            acc_ref[...] = contrib
        else:
            acc_ref[...] += contrib

    y = acc_ref[...] * s_ref[...] + b_ref[...]       # BN affine in f32
    o_ref[0, :, :] = jnp.maximum(y, 0.0).astype(o_ref.dtype)


def _max4_kernel(a_ref, b_ref, c_ref, d_ref, o_ref):
    # Whole-tile elementwise max of the four 2x2 pooling phases (lane dense).
    o_ref[...] = jnp.maximum(jnp.maximum(a_ref[...], b_ref[...]),
                             jnp.maximum(c_ref[...], d_ref[...]))


# --------------------------------------------------------------------------- #
# Tile-size helpers
# --------------------------------------------------------------------------- #
def _conv_row_tile(h, width, target=_CONV_TILE_ROWS):
    """Flattened-row tile: whole image rows, divides H*W, multiple of 8 when tiled."""
    full = h * width
    if full <= target:
        return full
    for th in range(h, 0, -1):
        if h % th == 0:
            tm = th * width
            if tm <= target and tm % 8 == 0:
                return tm
    return full


def _pool_row_tile(rows, cols, target_elems=512 * 1024):
    target = max(8, min(_POOL_TILE_ROWS, target_elems // max(cols, 1)))
    if rows <= target:
        return rows
    start = target - (target % 8)
    for t in range(start, 7, -8):
        if rows % t == 0:
            return t
    return rows


# --------------------------------------------------------------------------- #
# Wrappers (glue: padding / flattening / transposes)
# --------------------------------------------------------------------------- #
def conv3x3_bn_relu(x, w, scale, bias, *, tile_target=_CONV_TILE_ROWS):
    """x: (N,H,W,Cin) f32; w: (3,3,Cin,Cout); scale/bias: (Cout,). -> (N,H,W,Cout) f32."""
    n, h, wd, cin = x.shape
    cout = w.shape[-1]
    hw = h * wd

    xb = x.astype(jnp.bfloat16).reshape(n, hw, cin)
    w9 = w.astype(jnp.bfloat16).reshape(9, cin, cout)

    # Pad Cin to a multiple of 8 (zero taps contribute 0; helps the tiny first layer).
    if cin % 8:
        pc = 8 - cin % 8
        xb = jnp.pad(xb, ((0, 0), (0, 0), (0, pc)))
        w9 = jnp.pad(w9, ((0, 0), (0, pc), (0, 0)))
        cin += pc

    # Zero pad in (flattened) H only: guard rows + one image row of top/bottom padding.
    # This is a contiguous pad (~1.1x bytes), unlike a 9x im2col materialisation.
    xp = jnp.pad(xb, ((0, 0), (_GUARD + wd, wd + _GUARD), (0, 0)))
    hwp = xp.shape[1]

    s2 = scale.reshape(1, cout).astype(jnp.float32)
    b2 = bias.reshape(1, cout).astype(jnp.float32)

    tm = _conv_row_tile(h, wd, tile_target)
    nt = hw // tm
    wsz = tm + 2 * wd + 2 * _GUARD

    kernel = functools.partial(_conv3x3_bn_relu_kernel,
                               width=wd, guard=_GUARD, tiled=(nt > 1))

    out = pl.pallas_call(
        kernel,
        out_shape=jax.ShapeDtypeStruct((n, hw, cout), jnp.float32),
        grid_spec=pltpu.PrefetchScalarGridSpec(
            num_scalar_prefetch=0,
            grid=(n, nt),
            in_specs=[
                pl.BlockSpec((1, hwp, cin), lambda i, t: (i, 0, 0)),   # resident per image
                pl.BlockSpec((9, cin, cout), lambda i, t: (0, 0, 0)),  # weights resident
                pl.BlockSpec((1, cout), lambda i, t: (0, 0)),
                pl.BlockSpec((1, cout), lambda i, t: (0, 0)),
            ],
            out_specs=pl.BlockSpec((1, tm, cout), lambda i, t: (i, t, 0)),
            scratch_shapes=[
                pltpu.VMEM((wsz, cin), jnp.bfloat16),    # input window (tile + halo)
                pltpu.VMEM((tm, cout), jnp.float32),     # f32 accumulator
            ],
        ),
        compiler_params=pltpu.CompilerParams(
            dimension_semantics=("parallel", "parallel"),
            vmem_limit_bytes=_VMEM_LIMIT_BYTES,
        ),
    )(xp, w9, s2, b2)
    return out.reshape(n, h, wd, cout)


def maxpool2x2(x):
    """x: (N,H,W,C) -> (N,H//2,W//2,C), kernel 2, stride 2."""
    n, h, w, c = x.shape
    ho, wo = h // 2, w // 2
    rows, cols = n * ho, wo * c
    # Stride-2 phase gather in glue (cheap XLA strided slices); the reduction runs
    # as a lane-dense vectorised Pallas kernel on (rows, wo*C) slabs.
    a = x[:, 0::2, 0::2, :].reshape(rows, cols)
    b = x[:, 0::2, 1::2, :].reshape(rows, cols)
    cc = x[:, 1::2, 0::2, :].reshape(rows, cols)
    d = x[:, 1::2, 1::2, :].reshape(rows, cols)

    tm = _pool_row_tile(rows, cols)
    out = pl.pallas_call(
        _max4_kernel,
        out_shape=jax.ShapeDtypeStruct((rows, cols), x.dtype),
        grid_spec=pltpu.PrefetchScalarGridSpec(
            num_scalar_prefetch=0,
            grid=(rows // tm,),
            in_specs=[pl.BlockSpec((tm, cols), lambda i: (i, 0)) for _ in range(4)],
            out_specs=pl.BlockSpec((tm, cols), lambda i: (i, 0)),
        ),
        compiler_params=pltpu.CompilerParams(
            dimension_semantics=("parallel",),
            vmem_limit_bytes=_VMEM_LIMIT_BYTES,
        ),
    )(a, b, cc, d)
    return out.reshape(n, ho, wo, c)


# --------------------------------------------------------------------------- #
# Deterministic parameter construction (conv weight/bias + folded inference BN)
# --------------------------------------------------------------------------- #
def make_params(key, initial_inplanes, cfg=VGG16_BN_CFG, eps=1e-5):
    params = []
    cin = initial_inplanes
    for v in cfg:
        if v == 'M':
            continue
        key, kw, kb, kg, kbt, km, kv = jax.random.split(key, 7)
        w = jax.random.normal(kw, (3, 3, cin, v), jnp.float32) / jnp.sqrt(9.0 * cin)
        conv_b = 0.01 * jax.random.normal(kb, (v,), jnp.float32)
        gamma = 1.0 + 0.1 * jax.random.normal(kg, (v,), jnp.float32)
        beta = 0.1 * jax.random.normal(kbt, (v,), jnp.float32)
        run_mean = 0.1 * jax.random.normal(km, (v,), jnp.float32)
        run_var = jnp.abs(1.0 + 0.1 * jax.random.normal(kv, (v,), jnp.float32))
        scale = gamma / jnp.sqrt(run_var + eps)
        bias = (conv_b - run_mean) * scale + beta
        params.append((w, scale, bias))
        cin = v
    return params


# --------------------------------------------------------------------------- #
# VGG16-BN backbone forward (matches VGG.forward for arch_name == 'vgg16_bn')
#   div1 = conv0,conv1 ; div2 = pool,conv2,conv3 ; div4 = pool,conv4-6 ;
#   div8 = pool,conv7-9 ; div16 = pool,conv10-12  (final cfg maxpool unused)
#   returns [x2, x3, x4, x5]
# --------------------------------------------------------------------------- #
def vgg16_bn_backbone(x_nchw, params):
    x = jnp.transpose(x_nchw, (0, 2, 3, 1)).astype(jnp.float32)   # NCHW -> NHWC
    idx = 0

    def convs(t, n):
        nonlocal idx
        for _ in range(n):
            w, s, b = params[idx]
            idx += 1
            t = conv3x3_bn_relu(t, w, s, b)
        return t

    x1 = convs(x, 2)
    x2 = convs(maxpool2x2(x1), 2)
    x3 = convs(maxpool2x2(x2), 3)
    x4 = convs(maxpool2x2(x3), 3)
    x5 = convs(maxpool2x2(x4), 3)
    return [jnp.transpose(o, (0, 3, 1, 2)) for o in (x2, x3, x4, x5)]   # back to NCHW


# --------------------------------------------------------------------------- #
# Plain-JAX reference + self-checks
# --------------------------------------------------------------------------- #
def _conv3x3_bn_relu_reference(x, w, scale, bias):
    xb = x.astype(jnp.bfloat16).astype(jnp.float32)
    wb = w.astype(jnp.bfloat16).astype(jnp.float32)
    y = jax.lax.conv_general_dilated(
        xb, wb, window_strides=(1, 1), padding='SAME',
        dimension_numbers=('NHWC', 'HWIO', 'NHWC'),
        precision=jax.lax.Precision.HIGHEST)
    return jnp.maximum(y * scale + bias, 0.0)


def _check_conv(key, n, h, w, cin, cout, tol=2e-2, tile_target=_CONV_TILE_ROWS):
    kx, kw_, ks, kb = jax.random.split(key, 4)
    x = jax.random.normal(kx, (n, h, w, cin), jnp.float32)
    wt = jax.random.normal(kw_, (3, 3, cin, cout), jnp.float32) / jnp.sqrt(9.0 * cin)
    s = 1.0 + 0.1 * jax.random.normal(ks, (cout,), jnp.float32)
    b = 0.1 * jax.random.normal(kb, (cout,), jnp.float32)
    got = conv3x3_bn_relu(x, wt, s, b, tile_target=tile_target)
    ref = _conv3x3_bn_relu_reference(x, wt, s, b)
    err = float(jnp.max(jnp.abs(got - ref)))
    assert jnp.allclose(got, ref, rtol=tol, atol=tol), (n, h, w, cin, cout, err)


if __name__ == "__main__":
    key = jax.random.PRNGKey(0)
    kx, kp, kc = jax.random.split(key, 3)

    # Conv kernel spot checks vs plain-JAX conv (wide / narrow / 1x1 spatial, Cin pad,
    # and one case forcing multiple HW tiles to exercise the tiled path).
    k1, k2, k3, k4 = jax.random.split(kc, 4)
    _check_conv(k1, 2, 16, 16, 4, 64)
    _check_conv(k2, 1, 4, 4, 16, 32)
    _check_conv(k3, 1, 1, 1, 8, 16)
    _check_conv(k4, 2, 16, 16, 4, 64, tile_target=64)

    N, C, H, W = 2, 4, 16, 16                      # small synthetic NCHW input
    x = jax.random.normal(kx, (N, C, H, W), jnp.float32)
    params = make_params(kp, initial_inplanes=C)

    # Max-pool spot check (exact).
    y = jnp.transpose(x, (0, 2, 3, 1))
    mp_got = maxpool2x2(y)
    mp_ref = jnp.max(y.reshape(N, H // 2, 2, W // 2, 2, C), axis=(2, 4))
    assert jnp.allclose(mp_got, mp_ref)

    outs = jax.block_until_ready(vgg16_bn_backbone(x, params))

    expected = [(N, 128, 8, 8), (N, 256, 4, 4), (N, 512, 2, 2), (N, 512, 1, 1)]
    got = [tuple(o.shape) for o in outs]
    assert got == expected, f"unexpected stage shapes: {got}"
    assert all(bool(jnp.all(jnp.isfinite(o))) for o in outs)
    print("KERNEL_OK")
</pallas_src>

<mosaic_0001>
module attributes {stable_mosaic.version = 11 : i64} {
  func.func @_conv3x3_bn_relu_kernel(%arg0: i32, %arg1: i32, %arg2: memref<1x304x8xbf16, #tpu.memory_space<vmem>>, %arg3: memref<9x8x64xbf16, #tpu.memory_space<vmem>>, %arg4: memref<1x64xf32, #tpu.memory_space<vmem>>, %arg5: memref<1x64xf32, #tpu.memory_space<vmem>>, %arg6: memref<1x256x64xf32, #tpu.memory_space<vmem>>, %arg7: memref<304x8xbf16, #tpu.memory_space<vmem>>, %arg8: memref<256x64xf32, #tpu.memory_space<vmem>>) attributes {dimension_semantics = [#tpu.dimension_semantics<parallel>, #tpu.dimension_semantics<parallel>], iteration_bounds = array<i64: 2, 1>, scalar_prefetch = 0 : i64, scratch_operands = 2 : i64, tpu.core_type = #tpu.core_type<tc>, window_params = [{transform_indices = @transform_0, window_bounds = array<i64: 1, 304, 8>}, {pipeline_mode = #tpu.pipeline_mode<synchronous>, transform_indices = @transform_1, window_bounds = array<i64: 9, 8, 64>}, {pipeline_mode = #tpu.pipeline_mode<synchronous>, transform_indices = @transform_2, window_bounds = array<i64: 1, 64>}, {pipeline_mode = #tpu.pipeline_mode<synchronous>, transform_indices = @transform_3, window_bounds = array<i64: 1, 64>}, {transform_indices = @transform_4, window_bounds = array<i64: 1, 256, 64>}]} {
    %c0 = arith.constant 0 : index
    %c0_0 = arith.constant 0 : index
    %c0_1 = arith.constant 0 : index
    %0 = vector.load %arg2[%c0, %c0_0, %c0_1] : memref<1x304x8xbf16, #tpu.memory_space<vmem>>, vector<1x304x8xbf16>
    %1 = vector.shape_cast %0 : vector<1x304x8xbf16> to vector<304x8xbf16>
    %c0_2 = arith.constant 0 : index
    %c0_3 = arith.constant 0 : index
    %2 = vector.load %arg7[%c0_2, %c0_3] : memref<304x8xbf16, #tpu.memory_space<vmem>>, vector<304x8xbf16>
    tpu.vector_store %arg7[%c0_2, %c0_3], %1 {strides = array<i32>} : memref<304x8xbf16, #tpu.memory_space<vmem>>, vector<304x8xbf16>,
    %3 = tpu.iota {dimensions = array<i32: 0>} : vector<256x1xi32>
    %c16_i32 = arith.constant 16 : i32
    %c0_i32 = arith.constant 0 : i32
    %4 = arith.cmpi eq, %c16_i32, %c0_i32 : i32
    %c1_i32 = arith.constant 1 : i32
    %5 = arith.select %4, %c1_i32, %c16_i32 : i32
    %6 = vector.broadcast %5 : i32 to vector<256x1xi32>
    %7 = arith.remsi %3, %6 : vector<256x1xi32>
    %c0_i32_4 = arith.constant 0 : i32
    %8 = vector.broadcast %c0_i32_4 : i32 to vector<256x1xi32>
    %9 = arith.cmpi ne, %7, %8 : vector<256x1xi32>
    %c0_i32_5 = arith.constant 0 : i32
    %10 = vector.broadcast %c0_i32_5 : i32 to vector<256x1xi32>
    %11 = arith.cmpi slt, %7, %10 : vector<256x1xi32>
    %c0_i32_6 = arith.constant 0 : i32
    %12 = arith.cmpi slt, %5, %c0_i32_6 : i32
    %13 = vector.broadcast %12 : i1 to vector<256x1xi1>
    %14 = vector.broadcast %13 : vector<256x1xi1> to vector<256x1xi1>
    %15 = arith.xori %11, %14 : vector<256x1xi1>
    %16 = arith.andi %15, %9 : vector<256x1xi1>
    %17 = vector.broadcast %5 : i32 to vector<256x1xi32>
    %18 = arith.addi %7, %17 : vector<256x1xi32>
    %19 = arith.select %16, %18, %7 : vector<256x1xi1>, vector<256x1xi32>
    %c7 = arith.constant 7 : index
    %c0_7 = arith.constant 0 : index
    %20 = vector.load %arg7[%c7, %c0_7] : memref<304x8xbf16, #tpu.memory_space<vmem>>, vector<256x8xbf16>
    %c0_i32_8 = arith.constant 0 : i32
    %21 = vector.broadcast %c0_i32_8 : i32 to vector<256x1xi32>
    %22 = arith.cmpi sgt, %19, %21 : vector<256x1xi32>
    %cst = arith.constant 0.000000e+00 : bf16
    %23 = vector.broadcast %cst : bf16 to vector<256x8xbf16>
    %24 = vector.shape_cast %22 : vector<256x1xi1> to vector<256x1xi1>
    %25 = vector.broadcast %24 : vector<256x1xi1> to vector<256x8xi1>
    %26 = arith.select %25, %20, %23 : vector<256x8xi1>, vector<256x8xbf16>
    %c0_9 = arith.constant 0 : index
    %c0_10 = arith.constant 0 : index
    %c0_11 = arith.constant 0 : index
    %27 = vector.load %arg3[%c0_9, %c0_10, %c0_11] : memref<9x8x64xbf16, #tpu.memory_space<vmem>>, vector<1x8x64xbf16>
    %28 = vector.shape_cast %27 : vector<1x8x64xbf16> to vector<8x64xbf16>
    %cst_12 = arith.constant dense<0.000000e+00> : vector<256x64xf32>
    %29 = tpu.matmul %26, %28, %cst_12 {dimension_numbers = #tpu.dot_dimension_numbers<[1], [0], [0], [1], [0, 0, 1, 1], [], []>} : vector<256x8xbf16>, vector<8x64xbf16>, vector<256x64xf32> -> vector<256x64xf32>
    %c0_13 = arith.constant 0 : index
    %c0_14 = arith.constant 0 : index
    %30 = vector.load %arg8[%c0_13, %c0_14] : memref<256x64xf32, #tpu.memory_space<vmem>>, vector<256x64xf32>
    tpu.vector_store %arg8[%c0_13, %c0_14], %29 {strides = array<i32>} : memref<256x64xf32, #tpu.memory_space<vmem>>, vector<256x64xf32>,
    %c8 = arith.constant 8 : index
    %c0_15 = arith.constant 0 : index
    %31 = vector.load %arg7[%c8, %c0_15] : memref<304x8xbf16, #tpu.memory_space<vmem>>, vector<256x8xbf16>
    %c1 = arith.constant 1 : index
    %c0_16 = arith.constant 0 : index
    %c0_17 = arith.constant 0 : index
    %32 = vector.load %arg3[%c1, %c0_16, %c0_17] : memref<9x8x64xbf16, #tpu.memory_space<vmem>>, vector<1x8x64xbf16>
    %33 = vector.shape_cast %32 : vector<1x8x64xbf16> to vector<8x64xbf16>
    %cst_18 = arith.constant dense<0.000000e+00> : vector<256x64xf32>
    %34 = tpu.matmul %31, %33, %cst_18 {dimension_numbers = #tpu.dot_dimension_numbers<[1], [0], [0], [1], [0, 0, 1, 1], [], []>} : vector<256x8xbf16>, vector<8x64xbf16>, vector<256x64xf32> -> vector<256x64xf32>
    %c0_19 = arith.constant 0 : index
    %c0_20 = arith.constant 0 : index
    %35 = vector.load %arg8[%c0_19, %c0_20] : memref<256x64xf32, #tpu.memory_space<vmem>>, vector<256x64xf32>
    %36 = arith.addf %35, %34 : vector<256x64xf32>
    %c0_21 = arith.constant 0 : index
    %c0_22 = arith.constant 0 : index
    %37 = vector.load %arg8[%c0_21, %c0_22] : memref<256x64xf32, #tpu.memory_space<vmem>>, vector<256x64xf32>
    tpu.vector_store %arg8[%c0_21, %c0_22], %36 {strides = array<i32>} : memref<256x64xf32, #tpu.memory_space<vmem>>, vector<256x64xf32>,
    %c9 = arith.constant 9 : index
    %c0_23 = arith.constant 0 : index
    %38 = vector.load %arg7[%c9, %c0_23] : memref<304x8xbf16, #tpu.memory_space<vmem>>, vector<256x8xbf16>
    %c15_i32 = arith.constant 15 : i32
    %39 = vector.broadcast %c15_i32 : i32 to vector<256x1xi32>
    %40 = arith.cmpi slt, %19, %39 : vector<256x1xi32>
    %cst_24 = arith.constant 0.000000e+00 : bf16
    %41 = vector.broadcast %cst_24 : bf16 to vector<256x8xbf16>
    %42 = vector.shape_cast %40 : vector<256x1xi1> to vector<256x1xi1>
    %43 = vector.broadcast %42 : vector<256x1xi1> to vector<256x8xi1>
    %44 = arith.select %43, %38, %41 : vector<256x8xi1>, vector<256x8xbf16>
    %c2 = arith.constant 2 : index
    %c0_25 = arith.constant 0 : index
    %c0_26 = arith.constant 0 : index
    %45 = vector.load %arg3[%c2, %c0_25, %c0_26] : memref<9x8x64xbf16, #tpu.memory_space<vmem>>, vector<1x8x64xbf16>
    %46 = vector.shape_cast %45 : vector<1x8x64xbf16> to vector<8x64xbf16>
    %cst_27 = arith.constant dense<0.000000e+00> : vector<256x64xf32>
    %47 = tpu.matmul %44, %46, %cst_27 {dimension_numbers = #tpu.dot_dimension_numbers<[1], [0], [0], [1], [0, 0, 1, 1], [], []>} : vector<256x8xbf16>, vector<8x64xbf16>, vector<256x64xf32> -> vector<256x64xf32>
    %c0_28 = arith.constant 0 : index
    %c0_29 = arith.constant 0 : index
    %48 = vector.load %arg8[%c0_28, %c0_29] : memref<256x64xf32, #tpu.memory_space<vmem>>, vector<256x64xf32>
    %49 = arith.addf %48, %47 : vector<256x64xf32>
    %c0_30 = arith.constant 0 : index
    %c0_31 = arith.constant 0 : index
    %50 = vector.load %arg8[%c0_30, %c0_31] : memref<256x64xf32, #tpu.memory_space<vmem>>, vector<256x64xf32>
    tpu.vector_store %arg8[%c0_30, %c0_31], %49 {strides = array<i32>} : memref<256x64xf32, #tpu.memory_space<vmem>>, vector<256x64xf32>,
    %c23 = arith.constant 23 : index
    %c0_32 = arith.constant 0 : index
    %51 = vector.load %arg7[%c23, %c0_32] : memref<304x8xbf16, #tpu.memory_space<vmem>>, vector<256x8xbf16>
    %c0_i32_33 = arith.constant 0 : i32
    %52 = vector.broadcast %c0_i32_33 : i32 to vector<256x1xi32>
    %53 = arith.cmpi sgt, %19, %52 : vector<256x1xi32>
    %cst_34 = arith.constant 0.000000e+00 : bf16
    %54 = vector.broadcast %cst_34 : bf16 to vector<256x8xbf16>
    %55 = vector.shape_cast %53 : vector<256x1xi1> to vector<256x1xi1>
    %56 = vector.broadcast %55 : vector<256x1xi1> to vector<256x8xi1>
    %57 = arith.select %56, %51, %54 : vector<256x8xi1>, vector<256x8xbf16>
    %c3 = arith.constant 3 : index
    %c0_35 = arith.constant 0 : index
    %c0_36 = arith.constant 0 : index
    %58 = vector.load %arg3[%c3, %c0_35, %c0_36] : memref<9x8x64xbf16, #tpu.memory_space<vmem>>, vector<1x8x64xbf16>
    %59 = vector.shape_cast %58 : vector<1x8x64xbf16> to vector<8x64xbf16>
    %cst_37 = arith.constant dense<0.000000e+00> : vector<256x64xf32>
    %60 = tpu.matmul %57, %59, %cst_37 {dimension_numbers = #tpu.dot_dimension_numbers<[1], [0], [0], [1], [0, 0, 1, 1], [], []>} : vector<256x8xbf16>, vector<8x64xbf16>, vector<256x64xf32> -> vector<256x64xf32>
    %c0_38 = arith.constant 0 : index
    %c0_39 = arith.constant 0 : index
    %61 = vector.load %arg8[%c0_38, %c0_39] : memref<256x64xf32, #tpu.memory_space<vmem>>, vector<256x64xf32>
    %62 = arith.addf %61, %60 : vector<256x64xf32>
    %c0_40 = arith.constant 0 : index
    %c0_41 = arith.constant 0 : index
    %63 = vector.load %arg8[%c0_40, %c0_41] : memref<256x64xf32, #tpu.memory_space<vmem>>, vector<256x64xf32>
    tpu.vector_store %arg8[%c0_40, %c0_41], %62 {strides = array<i32>} : memref<256x64xf32, #tpu.memory_space<vmem>>, vector<256x64xf32>,
    %c24 = arith.constant 24 : index
    %c0_42 = arith.constant 0 : index
    %64 = vector.load %arg7[%c24, %c0_42] : memref<304x8xbf16, #tpu.memory_space<vmem>>, vector<256x8xbf16>
    %c4 = arith.constant 4 : index
    %c0_43 = arith.constant 0 : index
    %c0_44 = arith.constant 0 : index
    %65 = vector.load %arg3[%c4, %c0_43, %c0_44] : memref<9x8x64xbf16, #tpu.memory_space<vmem>>, vector<1x8x64xbf16>
    %66 = vector.shape_cast %65 : vector<1x8x64xbf16> to vector<8x64xbf16>
    %cst_45 = arith.constant dense<0.000000e+00> : vector<256x64xf32>
    %67 = tpu.matmul %64, %66, %cst_45 {dimension_numbers = #tpu.dot_dimension_numbers<[1], [0], [0], [1], [0, 0, 1, 1], [], []>} : vector<256x8xbf16>, vector<8x64xbf16>, vector<256x64xf32> -> vector<256x64xf32>
    %c0_46 = arith.constant 0 : index
    %c0_47 = arith.constant 0 : index
    %68 = vector.load %arg8[%c0_46, %c0_47] : memref<256x64xf32, #tpu.memory_space<vmem>>, vector<256x64xf32>
    %69 = arith.addf %68, %67 : vector<256x64xf32>
    %c0_48 = arith.constant 0 : index
    %c0_49 = arith.constant 0 : index
    %70 = vector.load %arg8[%c0_48, %c0_49] : memref<256x64xf32, #tpu.memory_space<vmem>>, vector<256x64xf32>
    tpu.vector_store %arg8[%c0_48, %c0_49], %69 {strides = array<i32>} : memref<256x64xf32, #tpu.memory_space<vmem>>, vector<256x64xf32>,
    %c25 = arith.constant 25 : index
    %c0_50 = arith.constant 0 : index
    %71 = vector.load %arg7[%c25, %c0_50] : memref<304x8xbf16, #tpu.memory_space<vmem>>, vector<256x8xbf16>
    %c15_i32_51 = arith.constant 15 : i32
    %72 = vector.broadcast %c15_i32_51 : i32 to vector<256x1xi32>
    %73 = arith.cmpi slt, %19, %72 : vector<256x1xi32>
    %cst_52 = arith.constant 0.000000e+00 : bf16
    %74 = vector.broadcast %cst_52 : bf16 to vector<256x8xbf16>
    %75 = vector.shape_cast %73 : vector<256x1xi1> to vector<256x1xi1>
    %76 = vector.broadcast %75 : vector<256x1xi1> to vector<256x8xi1>
    %77 = arith.select %76, %71, %74 : vector<256x8xi1>, vector<256x8xbf16>
    %c5 = arith.constant 5 : index
    %c0_53 = arith.constant 0 : index
    %c0_54 = arith.constant 0 : index
    %78 = vector.load %arg3[%c5, %c0_53, %c0_54] : memref<9x8x64xbf16, #tpu.memory_space<vmem>>, vector<1x8x64xbf16>
    %79 = vector.shape_cast %78 : vector<1x8x64xbf16> to vector<8x64xbf16>
    %cst_55 = arith.constant dense<0.000000e+00> : vector<256x64xf32>
    %80 = tpu.matmul %77, %79, %cst_55 {dimension_numbers = #tpu.dot_dimension_numbers<[1], [0], [0], [1], [0, 0, 1, 1], [], []>} : vector<256x8xbf16>, vector<8x64xbf16>, vector<256x64xf32> -> vector<256x64xf32>
    %c0_56 = arith.constant 0 : index
    %c0_57 = arith.constant 0 : index
    %81 = vector.load %arg8[%c0_56, %c0_57] : memref<256x64xf32, #tpu.memory_space<vmem>>, vector<256x64xf32>
    %82 = arith.addf %81, %80 : vector<256x64xf32>
    %c0_58 = arith.constant 0 : index
    %c0_59 = arith.constant 0 : index
    %83 = vector.load %arg8[%c0_58, %c0_59] : memref<256x64xf32, #tpu.memory_space<vmem>>, vector<256x64xf32>
    tpu.vector_store %arg8[%c0_58, %c0_59], %82 {strides = array<i32>} : memref<256x64xf32, #tpu.memory_space<vmem>>, vector<256x64xf32>,
    %c39 = arith.constant 39 : index
    %c0_60 = arith.constant 0 : index
    %84 = vector.load %arg7[%c39, %c0_60] : memref<304x8xbf16, #tpu.memory_space<vmem>>, vector<256x8xbf16>
    %c0_i32_61 = arith.constant 0 : i32
    %85 = vector.broadcast %c0_i32_61 : i32 to vector<256x1xi32>
    %86 = arith.cmpi sgt, %19, %85 : vector<256x1xi32>
    %cst_62 = arith.constant 0.000000e+00 : bf16
    %87 = vector.broadcast %cst_62 : bf16 to vector<256x8xbf16>
    %88 = vector.shape_cast %86 : vector<256x1xi1> to vector<256x1xi1>
    %89 = vector.broadcast %88 : vector<256x1xi1> to vector<256x8xi1>
    %90 = arith.select %89, %84, %87 : vector<256x8xi1>, vector<256x8xbf16>
    %c6 = arith.constant 6 : index
    %c0_63 = arith.constant 0 : index
    %c0_64 = arith.constant 0 : index
    %91 = vector.load %arg3[%c6, %c0_63, %c0_64] : memref<9x8x64xbf16, #tpu.memory_space<vmem>>, vector<1x8x64xbf16>
    %92 = vector.shape_cast %91 : vector<1x8x64xbf16> to vector<8x64xbf16>
    %cst_65 = arith.constant dense<0.000000e+00> : vector<256x64xf32>
    %93 = tpu.matmul %90, %92, %cst_65 {dimension_numbers = #tpu.dot_dimension_numbers<[1], [0], [0], [1], [0, 0, 1, 1], [], []>} : vector<256x8xbf16>, vector<8x64xbf16>, vector<256x64xf32> -> vector<256x64xf32>
    %c0_66 = arith.constant 0 : index
    %c0_67 = arith.constant 0 : index
    %94 = vector.load %arg8[%c0_66, %c0_67] : memref<256x64xf32, #tpu.memory_space<vmem>>, vector<256x64xf32>
    %95 = arith.addf %94, %93 : vector<256x64xf32>
    %c0_68 = arith.constant 0 : index
    %c0_69 = arith.constant 0 : index
    %96 = vector.load %arg8[%c0_68, %c0_69] : memref<256x64xf32, #tpu.memory_space<vmem>>, vector<256x64xf32>
    tpu.vector_store %arg8[%c0_68, %c0_69], %95 {strides = array<i32>} : memref<256x64xf32, #tpu.memory_space<vmem>>, vector<256x64xf32>,
    %c40 = arith.constant 40 : index
    %c0_70 = arith.constant 0 : index
    %97 = vector.load %arg7[%c40, %c0_70] : memref<304x8xbf16, #tpu.memory_space<vmem>>, vector<256x8xbf16>
    %c7_71 = arith.constant 7 : index
    %c0_72 = arith.constant 0 : index
    %c0_73 = arith.constant 0 : index
    %98 = vector.load %arg3[%c7_71, %c0_72, %c0_73] : memref<9x8x64xbf16, #tpu.memory_space<vmem>>, vector<1x8x64xbf16>
    %99 = vector.shape_cast %98 : vector<1x8x64xbf16> to vector<8x64xbf16>
    %cst_74 = arith.constant dense<0.000000e+00> : vector<256x64xf32>
    %100 = tpu.matmul %97, %99, %cst_74 {dimension_numbers = #tpu.dot_dimension_numbers<[1], [0], [0], [1], [0, 0, 1, 1], [], []>} : vector<256x8xbf16>, vector<8x64xbf16>, vector<256x64xf32> -> vector<256x64xf32>
    %c0_75 = arith.constant 0 : index
    %c0_76 = arith.constant 0 : index
    %101 = vector.load %arg8[%c0_75, %c0_76] : memref<256x64xf32, #tpu.memory_space<vmem>>, vector<256x64xf32>
    %102 = arith.addf %101, %100 : vector<256x64xf32>
    %c0_77 = arith.constant 0 : index
    %c0_78 = arith.constant 0 : index
    %103 = vector.load %arg8[%c0_77, %c0_78] : memref<256x64xf32, #tpu.memory_space<vmem>>, vector<256x64xf32>
    tpu.vector_store %arg8[%c0_77, %c0_78], %102 {strides = array<i32>} : memref<256x64xf32, #tpu.memory_space<vmem>>, vector<256x64xf32>,
    %c41 = arith.constant 41 : index
    %c0_79 = arith.constant 0 : index
    %104 = vector.load %arg7[%c41, %c0_79] : memref<304x8xbf16, #tpu.memory_space<vmem>>, vector<256x8xbf16>
    %c15_i32_80 = arith.constant 15 : i32
    %105 = vector.broadcast %c15_i32_80 : i32 to vector<256x1xi32>
    %106 = arith.cmpi slt, %19, %105 : vector<256x1xi32>
    %cst_81 = arith.constant 0.000000e+00 : bf16
    %107 = vector.broadcast %cst_81 : bf16 to vector<256x8xbf16>
    %108 = vector.shape_cast %106 : vector<256x1xi1> to vector<256x1xi1>
    %109 = vector.broadcast %108 : vector<256x1xi1> to vector<256x8xi1>
    %110 = arith.select %109, %104, %107 : vector<256x8xi1>, vector<256x8xbf16>
    %c8_82 = arith.constant 8 : index
    %c0_83 = arith.constant 0 : index
    %c0_84 = arith.constant 0 : index
    %111 = vector.load %arg3[%c8_82, %c0_83, %c0_84] : memref<9x8x64xbf16, #tpu.memory_space<vmem>>, vector<1x8x64xbf16>
    %112 = vector.shape_cast %111 : vector<1x8x64xbf16> to vector<8x64xbf16>
    %cst_85 = arith.constant dense<0.000000e+00> : vector<256x64xf32>
    %113 = tpu.matmul %110, %112, %cst_85 {dimension_numbers = #tpu.dot_dimension_numbers<[1], [0], [0], [1], [0, 0, 1, 1], [], []>} : vector<256x8xbf16>, vector<8x64xbf16>, vector<256x64xf32> -> vector<256x64xf32>
    %c0_86 = arith.constant 0 : index
    %c0_87 = arith.constant 0 : index
    %114 = vector.load %arg8[%c0_86, %c0_87] : memref<256x64xf32, #tpu.memory_space<vmem>>, vector<256x64xf32>
    %115 = arith.addf %114, %113 : vector<256x64xf32>
    %c0_88 = arith.constant 0 : index
    %c0_89 = arith.constant 0 : index
    %116 = vector.load %arg8[%c0_88, %c0_89] : memref<256x64xf32, #tpu.memory_space<vmem>>, vector<256x64xf32>
    tpu.vector_store %arg8[%c0_88, %c0_89], %115 {strides = array<i32>} : memref<256x64xf32, #tpu.memory_space<vmem>>, vector<256x64xf32>,
    %c0_90 = arith.constant 0 : index
    %c0_91 = arith.constant 0 : index
    %117 = vector.load %arg8[%c0_90, %c0_91] : memref<256x64xf32, #tpu.memory_space<vmem>>, vector<256x64xf32>
    %c0_92 = arith.constant 0 : index
    %c0_93 = arith.constant 0 : index
    %118 = vector.load %arg4[%c0_92, %c0_93] : memref<1x64xf32, #tpu.memory_space<vmem>>, vector<1x64xf32>
    %119 = vector.broadcast %118 : vector<1x64xf32> to vector<256x64xf32>
    %120 = arith.mulf %117, %119 : vector<256x64xf32>
    %c0_94 = arith.constant 0 : index
    %c0_95 = arith.constant 0 : index
    %121 = vector.load %arg5[%c0_94, %c0_95] : memref<1x64xf32, #tpu.memory_space<vmem>>, vector<1x64xf32>
    %122 = vector.broadcast %121 : vector<1x64xf32> to vector<256x64xf32>
    %123 = arith.addf %120, %122 : vector<256x64xf32>
    %cst_96 = arith.constant 0.000000e+00 : f32
    %124 = vector.broadcast %cst_96 : f32 to vector<256x64xf32>
    %125 = arith.maximumf %123, %124 : vector<256x64xf32>
    %c0_97 = arith.constant 0 : index
    %c0_98 = arith.constant 0 : index
    %c0_99 = arith.constant 0 : index
    %126 = vector.load %arg6[%c0_97, %c0_98, %c0_99] : memref<1x256x64xf32, #tpu.memory_space<vmem>>, vector<1x256x64xf32>
    %127 = vector.shape_cast %126 : vector<1x256x64xf32> to vector<256x64xf32>
    %128 = vector.shape_cast %125 : vector<256x64xf32> to vector<1x256x64xf32>
    tpu.vector_store %arg6[%c0_97, %c0_98, %c0_99], %128 {strides = array<i32>} : memref<1x256x64xf32, #tpu.memory_space<vmem>>, vector<1x256x64xf32>,
    return
  }
  func.func @transform_0(%arg0: i32, %arg1: i32) -> (i32, i32, i32) {
    %c0_i32 = arith.constant 0 : i32
    %c0_i32_0 = arith.constant 0 : i32
    %c0_i32_1 = arith.constant 0 : i32
    return %arg0, %c0_i32, %c0_i32_0 : i32, i32, i32
  }
  func.func @transform_1(%arg0: i32, %arg1: i32) -> (i32, i32, i32) {
    %c0_i32 = arith.constant 0 : i32
    %c0_i32_0 = arith.constant 0 : i32
    %c0_i32_1 = arith.constant 0 : i32
    %c0_i32_2 = arith.constant 0 : i32
    return %c0_i32, %c0_i32_0, %c0_i32_1 : i32, i32, i32
  }
  func.func @transform_2(%arg0: i32, %arg1: i32) -> (i32, i32) {
    %c0_i32 = arith.constant 0 : i32
    %c0_i32_0 = arith.constant 0 : i32
    %c0_i32_1 = arith.constant 0 : i32
    return %c0_i32, %c0_i32_0 : i32, i32
  }
  func.func @transform_3(%arg0: i32, %arg1: i32) -> (i32, i32) {
    %c0_i32 = arith.constant 0 : i32
    %c0_i32_0 = arith.constant 0 : i32
    %c0_i32_1 = arith.constant 0 : i32
    return %c0_i32, %c0_i32_0 : i32, i32
  }
  func.func @transform_4(%arg0: i32, %arg1: i32) -> (i32, i32, i32) {
    %c0_i32 = arith.constant 0 : i32
    %c0_i32_0 = arith.constant 0 : i32
    return %arg0, %arg1, %c0_i32 : i32, i32, i32
  }
}

</mosaic_0001>

<bundles_post_ra>
// kernel: tpu_custom_call.1
= control target key start
LH: loop header
LB: loop body
LE: loop exit
PB: predicated region body
PF: predicated region fallthrough
CT: control target
= control target key end

     0   :  { %s6636_s15 = smov 0   ;;  %s6638_s16 = smov 0   ;;  %s8499_s0 = inlined_call_operand.vmem [shape: bf16[2,304,8], index: 0, kind: input, shape index: {}]   ;;  %s8500_s1 = inlined_call_operand.vmem [shape: bf16[9,8,64], index: 1, kind: input, shape index: {}]   ;;  %s8501_s2 = inlined_call_operand.vmem [shape: f32[1,64], index: 2, kind: input, shape index: {}]   ;;  %s8502_s3 = inlined_call_operand.vmem [shape: f32[1,64], index: 3, kind: input, shape index: {}]   ;;  %s8503_s4 = inlined_call_operand.vmem [shape: f32[2,256,64], index: 4, kind: output, shape index: {}]  }
   0x1   :  { %s6640_s17 = smov 0  }
   0x2 LB: > { %s26_s18 = sadd.s32 1, %s6603_s16  ;;  %p5855_p0 = scmp.ge.s32.totalorder %s6607_s17, 1  ;;  %s6607_s17 = sphi %s6640_s17, %s14_s17   ;;  %s6603_s16 = sphi %s6638_s16, %s8668_s16   ;;  %s6599_s15 = sphi %s6636_s15, %s8667_s15  }
   0x3   : > { %p28_p1 = scmp.ge.s32.totalorder %s26_s18, 2  ;;  %p176_p2 = scmp.lt.s32.totalorder %s6607_s17, 3 }
   0x5   : > { %s8670_s18 = smov (%p28_p1, %s26_s18), 0  ;;  %p177_p3 = pnand %p5855_p0, %p176_p2 }
   0x7   : > { %180 = sbr.rel (%p177_p3) target bundleno = 619 (0x26b), region = 36 }
   0xe   : > { %v1216_v0 = vld [vmem:[%s8500_s1] sm:$0xf]  ;;  %vm1418_vm0 = vcmask 1043456   ;;  %p206_p4 = scmp.lt.s32.totalorder %s6599_s15, 1  ;;  %v396_v1 = vlaneseq  ;;  %vm6609_vm1 = vmmov 1   ;;  %vm376_vm3 = vcmask 64512  }
   0xf   : > { %6529 = vmatprep.subr.msk.bf16.mxu1 %vm1418_vm0, %v1216_v0  ;;  %v1420_v2 = vsel %vm1418_vm0, %v1216_v0, 0  ;;  %vm927_vm2 = vmpackc.low %vm6609_vm1, %vm6609_vm1  ;;  %6528 = vmatprep.subr.msk.bf16.mxu0 %vm1418_vm0, %v1216_v0  ;;  %v5910_v4 = vld [vmem:[%s8500_s1 + $0x4] sm:$0xf]  ;;  %v8524_v5 = vmov 0   ;;  %v6677_v8 = vld [vmem:[%s8500_s1 + $0x8] sm:$0xf] }
  0x10   : > { %6527 = vmatpush3.bf16.msra.mxu1 %v1420_v2  ;;  %s8672_s15 = smov (!%p206_p4, %s6599_s15), 1  ;;  %v6662_v3 = vshrl.u32 %v396_v1, 7  ;;  %6221 = vmatpush3.bf16.msra.mxu0 %v1420_v2  ;;  %v6668_v6 = vsel %vm927_vm2, 65537, %v8524_v5  ;;  %v6672_v7 = vsel %vm1418_vm0, %v5910_v4, 0  ;;  %vm1038_vm8 = vsmask.f32 3328 }
  0x11   : > { %6530 = vmatprep.subr.msk.bf16.mxu1 %vm1418_vm0, %v5910_v4  ;;  %s6538_s25 = smul.u32 152, %s8672_s15  ;;  %6531 = vmatprep.subr.msk.bf16.mxu0 %vm1418_vm0, %v6677_v8  ;;  %vm1217_vm2 = vsmask.f32 4352  ;;  %s6066_s23 = sshll.u32 %s8672_s15, 8 }
  0x12   : > { %v411_v9 = vadd.s32 112, %v6662_v3  ;;  %v413_v10 = vadd.s32 128, %v6662_v3  ;;  %v415_v11 = vadd.s32 144, %v6662_v3  ;;  %v417_v12 = vadd.s32 160, %v6662_v3 }
  0x13   : > { %v399_v13 = vadd.s32 16, %v6662_v3  ;;  %v433_v14 = vand.u32 15, %v6662_v3  ;;  %v6689_v15 = vadd.s32 32, %v6662_v3  ;;  %v6692_v16 = vadd.s32 176, %v6662_v3  ;;  %s6697_s28 = scalar_lea.vmem %s8499_s0, %s6538_s25  ;;  %s8319_s25 = scalar_lea.vmem %s8503_s4, %s6066_s23 }
  0x14   : > { %v531_v17 = vand.u32 15, %v411_v9  ;;  %v545_v18 = vand.u32 15, %v413_v10  ;;  %v559_v19 = vand.u32 15, %v415_v11  ;;  %v573_v20 = vand.u32 15, %v417_v12  ;;  %v6565_v21 = vld [vmem:[%s6697_s28 + $0x40] sm:$0xff]   ;;  %v6566_v22 = vld [vmem:[%s6697_s28 + $0x48] sm:$0xff]  }
  0x15   : > { %385 = vst.msk [vmem:[#allocation2 + $0x40] sm:$0xff] %vm376_vm3, %v6565_v21  ;;  %386 = vst.msk [vmem:[#allocation2 + $0x48] sm:$0xff] %vm376_vm3, %v6566_v22  ;;  %v6567_v26 = vld [vmem:[%s6697_s28 + $0x50] sm:$0xff]   ;;  %v447_v27 = vand.u32 15, %v399_v13  ;;  %vm6713_vm11 = vcmp.gt.s32.totalorder %v433_v14, 0  ;;  %v461_v31 = vand.u32 15, %v6689_v15 }
  0x16   : > { %vm844_vm4 = vcmp.gt.s32.totalorder %v531_v17, 0  ;;  %vm846_vm5 = vcmp.gt.s32.totalorder %v545_v18, 0  ;;  %vm6701_vm6 = vcmp.gt.s32.totalorder %v559_v19, 0  ;;  %vm6705_vm9 = vcmp.gt.s32.totalorder %v573_v20, 0  ;;  %387 = vst.msk [vmem:[#allocation2 + $0x50] sm:$0xff] %vm376_vm3, %v6567_v26  ;;  %v6568_v34 = vld [vmem:[%s6697_s28] sm:$0xff]   ;;  %vm926_vm15 = vmpackc.low %vm6713_vm11, %vm6713_vm11 }
  0x17   : > { %vm940_vm7 = vmpackc.low %vm844_vm4, %vm844_vm4  ;;  %vm6730_vm14 = vcmp.gt.s32.totalorder %v447_v27, 0  ;;  %v587_v36 = vand.u32 15, %v6692_v16  ;;  %v6569_v41 = vld [vmem:[%s6697_s28 + $0x8] sm:$0xff]   ;;  %377 = vst.msk [vmem:[#allocation2] sm:$0xff] %vm376_vm3, %v6568_v34  ;;  %v958_v45 = vsel %vm926_vm15, 65537, %v8524_v5  ;;  %v6570_v46 = vld [vmem:[%s6697_s28 + $0x10] sm:$0xff]  }
  0x18   : > { %vm942_vm10 = vmpackc.low %vm846_vm5, %vm846_vm5  ;;  %v972_v25 = vsel %vm940_vm7, 65537, %v8524_v5  ;;  %378 = vst.msk [vmem:[#allocation2 + $0x8] sm:$0xff] %vm376_vm3, %v6569_v41  ;;  %v6571_v59 = vld [vmem:[%s6697_s28 + $0x18] sm:$0xff]   ;;  %v5878_v63 = vcombine.low %v958_v45, %v6668_v6  ;;  %v6572_v4 = vld [vmem:[%s6697_s28 + $0x20] sm:$0xff]   ;;  %vm6763_vm4 = vcmp.gt.s32.totalorder %v461_v31, 0 }
  0x19   : > { %vm944_vm12 = vmpackc.low %vm6701_vm6, %vm6701_vm6  ;;  %v974_v29 = vsel %vm942_vm10, 65537, %v8524_v5  ;;  %v5885_v30 = vcombine.low %v972_v25, %v6668_v6  ;;  %379 = vst.msk [vmem:[#allocation2 + $0x10] sm:$0xff] %vm376_vm3, %v6570_v46  ;;  %vm6767_vm5 = vcmp.gt.s32.totalorder %v587_v36, 0  ;;  %v6573_v16 = vld [vmem:[%s6697_s28 + $0x58] sm:$0xff]   ;;  %v6574_v21 = vld [vmem:[%s6697_s28 + $0x60] sm:$0xff]  }
  0x1a   : > { %v976_v32 = vsel %vm944_vm12, 65537, %v8524_v5  ;;  %v5886_v33 = vcombine.low %v974_v29, %v6668_v6  ;;  %vm946_vm13 = vmpackc.low %vm6705_vm9, %vm6705_vm9  ;;  %380 = vst.msk [vmem:[#allocation2 + $0x18] sm:$0xff] %vm376_vm3, %v6571_v59  ;;  %v1040_v14 = vshrl.u32 %v5878_v63, 16  ;;  %v1043_v15 = vshll.u32 %v5878_v63, 16  ;;  %v6575_v28 = vld [vmem:[%s6697_s28 + $0x68] sm:$0xff]   ;;  %v6576_v46 = vld [vmem:[%s6697_s28 + $0x70] sm:$0xff]  }
  0x1b   : > { %v5887_v37 = vcombine.low %v976_v32, %v6668_v6  ;;  %v1102_v38 = vshrl.u32 %v5885_v30, 16  ;;  %v1105_v39 = vshll.u32 %v5885_v30, 16  ;;  %v978_v40 = vsel %vm946_vm13, 65537, %v8524_v5  ;;  %vm928_vm1 = vmpackc.low %vm6730_vm14, %vm6730_vm14  ;;  %381 = vst.msk [vmem:[#allocation2 + $0x20] sm:$0xff] %vm376_vm3, %v6572_v4  ;;  %v6579_v4 = vld [vmem:[%s6697_s28 + $0x78] sm:$0xff]  }
  0x1c   : > { %v1111_v42 = vshrl.u32 %v5886_v33, 16  ;;  %v1114_v43 = vshll.u32 %v5886_v33, 16  ;;  %v5888_v44 = vcombine.low %v978_v40, %v6668_v6  ;;  %v960_v58 = vsel %vm928_vm1, 65537, %v8524_v5  ;;  %v821_v0 = vld [vmem:[#allocation2 + $0x40] sm:$0xff]  ;;  %v822_v11 = vld [vmem:[#allocation2 + $0x48] sm:$0xff]  ;;  %388 = vst.msk [vmem:[#allocation2 + $0x58] sm:$0xff] %vm376_vm3, %v6573_v16  ;;  %vm930_vm10 = vmpackc.low %vm6763_vm4, %vm6763_vm4 }
  0x1d   : > { %v1104_v47 = vrot.slane %v1102_v38, 4  ;;  %v1107_v48 = vrot.slane %v1105_v39, 5  ;;  %v1120_v49 = vshrl.u32 %v5887_v37, 16  ;;  %v1123_v50 = vshll.u32 %v5887_v37, 16  ;;  %v823_v18 = vld [vmem:[#allocation2 + $0x50] sm:$0xff]  ;;  %389 = vst.msk [vmem:[#allocation2 + $0x60] sm:$0xff] %vm376_vm3, %v6574_v21  ;;  %vm948_vm11 = vmpackc.low %vm6767_vm5, %vm6767_vm5 }
  0x1e   : > { %v1113_v51 = vrot.slane %v1111_v42, 4  ;;  %v1116_v52 = vrot.slane %v1114_v43, 5  ;;  %v1129_v53 = vshrl.u32 %v5888_v44, 16  ;;  %v1132_v54 = vshll.u32 %v5888_v44, 16  ;;  %v813_v32 = vld [vmem:[#allocation2] sm:$0xf8] }
  0x1f   : > { %v6750_v55 = vor.u32 %v1107_v48, %v1104_v47  ;;  %v1122_v56 = vrot.slane %v1120_v49, 4  ;;  %v1125_v57 = vrot.slane %v1123_v50, 5  ;;  %v5879_v2 = vcombine.low %v960_v58, %v6668_v6  ;;  %390 = vst.msk [vmem:[#allocation2 + $0x68] sm:$0xff] %vm376_vm3, %v6575_v28  ;;  %391 = vst.msk [vmem:[#allocation2 + $0x70] sm:$0xff] %vm376_vm3, %v6576_v46 }
  0x20   : > { %v1117_v60 = vor.u32 %v1116_v52, %v1113_v51  ;;  %v1131_v61 = vrot.slane %v1129_v53, 4  ;;  %v1134_v62 = vrot.slane %v1132_v54, 5  ;;  %v1042_v24 = vrot.slane %v1040_v14, 4  ;;  %v6828_v54 = vld [vmem:[%s8500_s1 + $0xc] sm:$0xf]  ;;  %v6580_v14 = vld [vmem:[%s6697_s28 + $0x80] sm:$0xff]  }
  0x21   : > { %v1126_v1 = vor.u32 %v1125_v57, %v1122_v56  ;;  %v1048_v19 = vshrl.u32 %v5879_v2, 16  ;;  %v1051_v20 = vshll.u32 %v5879_v2, 16  ;;  %v1045_v33 = vrot.slane %v1043_v15, 5  ;;  %v6832_v57 = vld [vmem:[#allocation2 + $0x8] sm:$0xff]  ;;  %v6578_v2 = vld [vmem:[%s6697_s28 + $0x30] sm:$0xff]   ;;  %392 = vst.msk [vmem:[#allocation2 + $0x78] sm:$0xff] %vm376_vm3, %v6579_v4 }
  0x22   : > { %v6773_v12 = vsel %vm1038_vm8, %v6750_v55, %v1117_v60  ;;  %v6775_v13 = vor.u32 %v1134_v62, %v1131_v61  ;;  %v962_v48 = vsel %vm930_vm10, 65537, %v8524_v5  ;;  %v980_v49 = vsel %vm948_vm11, 65537, %v8524_v5  ;;  %v6577_v61 = vld [vmem:[%s6697_s28 + $0x28] sm:$0xff]   ;;  %383 = vst.msk [vmem:[#allocation2 + $0x30] sm:$0xff] %vm376_vm3, %v6578_v2  ;;  %393 = vst.msk [vmem:[#allocation2 + $0x80] sm:$0xff] %vm376_vm3, %v6580_v14 }
  0x23   : > { %v6779_v17 = vsel %vm1038_vm8, %v1117_v60, %v1126_v1  ;;  %vm8521_vm6 = vcmp.ne.s16.totalorder %v6773_v12, 0  ;;  %v6806_v40 = vor.u32 %v1045_v33, %v1042_v24  ;;  %v1050_v41 = vrot.slane %v1048_v19, 4  ;;  %382 = vst.msk [vmem:[#allocation2 + $0x28] sm:$0xff] %vm376_vm3, %v6577_v61  ;;  %v6581_v24 = vld [vmem:[%s6697_s28 + $0x38] sm:$0xff]  }
  0x24   : > { %8569 = vst [vmem:[#allocation4_spill] sm:$0xff] %v6779_v17  ;;  %vm8516_vm7 = vcmp.ne.s16.totalorder %v6779_v17, 0  ;;  %v1207_v22 = vsel %vm8521_vm6, %v821_v0, 0  ;;  %v6789_v23 = vsel %vm1038_vm8, %v1126_v1, %v6775_v13  ;;  %v1053_v45 = vrot.slane %v1051_v20, 5  ;;  %384 = vst.msk [vmem:[#allocation2 + $0x38] sm:$0xff] %vm376_vm3, %v6581_v24 }
  0x25   : > { %8570 = vst [vmem:[#allocation5_spill] sm:$0xff] %v6789_v23  ;;  %v1208_v25 = vsel %vm8516_vm7, %v822_v11, 0  ;;  %v1290_v26 = vshrl.u32 %v1207_v22, 16  ;;  %v1293_v27 = vshll.u32 %v1207_v22, 16  ;;  %vm8509_vm9 = vcmp.ne.s16.totalorder %v6789_v23, 0 }
  0x26   : > { %v1299_v29 = vshrl.u32 %v1208_v25, 16  ;;  %v1302_v30 = vshll.u32 %v1208_v25, 16  ;;  %v1209_v31 = vsel %vm8509_vm9, %v823_v18, 0  ;;  %vm1182_vm12 = vcmp.ne.s16.totalorder %v6806_v40, 0 }
  0x27   : > { %v1292_v34 = vrot.slane %v1290_v26, 3  ;;  %v1295_v35 = vrot.slane %v1293_v27, 4  ;;  %v1308_v36 = vshrl.u32 %v1209_v31, 16  ;;  %v1311_v37 = vshll.u32 %v1209_v31, 16  ;;  %v6864_v31 = vld [vmem:[#allocation2 + $0x18] sm:$0xff] }
  0x28   : > { %v1301_v38 = vrot.slane %v1299_v29, 3  ;;  %v1304_v39 = vrot.slane %v1302_v30, 4  ;;  %v1054_v51 = vor.u32 %v1053_v45, %v1050_v41  ;;  %v1199_v52 = vsel %vm1182_vm12, %v813_v32, 0  ;;  %v6862_v30 = vld [vmem:[#allocation2 + $0x10] sm:$0xff] }
  0x29   : > { %v6808_v42 = vor.u32 %v1295_v35, %v1292_v34  ;;  %v1310_v43 = vrot.slane %v1308_v36, 3  ;;  %v1313_v44 = vrot.slane %v1311_v37, 4  ;;  %v5880_v53 = vcombine.low %v962_v48, %v6668_v6 }
  0x2a   : > { %v1305_v47 = vor.u32 %v1304_v39, %v1301_v38  ;;  %v1219_v58 = vshrl.u32 %v1199_v52, 16  ;;  %v1222_v59 = vshll.u32 %v1199_v52, 16  ;;  %v5889_v60 = vcombine.low %v980_v49, %v6668_v6  ;;  %v824_v39 = vld [vmem:[#allocation2 + $0x58] sm:$0xff] }
  0x2b   : > { %v6819_v50 = vor.u32 %v1313_v44, %v1310_v43  ;;  %v6841_v63 = vsel %vm1038_vm8, %v6806_v40, %v1054_v51  ;;  %v1057_v0 = vshrl.u32 %v5880_v53, 16  ;;  %v1060_v1 = vshll.u32 %v5880_v53, 16 }
  0x2c   : > { %v1306_v56 = vsel %vm1217_vm2, %v6808_v42, %v1305_v47  ;;  %vm1183_vm13 = vcmp.ne.s16.totalorder %v6841_v63, 0  ;;  %v1221_v9 = vrot.slane %v1219_v58, 3  ;;  %v1224_v10 = vrot.slane %v1222_v59, 4 }
  0x2d   : > { %6238 = vmatprep.mubr.msk.bf16.mxu1 %vm376_vm3, %v1306_v56  ;;  %v1315_v62 = vsel %vm1217_vm2, %v1305_v47, %v6819_v50  ;;  %v1138_v11 = vshrl.u32 %v5889_v60, 16  ;;  %v1200_v15 = vsel %vm1183_vm13, %v6832_v57, 0  ;;  %v1059_v16 = vrot.slane %v1057_v0, 4 }
  0x2e   : > { %6239 = vmatmul.mubr.msk.bf16.vlgmr.msra.gmra.mrb[0].mxu1 %vm376_vm3, %v1315_v62  ;;  %v1062_v18 = vrot.slane %v1060_v1, 5  ;;  %v1141_v19 = vshll.u32 %v5889_v60, 16  ;;  %v1227_v20 = vshrl.u32 %v1200_v15, 16  ;;  %v1230_v21 = vshll.u32 %v1200_v15, 16 }
  0x2f   : > { %6255 = vmatpush3.bf16.msra.mxu1 %v6672_v7  ;;  %v1140_v22 = vrot.slane %v1138_v11, 4  ;;  %v1225_v7 = vor.u32 %v1224_v10, %v1221_v9  ;;  %v421_v27 = vadd.s32 192, %v6662_v3  ;;  %v403_v32 = vadd.s32 48, %v6662_v3 }
  0x30   : > { %6532 = vmatprep.subr.msk.bf16.mxu1 %vm1418_vm0, %v6828_v54  ;;  %v6859_v25 = vor.u32 %v1062_v18, %v1059_v16  ;;  %v1143_v26 = vrot.slane %v1141_v19, 5  ;;  %v1229_v28 = vrot.slane %v1227_v20, 3  ;;  %v1232_v29 = vrot.slane %v1230_v21, 4  ;;  %v6928_v20 = vld [vmem:[%s8500_s1 + $0x10] sm:$0xf] }
  0x31   : > { %v405_v33 = vadd.s32 64, %v6662_v3  ;;  %v601_v36 = vand.u32 15, %v421_v27  ;;  %v2599_v37 = vsel %vm1418_vm0, %v6677_v8, 0  ;;  %v475_v41 = vand.u32 15, %v403_v32 }
  0x32   : > { %v6871_v34 = vsel %vm1038_vm8, %v1054_v51, %v6859_v25  ;;  %v6873_v35 = vor.u32 %v1143_v26, %v1140_v22  ;;  %v1233_v38 = vor.u32 %v1232_v29, %v1229_v28  ;;  %v423_v8 = vadd.s32 208, %v6662_v3 }
  0x33   : > { %8571 = vst [vmem:[#allocation6_spill] sm:$0xff] %v6871_v34  ;;  %vm8504_vm14 = vcmp.ne.s16.totalorder %v6871_v34, 0  ;;  %v489_v43 = vand.u32 15, %v405_v33  ;;  %vm854_vm1 = vcmp.gt.s32.totalorder %v601_v36, 0  ;;  %vm6897_vm4 = vcmp.gt.s32.totalorder %v475_v41, 0 }
  0x34   : > { %v1201_v44 = vsel %vm8504_vm14, %v6862_v30, 0  ;;  %v6884_v45 = vsel %vm8504_vm14, %v6864_v31, 0  ;;  %v6889_v46 = vsel %vm1038_vm8, %v6775_v13, %v6873_v35  ;;  %v1234_v47 = vsel %vm1217_vm2, %v1225_v7, %v1233_v38  ;;  %vm950_vm10 = vmpackc.low %vm854_vm1, %vm854_vm1  ;;  %v6981_v7 = vld [vmem:[#allocation2 + $0x68] sm:$0xff] }
  0x35   : > { %v1236_v48 = vshrl.u32 %v1201_v44, 16  ;;  %v1239_v49 = vshll.u32 %v1201_v44, 16  ;;  %vm8508_vm15 = vcmp.ne.s16.totalorder %v6889_v46, 0  ;;  %6222 = vmatprep.mubr.msk.bf16.mxu0 %vm376_vm3, %v1234_v47  ;;  %vm6901_vm5 = vcmp.gt.s32.totalorder %v489_v43, 0  ;;  %vm932_vm11 = vmpackc.low %vm6897_vm4, %vm6897_vm4  ;;  %v825_v43 = vld [vmem:[#allocation2 + $0x60] sm:$0xff] }
  0x36   : > { %v1210_v51 = vsel %vm8508_vm15, %v824_v39, 0  ;;  %v982_v60 = vsel %vm950_vm10, 65537, %v8524_v5  ;;  %v615_v61 = vand.u32 15, %v423_v8  ;;  %v425_v62 = vadd.s32 224, %v6662_v3  ;;  %vm934_vm1 = vmpackc.low %vm6901_vm5, %vm6901_vm5 }
  0x37   : > { %v1238_v53 = vrot.slane %v1236_v48, 3  ;;  %v1241_v56 = vrot.slane %v1239_v49, 4  ;;  %v1317_v58 = vshrl.u32 %v1210_v51, 16  ;;  %v1320_v59 = vshll.u32 %v1210_v51, 16 }
  0x38   : > { %v6911_v0 = vadd.s32 80, %v6662_v3  ;;  %v5890_v9 = vcombine.low %v982_v60, %v6668_v6  ;;  %v964_v10 = vsel %vm932_vm11, 65537, %v8524_v5  ;;  %v966_v11 = vsel %vm934_vm1, 65537, %v8524_v5 }
  0x39   : > { %v6913_v1 = vor.u32 %v1241_v56, %v1238_v53  ;;  %v1319_v2 = vrot.slane %v1317_v58, 3  ;;  %v1322_v4 = vrot.slane %v1320_v59, 4  ;;  %vm856_vm4 = vcmp.gt.s32.totalorder %v615_v61, 0  ;;  %v6958_v59 = vld [vmem:[#allocation2 + $0x20] sm:$0xff] }
  0x3a   : > { %v629_v14 = vand.u32 15, %v425_v62  ;;  %v1147_v18 = vshrl.u32 %v5890_v9, 16  ;;  %v1150_v19 = vshll.u32 %v5890_v9, 16  ;;  %vm952_vm10 = vmpackc.low %vm856_vm4, %vm856_vm4  ;;  %v5881_v21 = vcombine.low %v964_v10, %v6668_v6 }
  0x3b   : > { %v1243_v15 = vsel %vm1217_vm2, %v1233_v38, %v6913_v1  ;;  %v6923_v16 = vor.u32 %v1322_v4, %v1319_v2  ;;  %v5882_v22 = vcombine.low %v966_v11, %v6668_v6  ;;  %v984_v24 = vsel %vm952_vm10, 65537, %v8524_v5 }
  0x3c   : > { %6223 = vmatmul.mubr.msk.bf16.vlgmr.msra.gmra.mrb[0].mxu0 %vm376_vm3, %v1243_v15  ;;  %vm6934_vm5 = vcmp.gt.s32.totalorder %v629_v14, 0  ;;  %v1149_v27 = vrot.slane %v1147_v18, 4  ;;  %v1152_v28 = vrot.slane %v1150_v19, 5  ;;  %v5891_v29 = vcombine.low %v984_v24, %v6668_v6 }
  0x3d   : > { %v1324_v26 = vsel %vm1217_vm2, %v6819_v50, %v6923_v16  ;;  %6289 = vmatpush3.bf16.msra.mxu0 %v2599_v37  ;;  %vm954_vm11 = vmpackc.low %vm6934_vm5, %vm6934_vm5  ;;  %v1066_v32 = vshrl.u32 %v5881_v21, 16  ;;  %v1069_v33 = vshll.u32 %v5881_v21, 16  ;;  %v1075_v36 = vshrl.u32 %v5882_v22, 16 }
  0x3e   : > { %6242 = vmatprep.mubr.msk.bf16.mxu1 %vm376_vm3, %v1324_v26  ;;  %v1078_v38 = vshll.u32 %v5882_v22, 16  ;;  %6533 = vmatprep.subr.msk.bf16.mxu0 %vm1418_vm0, %v6928_v20  ;;  %v1153_v39 = vor.u32 %v1152_v28, %v1149_v27  ;;  %v1156_v50 = vshrl.u32 %v5891_v29, 16  ;;  %v1159_v41 = vshll.u32 %v5891_v29, 16 }
  0x3f   : > { %v986_v37 = vsel %vm954_vm11, 65537, %v8524_v5  ;;  %v1068_v44 = vrot.slane %v1066_v32, 4  ;;  %v1071_v8 = vrot.slane %v1069_v33, 5  ;;  %v1077_v47 = vrot.slane %v1075_v36, 4 }
  0x40   : > { %v1080_v48 = vrot.slane %v1078_v38, 5  ;;  %v6951_v49 = vsel %vm1038_vm8, %v6873_v35, %v1153_v39  ;;  %v1158_v51 = vrot.slane %v1156_v50, 4  ;;  %v1161_v52 = vrot.slane %v1159_v41, 5 }
  0x41   : > { %v5892_v13 = vcombine.low %v986_v37, %v6668_v6  ;;  %vm8507_vm1 = vcmp.ne.s16.totalorder %v6951_v49, 0  ;;  %v1072_v53 = vor.u32 %v1071_v8, %v1068_v44  ;;  %v503_v58 = vand.u32 15, %v6911_v0  ;;  %v6995_v8 = vld [vmem:[#allocation2 + $0x70] sm:$0xff] }
  0x42   : > { %v6955_v56 = vor.u32 %v1080_v48, %v1077_v47  ;;  %v1211_v60 = vsel %vm8507_vm1, %v825_v43, 0  ;;  %v1162_v61 = vor.u32 %v1161_v52, %v1158_v51  ;;  %v409_v48 = vadd.s32 96, %v6662_v3  ;;  %v1616_v52 = vld [vmem:[#allocation2] sm:$0xf0] }
  0x43   : > { %v1165_v62 = vshrl.u32 %v5892_v13, 16  ;;  %v1168_v35 = vshll.u32 %v5892_v13, 16  ;;  %v1326_v2 = vshrl.u32 %v1211_v60, 16  ;;  %v1329_v4 = vshll.u32 %v1211_v60, 16 }
  0x44   : > { %v6964_v9 = vsel %vm1038_vm8, %v6859_v25, %v1072_v53  ;;  %v6968_v10 = vsel %vm1038_vm8, %v1072_v53, %v6955_v56  ;;  %v6973_v0 = vsel %vm1038_vm8, %v1153_v39, %v1162_v61  ;;  %vm840_vm11 = vcmp.gt.s32.totalorder %v503_v58, 0 }
  0x45   : > { %vm1185_vm4 = vcmp.ne.s16.totalorder %v6964_v9, 0  ;;  %vm1186_vm10 = vcmp.ne.s16.totalorder %v6968_v10, 0  ;;  %v1167_v11 = vrot.slane %v1165_v62, 4  ;;  %v1328_v14 = vrot.slane %v1326_v2, 3  ;;  %vm936_vm14 = vmpackc.low %vm840_vm11, %vm840_vm11 }
  0x46   : > { %v1331_v15 = vrot.slane %v1329_v4, 4  ;;  %v1202_v18 = vsel %vm1185_vm4, %v6864_v31, 0  ;;  %v1203_v25 = vsel %vm1186_vm10, %v6958_v59, 0  ;;  %vm8505_vm5 = vcmp.ne.s16.totalorder %v6973_v0, 0 }
  0x47   : > { %v1245_v19 = vshrl.u32 %v1202_v18, 16  ;;  %v1248_v21 = vshll.u32 %v1202_v18, 16  ;;  %v1254_v22 = vshrl.u32 %v1203_v25, 16  ;;  %v1257_v24 = vshll.u32 %v1203_v25, 16 }
  0x48   : > { %v1332_v26 = vor.u32 %v1331_v15, %v1328_v14  ;;  %v1170_v27 = vrot.slane %v1168_v35, 5  ;;  %v1212_v38 = vsel %vm8505_vm5, %v6981_v7, 0  ;;  %v968_v50 = vsel %vm936_vm14, 65537, %v8524_v5 }
  0x49   : > { %v1247_v28 = vrot.slane %v1245_v19, 3  ;;  %v1250_v29 = vrot.slane %v1248_v21, 4  ;;  %v1256_v32 = vrot.slane %v1254_v22, 3  ;;  %v1259_v33 = vrot.slane %v1257_v24, 4 }
  0x4a   : > { %v1333_v36 = vsel %vm1217_vm2, %v6923_v16, %v1332_v26  ;;  %v6989_v39 = vor.u32 %v1170_v27, %v1167_v11  ;;  %v1335_v43 = vshrl.u32 %v1212_v38, 16  ;;  %v1338_v44 = vshll.u32 %v1212_v38, 16 }
  0x4b   : > { %6243 = vmatmul.mubr.msk.bf16.gmra.mrb[4].mxu1 %vm376_vm3, %v1333_v36  ;;  %v1251_v41 = vor.u32 %v1250_v29, %v1247_v28  ;;  %v6993_v37 = vor.u32 %v1259_v33, %v1256_v32  ;;  %v5883_v47 = vcombine.low %v968_v50, %v6668_v6  ;;  %v427_v51 = vadd.s32 240, %v6662_v3  ;;  %v7022_v32 = vld [vmem:[#allocation2 + $0x28] sm:$0xff] }
  0x4c   : > { %v6999_v16 = vsel %vm1038_vm8, %v1162_v61, %v6989_v39  ;;  %v1337_v58 = vrot.slane %v1335_v43, 3  ;;  %v1340_v60 = vrot.slane %v1338_v44, 4  ;;  %v517_v35 = vand.u32 15, %v409_v48 }
  0x4d   : > { %8578 = vst [vmem:[#allocation7_spill] sm:$0xff] %v6999_v16  ;;  %v1252_v13 = vsel %vm1217_vm2, %v6913_v1, %v1251_v41  ;;  %v1261_v53 = vsel %vm1217_vm2, %v1251_v41, %v6993_v37  ;;  %vm8506_vm14 = vcmp.ne.s16.totalorder %v6999_v16, 0  ;;  %v1084_v61 = vshrl.u32 %v5883_v47, 16 }
  0x4e   : > { %6226 = vmatprep.mubr.msk.bf16.mxu0 %vm376_vm3, %v1252_v13  ;;  %v1087_v62 = vshll.u32 %v5883_v47, 16  ;;  %v1341_v2 = vor.u32 %v1340_v60, %v1337_v58  ;;  %v1213_v4 = vsel %vm8506_vm14, %v6995_v8, 0  ;;  %v643_v1 = vand.u32 15, %v427_v51 }
  0x4f   : > { %6227 = vmatmul.mubr.msk.bf16.gmra.mrb[4].mxu0 %vm376_vm3, %v1261_v53  ;;  %v1653_v11 = vrot.slane %v1616_v52, 4  ;;  %v1344_v14 = vshrl.u32 %v1213_v4, 16  ;;  %v1347_v15 = vshll.u32 %v1213_v4, 16  ;;  %v1086_v18 = vrot.slane %v1084_v61, 4 }
  0x50   : > { %v1089_v25 = vrot.slane %v1087_v62, 5  ;;  %v1342_v19 = vsel %vm1217_vm2, %v1332_v26, %v1341_v2  ;;  %vm842_vm11 = vcmp.gt.s32.totalorder %v517_v35, 0  ;;  %vm7015_vm5 = vcmp.gt.s32.totalorder %v643_v1, 0 }
  0x51   : > { %v1654_v22 = vrot.slane %v6832_v57, 4  ;;  %6246 = vmatprep.mubr.msk.bf16.mxu1 %vm376_vm3, %v1342_v19  ;;  %v1346_v24 = vrot.slane %v1344_v14, 3  ;;  %v1349_v27 = vrot.slane %v1347_v15, 4  ;;  %vm938_vm14 = vmpackc.low %vm842_vm11, %vm842_vm11  ;;  %v1656_v29 = vrot.slane %v6862_v30, 4 }
  0x52   : > { %v1090_v28 = vor.u32 %v1089_v25, %v1086_v18  ;;  %v970_v33 = vsel %vm938_vm14, 65537, %v8524_v5  ;;  %vm956_vm1 = vmpackc.low %vm7015_vm5, %vm7015_vm5  ;;  %v7033_v36 = vsel %vm1418_vm0, %v6828_v54, 0  ;;  %v398_v38 = vadd.s32 8, %v6662_v3 }
  0x53   : > { %v7029_v26 = vsel %vm1418_vm0, %v1653_v11, %v1654_v22  ;;  %v7036_v50 = vor.u32 %v1349_v27, %v1346_v24  ;;  %v5884_v43 = vcombine.low %v970_v33, %v6668_v6  ;;  %v988_v44 = vsel %vm956_vm1, 65537, %v8524_v5  ;;  %v829_v27 = vld [vmem:[#allocation2 + $0x80] sm:$0xf] }
  0x54   : > { %v7040_v41 = vsel %vm1038_vm8, %v6955_v56, %v1090_v28  ;;  %v5893_v47 = vcombine.low %v988_v44, %v6668_v6  ;;  %v7047_v48 = vsel %vm1418_vm0, %v1654_v22, %v1656_v29  ;;  %v400_v54 = vadd.s32 24, %v6662_v3  ;;  %v7061_v22 = vld [vmem:[#allocation2 + $0x30] sm:$0xff]  ;;  %v7070_v44 = vld [vmem:[#allocation2 + $0x78] sm:$0xff] }
  0x55   : > { %vm1187_vm5 = vcmp.ne.s16.totalorder %v7040_v41, 0  ;;  %v1351_v51 = vsel %vm1217_vm2, %v1341_v2, %v7036_v50  ;;  %v1093_v52 = vshrl.u32 %v5884_v43, 16  ;;  %v1096_v13 = vshll.u32 %v5884_v43, 16 }
  0x56   : > { %v1204_v56 = vsel %vm1187_vm5, %v7022_v32, 0  ;;  %6247 = vmatmul.mubr.msk.bf16.gmra.mrb[8].mxu1 %vm376_vm3, %v1351_v51  ;;  %v1174_v60 = vshrl.u32 %v5893_v47, 16  ;;  %v1177_v61 = vshll.u32 %v5893_v47, 16  ;;  %v440_v4 = vand.u32 15, %v398_v38 }
  0x57   : > { %v1263_v53 = vshrl.u32 %v1204_v56, 16  ;;  %v1266_v58 = vshll.u32 %v1204_v56, 16  ;;  %v1095_v62 = vrot.slane %v1093_v52, 4  ;;  %v1098_v35 = vrot.slane %v1096_v13, 5 }
  0x58   : > { %v454_v1 = vand.u32 15, %v400_v54  ;;  %v1176_v15 = vrot.slane %v1174_v60, 4  ;;  %v1179_v2 = vrot.slane %v1177_v61, 5  ;;  %vm2012_vm1 = vcmp.lt.s32.totalorder %v440_v4, 15 }
  0x59   : > { %v1265_v11 = vrot.slane %v1263_v53, 3  ;;  %v1268_v14 = vrot.slane %v1266_v58, 4  ;;  %v1099_v18 = vor.u32 %v1098_v35, %v1095_v62  ;;  %v8511_v19 = vrot.slane %v6864_v31, 4  ;;  %vm2108_vm11 = vmpackc.low %vm2012_vm1, %vm2012_vm1 }
  0x5a   : > { %vm7056_vm14 = vcmp.lt.s32.totalorder %v454_v1, 15  ;;  %v7063_v24 = vor.u32 %v1179_v2, %v1176_v15  ;;  %v402_v33 = vadd.s32 40, %v6662_v3  ;;  %v2140_v54 = vsel %vm2108_vm11, 65537, %v8524_v5 }
  0x5b   : > { %v1269_v21 = vor.u32 %v1268_v14, %v1265_v11  ;;  %v7068_v43 = vsel %vm1038_vm8, %v1090_v28, %v1099_v18  ;;  %v7074_v47 = vsel %vm1038_vm8, %v1099_v18, %v6750_v55  ;;  %v7080_v51 = vsel %vm1418_vm0, %v1656_v29, %v8511_v19  ;;  %v7091_v55 = vld [vmem:[#allocation2 + $0x38] sm:$0xff] }
  0x5c   : > { %8583 = vst [vmem:[#allocation8_spill] sm:$0xff] %v7063_v24  ;;  %vm1188_vm1 = vcmp.ne.s16.totalorder %v7068_v43, 0  ;;  %v7088_v28 = vsel %vm1038_vm8, %v6989_v39, %v7063_v24  ;;  %vm8510_vm15 = vcmp.ne.s16.totalorder %v7063_v24, 0  ;;  %vm8522_vm9 = vcmp.ne.s16.totalorder %v7074_v47, 0 }
  0x5d   : > { %v1270_v56 = vsel %vm1217_vm2, %v6993_v37, %v1269_v21  ;;  %8584 = vst [vmem:[#allocation9_spill] sm:$0xff] %v7088_v28  ;;  %v1205_v29 = vsel %vm1188_vm1, %v7061_v22, 0  ;;  %vm8514_vm11 = vcmp.ne.s16.totalorder %v7088_v28, 0  ;;  %v1215_v37 = vsel %vm8510_vm15, %v829_v27, 0  ;;  %vm2110_vm15 = vmpackc.low %vm7056_vm14, %vm7056_vm14 }
  0x5e   : > { %6230 = vmatprep.mubr.msk.bf16.mxu0 %vm376_vm3, %v1270_v56  ;;  %v1272_v52 = vshrl.u32 %v1205_v29, 16  ;;  %v1275_v39 = vshll.u32 %v1205_v29, 16  ;;  %v1214_v13 = vsel %vm8514_vm11, %v7070_v44, 0  ;;  %v1362_v53 = vshrl.u32 %v1215_v37, 16 }
  0x5f   : > { %v1353_v58 = vshrl.u32 %v1214_v13, 16  ;;  %v1356_v60 = vshll.u32 %v1214_v13, 16  ;;  %v1365_v61 = vshll.u32 %v1215_v37, 16  ;;  %v1206_v62 = vsel %vm8522_vm9, %v7091_v55, 0 }
  0x60   : > { %v1274_v35 = vrot.slane %v1272_v52, 3  ;;  %v1277_v4 = vrot.slane %v1275_v39, 4  ;;  %v1364_v1 = vrot.slane %v1362_v53, 3  ;;  %v1281_v11 = vshrl.u32 %v1206_v62, 16 }
  0x61   : > { %v1355_v14 = vrot.slane %v1353_v58, 3  ;;  %v1358_v15 = vrot.slane %v1356_v60, 4  ;;  %v1367_v2 = vrot.slane %v1365_v61, 4  ;;  %v1284_v18 = vshll.u32 %v1206_v62, 16 }
  0x62   : > { %v1278_v27 = vor.u32 %v1277_v4, %v1274_v35  ;;  %v1283_v56 = vrot.slane %v1281_v11, 3  ;;  %v2142_v29 = vsel %vm2110_vm15, 65537, %v8524_v5  ;;  %v5927_v37 = vcombine.low %v6668_v6, %v2140_v54 }
  0x63   : > { %v1359_v13 = vor.u32 %v1358_v15, %v1355_v14  ;;  %v1368_v19 = vor.u32 %v1367_v2, %v1364_v1  ;;  %v1286_v38 = vrot.slane %v1284_v18, 4  ;;  %v5928_v25 = vcombine.low %v6668_v6, %v2142_v29  ;;  %v6582_v29 = vld [vmem:[%s6697_s28 + $0x88] sm:$0xff]  }
  0x64   : > { %v1279_v52 = vsel %vm1217_vm2, %v1269_v21, %v1278_v27  ;;  %v2220_v39 = vshrl.u32 %v5927_v37, 16  ;;  %v2223_v53 = vshll.u32 %v5927_v37, 16  ;;  %v468_v34 = vand.u32 15, %v402_v33  ;;  %394 = vst.msk [vmem:[#allocation2 + $0x88] sm:$0xff] %vm376_vm3, %v6582_v29 }
  0x65   : > { %6231 = vmatmul.mubr.msk.bf16.gmra.mrb[8].mxu0 %vm376_vm3, %v1279_v52  ;;  %v1360_v58 = vsel %vm1217_vm2, %v7036_v50, %v1359_v13  ;;  %v1369_v60 = vsel %vm1217_vm2, %v1359_v13, %v1368_v19  ;;  %v1287_v61 = vor.u32 %v1286_v38, %v1283_v56  ;;  %v2228_v62 = vshrl.u32 %v5928_v25, 16 }
  0x66   : > { %6250 = vmatprep.mubr.msk.bf16.mxu1 %vm376_vm3, %v1360_v58  ;;  %v2222_v54 = vrot.slane %v2220_v39, 3  ;;  %v2225_v35 = vrot.slane %v2223_v53, 4  ;;  %v2231_v4 = vshll.u32 %v5928_v25, 16  ;;  %vm2016_vm15 = vcmp.lt.s32.totalorder %v468_v34, 15  ;;  %v1994_v34 = vld [vmem:[#allocation2] sm:$0xf0] }
  0x67   : > { %6251 = vmatmul.mubr.msk.bf16.gmra.mrb[12].mxu1 %vm376_vm3, %v1369_v60  ;;  %v1288_v21 = vsel %vm1217_vm2, %v1278_v27, %v1287_v61  ;;  %v1297_v33 = vsel %vm1217_vm2, %v1287_v61, %v6808_v42  ;;  %v2230_v1 = vrot.slane %v2228_v62, 3  ;;  %vm2112_vm14 = vmpackc.low %vm2016_vm15, %vm2016_vm15  ;;  %v8585_v50 = vrot.slane %v6958_v59, 4 }
  0x68   : > { %v8586_v19 = vrot.slane %v6864_v31, 4  ;;  %6234 = vmatprep.mubr.msk.bf16.mxu0 %vm376_vm3, %v1288_v21  ;;  %6256 = vmatprep.mubr.msk.bf16.mxu1 %vm376_vm3, %v7029_v26  ;;  %v7133_v11 = vor.u32 %v2225_v35, %v2222_v54  ;;  %v2233_v14 = vrot.slane %v2231_v4, 4  ;;  %v2144_v42 = vsel %vm2112_vm14, 65537, %v8524_v5 }
  0x69   : > { %v7138_v15 = vsel %vm1418_vm0, %v6928_v20, 0  ;;  %v5929_v2 = vcombine.low %v6668_v6, %v2144_v42  ;;  %v404_v18 = vadd.s32 56, %v6662_v3  ;;  %v1662_v27 = vrot.slane %v7022_v32, 4 }
  0x6a   : > { %v7128_v38 = vsel %vm1418_vm0, %v8586_v19, %v8585_v50  ;;  %v406_v56 = vadd.s32 72, %v6662_v3  ;;  %v2234_v26 = vor.u32 %v2233_v14, %v2230_v1  ;;  %vm8513_vm15 = vcmp.ne.s16.totalorder %v7133_v11, 0  ;;  %v7166_v19 = vld [vmem:[%s8500_s1 + $0x14] sm:$0xf] }
  0x6b   : > { %v1664_v37 = vrot.slane %v7061_v22, 4  ;;  %v408_v13 = vadd.s32 88, %v6662_v3  ;;  %v2379_v20 = vsel %vm8513_vm15, %v1994_v34, 0  ;;  %v2237_v25 = vshrl.u32 %v5929_v2, 16 }
  0x6c   : > { %v2240_v52 = vshll.u32 %v5929_v2, 16  ;;  %v482_v39 = vand.u32 15, %v404_v18  ;;  %v7153_v53 = vsel %vm1217_vm2, %v7133_v11, %v2234_v26  ;;  %v2399_v58 = vshrl.u32 %v2379_v20, 16 }
  0x6d   : > { %v2402_v60 = vshll.u32 %v2379_v20, 16  ;;  %v8587_v61 = vmov %v8585_v50  ;;  %6235 = vmatmul.mubr.msk.bf16.gmra.mrb[12].mxu0 %vm376_vm3, %v1297_v33  ;;  %vm8515_vm14 = vcmp.ne.s16.totalorder %v7153_v53, 0  ;;  %v2239_v54 = vrot.slane %v2237_v25, 3 }
  0x6e   : > { %v1663_v62 = vsel %vm1418_vm0, %v8587_v61, %v1662_v27  ;;  %v2242_v35 = vrot.slane %v2240_v52, 4  ;;  %vm2018_vm15 = vcmp.lt.s32.totalorder %v482_v39, 15  ;;  %v2380_v4 = vsel %vm8515_vm14, %v6832_v57, 0 }
  0x6f   : > { %v2401_v21 = vrot.slane %v2399_v58, 4  ;;  %v2404_v1 = vrot.slane %v2402_v60, 5  ;;  %vm2114_vm11 = vmpackc.low %vm2018_vm15, %vm2018_vm15  ;;  %v496_v50 = vand.u32 15, %v406_v56  ;;  %6257 = vmatmul.mubr.msk.bf16.vlgmr.msra.gmra.mrb[16].mxu1 %vm376_vm3, %v7047_v48  ;;  %v2407_v33 = vshrl.u32 %v2380_v4, 16 }
  0x70   : > { %v2410_v34 = vshll.u32 %v2380_v4, 16  ;;  %v2243_v14 = vor.u32 %v2242_v35, %v2239_v54  ;;  %v2146_v42 = vsel %vm2114_vm11, 65537, %v8524_v5  ;;  %6323 = vmatpush3.bf16.msra.mxu1 %v7033_v36  ;;  %6260 = vmatprep.mubr.msk.bf16.mxu1 %vm376_vm3, %v7080_v51  ;;  %v7178_v18 = vsel %vm1418_vm0, %v1662_v27, %v1664_v37 }
  0x71   : > { %v2405_v57 = vor.u32 %v2404_v1, %v2401_v21  ;;  %v5930_v2 = vcombine.low %v6668_v6, %v2146_v42  ;;  %vm2020_vm15 = vcmp.lt.s32.totalorder %v496_v50, 15  ;;  %v2409_v48 = vrot.slane %v2407_v33, 4  ;;  %6534 = vmatprep.subr.msk.bf16.mxu1 %vm1418_vm0, %v7166_v19 }
  0x72   : > { %v2412_v56 = vrot.slane %v2410_v34, 5  ;;  %v7181_v29 = vsel %vm1217_vm2, %v2234_v26, %v2243_v14  ;;  %vm2116_vm11 = vmpackc.low %vm2020_vm15, %vm2020_vm15  ;;  %v510_v20 = vand.u32 15, %v408_v13  ;;  %v1666_v42 = vrot.slane %v7091_v55, 4 }
  0x73   : > { %vm8520_vm14 = vcmp.ne.s16.totalorder %v7181_v29, 0  ;;  %v2246_v36 = vshrl.u32 %v5930_v2, 16  ;;  %v2249_v51 = vshll.u32 %v5930_v2, 16  ;;  %v2148_v25 = vsel %vm2116_vm11, 65537, %v8524_v5 }
  0x74   : > { %v2413_v52 = vor.u32 %v2412_v56, %v2409_v48  ;;  %v2381_v27 = vsel %vm8520_vm14, %v6862_v30, 0  ;;  %v5931_v39 = vcombine.low %v6668_v6, %v2148_v25  ;;  %vm2022_vm7 = vcmp.lt.s32.totalorder %v510_v20, 15  ;;  %v7207_v25 = vld [vmem:[#allocation2 + $0x40] sm:$0xff] }
  0x75   : > { %v2416_v26 = vshrl.u32 %v2381_v27, 16  ;;  %v2419_v58 = vshll.u32 %v2381_v27, 16  ;;  %v2248_v13 = vrot.slane %v2246_v36, 3  ;;  %v2251_v60 = vrot.slane %v2249_v51, 4  ;;  %vm2118_vm15 = vmpackc.low %vm2022_vm7, %vm2022_vm7 }
  0x76   : > { %v2414_v61 = vsel %vm1038_vm8, %v2405_v57, %v2413_v52  ;;  %v2255_v54 = vshrl.u32 %v5931_v39, 16  ;;  %v2258_v35 = vshll.u32 %v5931_v39, 16  ;;  %v2150_v4 = vsel %vm2118_vm15, 65537, %v8524_v5 }
  0x77   : > { %6290 = vmatprep.mubr.msk.bf16.mxu0 %vm376_vm3, %v2414_v61  ;;  %v2418_v21 = vrot.slane %v2416_v26, 4  ;;  %v2421_v1 = vrot.slane %v2419_v58, 5  ;;  %v2252_v50 = vor.u32 %v2251_v60, %v2248_v13  ;;  %v5932_v30 = vcombine.low %v6668_v6, %v2150_v4  ;;  %6261 = vmatmul.mubr.msk.bf16.gmra.mrb[20].mxu1 %vm376_vm3, %v7128_v38  ;;  %v7216_v26 = vld [vmem:[%s8500_s1 + $0x18] sm:$0xf] }
  0x78   : > { %v2257_v33 = vrot.slane %v2255_v54, 3  ;;  %v2260_v34 = vrot.slane %v2258_v35, 4  ;;  %v410_v57 = vadd.s32 104, %v6662_v3  ;;  %6264 = vmatprep.mubr.msk.bf16.mxu1 %vm376_vm3, %v1663_v62  ;;  %v1667_v38 = vsel %vm1418_vm0, %v1664_v37, %v1666_v42 }
  0x79   : > { %v2422_v2 = vor.u32 %v2421_v1, %v2418_v21  ;;  %v7200_v48 = vsel %vm1217_vm2, %v2243_v14, %v2252_v50  ;;  %v2264_v56 = vshrl.u32 %v5932_v30, 16  ;;  %v2267_v20 = vshll.u32 %v5932_v30, 16 }
  0x7a   : > { %vm8517_vm7 = vcmp.ne.s16.totalorder %v7200_v48, 0  ;;  %v2261_v36 = vor.u32 %v2260_v34, %v2257_v33  ;;  %v524_v51 = vand.u32 15, %v410_v57  ;;  %v412_v60 = vadd.s32 120, %v6662_v3  ;;  %v7243_v34 = vld [vmem:[#allocation2 + $0x48] sm:$0xff] }
  0x7b   : > { %v2423_v27 = vsel %vm1038_vm8, %v2413_v52, %v2422_v2  ;;  %v2382_v14 = vsel %vm8517_vm7, %v6864_v31, 0  ;;  %v2266_v39 = vrot.slane %v2264_v56, 3  ;;  %v2269_v62 = vrot.slane %v2267_v20, 4 }
  0x7c   : > { %6291 = vmatmul.mubr.msk.bf16.vlgmr.msra.gmra.mrb[16].mxu0 %vm376_vm3, %v2423_v27  ;;  %v2425_v58 = vshrl.u32 %v2382_v14, 16  ;;  %v2428_v37 = vshll.u32 %v2382_v14, 16  ;;  %v7220_v13 = vsel %vm1217_vm2, %v2252_v50, %v2261_v36  ;;  %vm2024_vm11 = vcmp.lt.s32.totalorder %v524_v51, 15 }
  0x7d   : > { %8588 = vst [vmem:[#allocation10_spill] sm:$0xff] %v7220_v13  ;;  %6357 = vmatpush3.bf16.msra.mxu0 %v7138_v15  ;;  %vm8519_vm15 = vcmp.ne.s16.totalorder %v7220_v13, 0  ;;  %v2270_v31 = vor.u32 %v2269_v62, %v2266_v39  ;;  %vm2120_vm7 = vmpackc.low %vm2024_vm11, %vm2024_vm11  ;;  %v7225_v52 = vrot.slane %v7207_v25, 4  ;;  %v538_v33 = vand.u32 15, %v412_v60  ;;  %v7250_v39 = vld [vmem:[#allocation2 + $0x50] sm:$0xff] }
  0x7e   : > { %v2427_v61 = vrot.slane %v2425_v58, 4  ;;  %v2430_v54 = vrot.slane %v2428_v37, 5  ;;  %v2383_v35 = vsel %vm8519_vm15, %v6958_v59, 0  ;;  %v2152_v4 = vsel %vm2120_vm7, 65537, %v8524_v5  ;;  %6535 = vmatprep.subr.msk.bf16.mxu0 %vm1418_vm0, %v7216_v26 }
  0x7f   : > { %v2434_v15 = vshrl.u32 %v2383_v35, 16  ;;  %v2437_v21 = vshll.u32 %v2383_v35, 16  ;;  %v7235_v1 = vsel %vm1217_vm2, %v2261_v36, %v2270_v31  ;;  %v5933_v50 = vcombine.low %v6668_v6, %v2152_v4  ;;  %6265 = vmatmul.mubr.msk.bf16.gmra.mrb[24].mxu1 %vm376_vm3, %v7178_v18 }
  0x80   : > { %8589 = vst [vmem:[#allocation11_spill] sm:$0xff] %v7235_v1  ;;  %v2431_v30 = vor.u32 %v2430_v54, %v2427_v61  ;;  %vm8518_vm11 = vcmp.ne.s16.totalorder %v7235_v1, 0  ;;  %v1669_v59 = vsel %vm1418_vm0, %v1666_v42, %v7225_v52  ;;  %6268 = vmatprep.mubr.msk.bf16.mxu1 %vm376_vm3, %v1667_v38  ;;  %vm2026_vm7 = vcmp.lt.s32.totalorder %v538_v33, 15  ;;  %v7255_v61 = vld [vmem:[#allocation2 + $0x58] sm:$0xff] }
  0x81   : > { %v2436_v57 = vrot.slane %v2434_v15, 4  ;;  %v2439_v56 = vrot.slane %v2437_v21, 5  ;;  %v2384_v20 = vsel %vm8518_vm11, %v7022_v32, 0  ;;  %v2273_v36 = vshrl.u32 %v5933_v50, 16  ;;  %vm2122_vm11 = vmpackc.low %vm2026_vm7, %vm2026_vm7 }
  0x82   : > { %v2432_v51 = vsel %vm1038_vm8, %v2422_v2, %v2431_v30  ;;  %v2443_v18 = vshrl.u32 %v2384_v20, 16  ;;  %v2446_v27 = vshll.u32 %v2384_v20, 16  ;;  %v2276_v14 = vshll.u32 %v5933_v50, 16 }
  0x83   : > { %6294 = vmatprep.mubr.msk.bf16.mxu0 %vm376_vm3, %v2432_v51  ;;  %v2440_v42 = vor.u32 %v2439_v56, %v2436_v57  ;;  %v2275_v62 = vrot.slane %v2273_v36, 3  ;;  %v1670_v58 = vrot.slane %v7243_v34, 4  ;;  %v414_v38 = vadd.s32 136, %v6662_v3 }
  0x84   : > { %v2445_v37 = vrot.slane %v2443_v18, 4  ;;  %v2448_v60 = vrot.slane %v2446_v27, 5  ;;  %v2278_v32 = vrot.slane %v2276_v14, 4  ;;  %v2154_v54 = vsel %vm2122_vm11, 65537, %v8524_v5 }
  0x85   : > { %v2441_v2 = vsel %vm1038_vm8, %v2431_v30, %v2440_v42  ;;  %v7261_v35 = vsel %vm1418_vm0, %v7225_v52, %v1670_v58  ;;  %v1672_v4 = vrot.slane %v7250_v39, 4  ;;  %v5934_v50 = vcombine.low %v6668_v6, %v2154_v54 }
  0x86   : > { %6295 = vmatmul.mubr.msk.bf16.gmra.mrb[20].mxu0 %vm376_vm3, %v2441_v2  ;;  %v2449_v15 = vor.u32 %v2448_v60, %v2445_v37  ;;  %v2279_v21 = vor.u32 %v2278_v32, %v2275_v62  ;;  %v552_v33 = vand.u32 15, %v414_v38  ;;  %v416_v30 = vadd.s32 152, %v6662_v3 }
  0x87   : > { %v7267_v57 = vsel %vm1418_vm0, %v1670_v58, %v1672_v4  ;;  %v1674_v56 = vrot.slane %v7255_v61, 4  ;;  %v418_v20 = vadd.s32 168, %v6662_v3  ;;  %6269 = vmatmul.mubr.msk.bf16.gmra.mrb[28].mxu1 %vm376_vm3, %v1669_v59  ;;  %v2282_v18 = vshrl.u32 %v5934_v50, 16 }
  0x88   : > { %v2450_v36 = vsel %vm1038_vm8, %v2440_v42, %v2449_v15  ;;  %v7274_v51 = vsel %vm1217_vm2, %v2270_v31, %v2279_v21  ;;  %v2285_v27 = vshll.u32 %v5934_v50, 16  ;;  %6272 = vmatprep.mubr.msk.bf16.mxu1 %vm376_vm3, %v7261_v35  ;;  %vm2028_vm7 = vcmp.lt.s32.totalorder %v552_v33, 15  ;;  %v7284_v42 = vld [vmem:[#allocation2 + $0x60] sm:$0xff] }
  0x89   : > { %8590 = vst [vmem:[#allocation12_spill] sm:$0xff] %v7274_v51  ;;  %6298 = vmatprep.mubr.msk.bf16.mxu0 %vm376_vm3, %v2450_v36  ;;  %vm8523_vm11 = vcmp.ne.s16.totalorder %v7274_v51, 0  ;;  %v566_v14 = vand.u32 15, %v416_v30  ;;  %v7282_v62 = vsel %vm1418_vm0, %v1672_v4, %v1674_v56  ;;  %v2284_v59 = vrot.slane %v2282_v18, 3  ;;  %vm2124_vm15 = vmpackc.low %vm2028_vm7, %vm2028_vm7 }
  0x8a   : > { %v2385_v31 = vsel %vm8523_vm11, %v7061_v22, 0  ;;  %v2287_v58 = vrot.slane %v2285_v27, 4  ;;  %v580_v37 = vand.u32 15, %v418_v20  ;;  %v2156_v38 = vsel %vm2124_vm15, 65537, %v8524_v5 }
  0x8b   : > { %v2452_v60 = vshrl.u32 %v2385_v31, 16  ;;  %v2455_v32 = vshll.u32 %v2385_v31, 16  ;;  %vm2030_vm14 = vcmp.lt.s32.totalorder %v566_v14, 15  ;;  %v5935_v54 = vcombine.low %v6668_v6, %v2156_v38 }
  0x8c   : > { %v2288_v2 = vor.u32 %v2287_v58, %v2284_v59  ;;  %vm2126_vm6 = vmpackc.low %vm2030_vm14, %vm2030_vm14  ;;  %vm2032_vm9 = vcmp.lt.s32.totalorder %v580_v37, 15  ;;  %v7292_v4 = vrot.slane %v7284_v42, 4  ;;  %v420_v30 = vadd.s32 184, %v6662_v3 }
  0x8d   : > { %v2454_v50 = vrot.slane %v2452_v60, 4  ;;  %v2457_v33 = vrot.slane %v2455_v32, 5  ;;  %v2158_v22 = vsel %vm2126_vm6, 65537, %v8524_v5  ;;  %vm2128_vm11 = vmpackc.low %vm2032_vm9, %vm2032_vm9  ;;  %v2291_v36 = vshrl.u32 %v5935_v54, 16 }
  0x8e   : > { %v7297_v20 = vsel %vm1217_vm2, %v2279_v21, %v2288_v2  ;;  %v2294_v18 = vshll.u32 %v5935_v54, 16  ;;  %v5936_v27 = vcombine.low %v6668_v6, %v2158_v22  ;;  %v2160_v31 = vsel %vm2128_vm11, 65537, %v8524_v5 }
  0x8f   : > { %8591 = vst [vmem:[#allocation13_spill] sm:$0xff] %v7297_v20  ;;  %v2458_v14 = vor.u32 %v2457_v33, %v2454_v50  ;;  %vm2369_vm14 = vcmp.ne.s16.totalorder %v7297_v20, 0  ;;  %v7304_v59 = vsel %vm1418_vm0, %v1674_v56, %v7292_v4  ;;  %v2293_v37 = vrot.slane %v2291_v36, 3  ;;  %6273 = vmatmul.mubr.msk.bf16.gmra.mrb[32].mxu1 %vm376_vm3, %v7267_v57 }
  0x90   : > { %v2386_v58 = vsel %vm2369_vm14, %v7091_v55, 0  ;;  %v2296_v21 = vrot.slane %v2294_v18, 4  ;;  %v2300_v60 = vshrl.u32 %v5936_v27, 16  ;;  %v2303_v50 = vshll.u32 %v5936_v27, 16  ;;  %6276 = vmatprep.mubr.msk.bf16.mxu1 %vm376_vm3, %v7282_v62 }
  0x91   : > { %v2459_v32 = vsel %vm1038_vm8, %v2449_v15, %v2458_v14  ;;  %v2461_v38 = vshrl.u32 %v2386_v58, 16  ;;  %v2464_v54 = vshll.u32 %v2386_v58, 16  ;;  %v5937_v55 = vcombine.low %v6668_v6, %v2160_v31 }
  0x92   : > { %6299 = vmatmul.mubr.msk.bf16.gmra.mrb[24].mxu0 %vm376_vm3, %v2459_v32  ;;  %v2297_v56 = vor.u32 %v2296_v21, %v2293_v37  ;;  %v2302_v33 = vrot.slane %v2300_v60, 3  ;;  %v594_v22 = vand.u32 15, %v420_v30  ;;  %v2305_v5 = vrot.slane %v2303_v50, 4 }
  0x93   : > { %v2463_v36 = vrot.slane %v2461_v38, 4  ;;  %v2466_v18 = vrot.slane %v2464_v54, 5  ;;  %v1678_v20 = vrot.slane %v6981_v7, 4  ;;  %v2309_v58 = vshrl.u32 %v5937_v55, 16 }
  0x94   : > { %v7318_v15 = vsel %vm1217_vm2, %v2288_v2, %v2297_v56  ;;  %v2312_v27 = vshll.u32 %v5937_v55, 16  ;;  %vm2034_vm6 = vcmp.lt.s32.totalorder %v594_v22, 15  ;;  %v2306_v32 = vor.u32 %v2305_v5, %v2302_v33 }
  0x95   : > { %8592 = vst [vmem:[#allocation14_spill] sm:$0xff] %v7318_v15  ;;  %v2467_v51 = vor.u32 %v2466_v18, %v2463_v36  ;;  %vm8540_vm9 = vcmp.ne.s16.totalorder %v7318_v15, 0  ;;  %vm2130_vm15 = vmpackc.low %vm2034_vm6, %vm2034_vm6  ;;  %v1679_v31 = vsel %vm1418_vm0, %v7292_v4, %v1678_v20  ;;  %v2311_v37 = vrot.slane %v2309_v58, 3 }
  0x96   : > { %v2387_v30 = vsel %vm8540_vm9, %v7207_v25, 0  ;;  %v2314_v21 = vrot.slane %v2312_v27, 4  ;;  %v8593_v60 = vmov 0   ;;  %v7329_v55 = vsel %vm1217_vm2, %v2297_v56, %v2306_v32 }
  0x97   : > { %v2162_v2 = vsel %vm2130_vm15, 65537, %v8593_v60  ;;  %v2468_v38 = vsel %vm1038_vm8, %v2458_v14, %v2467_v51  ;;  %v2470_v54 = vshrl.u32 %v2387_v30, 16  ;;  %v2473_v50 = vshll.u32 %v2387_v30, 16  ;;  %8594 = vst [vmem:[#allocation15_spill] sm:$0xff] %v7329_v55  ;;  %6277 = vmatmul.mubr.msk.bf16.gmra.mrb[36].mxu1 %vm376_vm3, %v7304_v59 }
  0x98   : > { %6302 = vmatprep.mubr.msk.bf16.mxu0 %vm376_vm3, %v2468_v38  ;;  %vm8539_vm11 = vcmp.ne.s16.totalorder %v7329_v55, 0  ;;  %v2315_v5 = vor.u32 %v2314_v21, %v2311_v37  ;;  %v5938_v33 = vcombine.low %v6668_v6, %v2162_v2  ;;  %v422_v22 = vadd.s32 200, %v6662_v3  ;;  %6280 = vmatprep.mubr.msk.bf16.mxu1 %vm376_vm3, %v1679_v31 }
  0x99   : > { %v2472_v36 = vrot.slane %v2470_v54, 4  ;;  %v2475_v18 = vrot.slane %v2473_v50, 5  ;;  %v2388_v14 = vsel %vm8539_vm11, %v7243_v34, 0  ;;  %v1680_v56 = vrot.slane %v6995_v8, 4 }
  0x9a   : > { %v2479_v58 = vshrl.u32 %v2388_v14, 16  ;;  %v2482_v27 = vshll.u32 %v2388_v14, 16  ;;  %v7343_v30 = vsel %vm1217_vm2, %v2306_v32, %v2315_v5  ;;  %v2318_v37 = vshrl.u32 %v5938_v33, 16 }
  0x9b   : > { %8595 = vst [vmem:[#allocation16_spill] sm:$0xff] %v7343_v30  ;;  %v2476_v21 = vor.u32 %v2475_v18, %v2472_v36  ;;  %vm8538_vm7 = vcmp.ne.s16.totalorder %v7343_v30, 0  ;;  %v2321_v2 = vshll.u32 %v5938_v33, 16  ;;  %v608_v38 = vand.u32 15, %v422_v22 }
  0x9c   : > { %v2481_v54 = vrot.slane %v2479_v58, 4  ;;  %v2484_v50 = vrot.slane %v2482_v27, 5  ;;  %v2389_v55 = vsel %vm8538_vm7, %v7250_v39, 0  ;;  %v2320_v31 = vrot.slane %v2318_v37, 3  ;;  %v1632_v37 = vld [vmem:[#allocation2 + $0x80] sm:$0xf] }
  0x9d   : > { %v2477_v15 = vsel %vm1038_vm8, %v2467_v51, %v2476_v21  ;;  %v2488_v1 = vshrl.u32 %v2389_v55, 16  ;;  %v2491_v14 = vshll.u32 %v2389_v55, 16  ;;  %v2323_v13 = vrot.slane %v2321_v2, 4 }
  0x9e   : > { %6303 = vmatmul.mubr.msk.bf16.gmra.mrb[28].mxu0 %vm376_vm3, %v2477_v15  ;;  %v2485_v32 = vor.u32 %v2484_v50, %v2481_v54  ;;  %vm2036_vm6 = vcmp.lt.s32.totalorder %v608_v38, 15  ;;  %v1681_v36 = vsel %vm1418_vm0, %v1678_v20, %v1680_v56  ;;  %v424_v33 = vadd.s32 216, %v6662_v3 }
  0x9f   : > { %v2490_v22 = vrot.slane %v2488_v1, 4  ;;  %v2493_v18 = vrot.slane %v2491_v14, 5  ;;  %v2324_v58 = vor.u32 %v2323_v13, %v2320_v31  ;;  %vm2132_vm15 = vmpackc.low %vm2036_vm6, %vm2036_vm6  ;;  %v1682_v27 = vrot.slane %v7070_v44, 4  ;;  %6281 = vmatmul.mubr.msk.bf16.gmra.mrb[40].mxu1 %vm376_vm3, %v1681_v36 }
  0xa0   : > { %v2486_v51 = vsel %vm1038_vm8, %v2476_v21, %v2485_v32  ;;  %v2164_v55 = vsel %vm2132_vm15, 65537, %v8593_v60  ;;  %v622_v15 = vand.u32 15, %v424_v33  ;;  %v426_v2 = vadd.s32 232, %v6662_v3 }
  0xa1   : > { %6306 = vmatprep.mubr.msk.bf16.mxu0 %vm376_vm3, %v2486_v51  ;;  %v2494_v20 = vor.u32 %v2493_v18, %v2490_v22  ;;  %v7360_v1 = vsel %vm1217_vm2, %v2315_v5, %v2324_v58  ;;  %v5939_v13 = vcombine.low %v6668_v6, %v2164_v55  ;;  %v1683_v38 = vsel %vm1418_vm0, %v1680_v56, %v1682_v27  ;;  %v7373_v55 = vld [vmem:[#allocation2 + $0x10] sm:$0xff] }
  0xa2   : > { %8596 = vst [vmem:[#allocation17_spill] sm:$0xff] %v7360_v1  ;;  %vm8545_vm6 = vcmp.ne.s16.totalorder %v7360_v1, 0  ;;  %vm2038_vm7 = vcmp.lt.s32.totalorder %v622_v15, 15  ;;  %6284 = vmatprep.mubr.msk.bf16.mxu1 %vm376_vm3, %v1683_v38  ;;  %v636_v21 = vand.u32 15, %v426_v2  ;;  %v1684_v54 = vrot.slane %v1632_v37, 4 }
  0xa3   : > { %v2495_v50 = vsel %vm1038_vm8, %v2485_v32, %v2494_v20  ;;  %v2390_v31 = vsel %vm8545_vm6, %v7255_v61, 0  ;;  %v2327_v14 = vshrl.u32 %v5939_v13, 16  ;;  %v2330_v5 = vshll.u32 %v5939_v13, 16  ;;  %vm2134_vm15 = vmpackc.low %vm2038_vm7, %vm2038_vm7  ;;  %v2858_v32 = vld [vmem:[#allocation2 + $0x8] sm:$0xf8] }
  0xa4   : > { %v2497_v36 = vshrl.u32 %v2390_v31, 16  ;;  %v2500_v33 = vshll.u32 %v2390_v31, 16  ;;  %v2166_v56 = vsel %vm2134_vm15, 65537, %v8593_v60  ;;  %vm2040_vm11 = vcmp.lt.s32.totalorder %v636_v21, 15 }
  0xa5   : > { %v2329_v22 = vrot.slane %v2327_v14, 3  ;;  %v2332_v18 = vrot.slane %v2330_v5, 4  ;;  %v5940_v51 = vcombine.low %v6668_v6, %v2166_v56  ;;  %vm2136_vm9 = vmpackc.low %vm2040_vm11, %vm2040_vm11  ;;  %v1685_v37 = vsel %vm1418_vm0, %v1682_v27, %v1684_v54 }
  0xa6   : > { %6307 = vmatmul.mubr.msk.bf16.gmra.mrb[32].mxu0 %vm376_vm3, %v2495_v50  ;;  %v2499_v15 = vrot.slane %v2497_v36, 4  ;;  %v2502_v2 = vrot.slane %v2500_v33, 5  ;;  %v2168_v13 = vsel %vm2136_vm9, 65537, %v8593_v60  ;;  %v428_v38 = vadd.s32 248, %v6662_v3 }
  0xa7   : > { %v2333_v31 = vor.u32 %v2332_v18, %v2329_v22  ;;  %v2336_v21 = vshrl.u32 %v5940_v51, 16  ;;  %v2339_v14 = vshll.u32 %v5940_v51, 16  ;;  %v5941_v5 = vcombine.low %v6668_v6, %v2168_v13  ;;  %6285 = vmatmul.mubr.msk.bf16.gmra.mrb[44].mxu1 %vm376_vm3, %v1685_v37 }
  0xa8   : > { %v2503_v56 = vor.u32 %v2502_v2, %v2499_v15  ;;  %v650_v27 = vand.u32 15, %v428_v38  ;;  %v2875_v54 = vsel %vm1182_vm12, %v2858_v32, 0  ;;  %v7385_v50 = vsel %vm1183_vm13, %v7373_v55, 0 }
  0xa9   : > { %v7388_v36 = vsel %vm1217_vm2, %v2324_v58, %v2333_v31  ;;  %v2338_v3 = vrot.slane %v2336_v21, 3  ;;  %v2341_v33 = vrot.slane %v2339_v14, 4  ;;  %v2345_v22 = vshrl.u32 %v5941_v5, 16 }
  0xaa   : > { %v2504_v18 = vsel %vm1038_vm8, %v2494_v20, %v2503_v56  ;;  %vm2374_vm9 = vcmp.ne.s16.totalorder %v7388_v36, 0  ;;  %v2348_v51 = vshll.u32 %v5941_v5, 16  ;;  %vm2042_vm11 = vcmp.lt.s32.totalorder %v650_v27, 15 }
  0xab   : > { %6310 = vmatprep.mubr.msk.bf16.mxu0 %vm376_vm3, %v2504_v18  ;;  %v2391_v37 = vsel %vm2374_vm9, %v7284_v42, 0  ;;  %v2342_v32 = vor.u32 %v2341_v33, %v2338_v3  ;;  %v2347_v15 = vrot.slane %v2345_v22, 3  ;;  %vm2138_vm7 = vmpackc.low %vm2042_vm11, %vm2042_vm11  ;;  %v2895_v58 = vshrl.u32 %v2875_v54, 16 }
  0xac   : > { %v2506_v2 = vshrl.u32 %v2391_v37, 16  ;;  %v2509_v13 = vshll.u32 %v2391_v37, 16  ;;  %v2350_v38 = vrot.slane %v2348_v51, 4  ;;  %v2170_v21 = vsel %vm2138_vm7, 65537, %v8593_v60 }
  0xad   : > { %v7398_v20 = vsel %vm1217_vm2, %v2333_v31, %v2342_v32  ;;  %v5942_v14 = vcombine.low %v6668_v6, %v2170_v21  ;;  %v7401_v5 = vrot.slane %v2895_v58, 3  ;;  %v2898_v27 = vshll.u32 %v2875_v54, 16 }
  0xae   : > { %v2508_v18 = vrot.slane %v2506_v2, 4  ;;  %v2511_v1 = vrot.slane %v2509_v13, 5  ;;  %vm2375_vm15 = vcmp.ne.s16.totalorder %v7398_v20, 0  ;;  %v2351_v3 = vor.u32 %v2350_v38, %v2347_v15  ;;  %v6583_v15 = vld [vmem:[%s6697_s28 + $0x90] sm:$0xff]  }
  0xaf   : > { %v2392_v33 = vsel %vm2375_vm15, %v6981_v7, 0  ;;  %v2354_v22 = vshrl.u32 %v5942_v14, 16  ;;  %v2357_v60 = vshll.u32 %v5942_v14, 16  ;;  %v2900_v51 = vrot.slane %v2898_v27, 4  ;;  %v2010_v27 = vld [vmem:[#allocation2 + $0x80] sm:$0x1f] }
  0xb0   : > { %v2512_v31 = vor.u32 %v2511_v1, %v2508_v18  ;;  %v2515_v37 = vshrl.u32 %v2392_v33, 16  ;;  %v2518_v30 = vshll.u32 %v2392_v33, 16  ;;  %v7408_v6 = vsel %vm1217_vm2, %v2342_v32, %v2351_v3  ;;  %395 = vst.msk [vmem:[#allocation2 + $0x90] sm:$0xff] %vm376_vm3, %v6583_v15 }
  0xb1   : > { %8597 = vst [vmem:[#allocation18_spill] sm:$0xff] %v7408_v6  ;;  %vm8550_vm11 = vcmp.ne.s16.totalorder %v7408_v6, 0  ;;  %v2356_v54 = vrot.slane %v2354_v22, 3  ;;  %v2359_v58 = vrot.slane %v2357_v60, 4  ;;  %v2901_v2 = vor.u32 %v2900_v51, %v7401_v5 }
  0xb2   : > { %v2513_v13 = vsel %vm1038_vm8, %v2503_v56, %v2512_v31  ;;  %v2517_v38 = vrot.slane %v2515_v37, 4  ;;  %v2520_v7 = vrot.slane %v2518_v30, 5  ;;  %v2393_v1 = vsel %vm8550_vm11, %v6995_v8, 0 }
  0xb3   : > { %6311 = vmatmul.mubr.msk.bf16.gmra.mrb[36].mxu0 %vm376_vm3, %v2513_v13  ;;  %v2524_v21 = vshrl.u32 %v2393_v1, 16  ;;  %v2527_v32 = vshll.u32 %v2393_v1, 16  ;;  %v7418_v14 = vor.u32 %v2359_v58, %v2356_v54  ;;  %v2903_v18 = vshrl.u32 %v7385_v50, 16 }
  0xb4   : > { %v2521_v5 = vor.u32 %v2520_v7, %v2517_v38  ;;  %v2906_v56 = vshll.u32 %v7385_v50, 16  ;;  %v2912_v30 = vshrl.u32 %v6884_v45, 16  ;;  %v2915_v33 = vshll.u32 %v6884_v45, 16 }
  0xb5   : > { %8598 = vst [vmem:[#allocation19_spill] sm:$0xff] %v7418_v14  ;;  %v2526_v22 = vrot.slane %v2524_v21, 4  ;;  %v2529_v8 = vrot.slane %v2527_v32, 5  ;;  %v7427_v60 = vsel %vm1217_vm2, %v2351_v3, %v7418_v14  ;;  %vm8548_vm7 = vcmp.ne.s16.totalorder %v7418_v14, 0 }
  0xb6   : > { %v2522_v51 = vsel %vm1038_vm8, %v2512_v31, %v2521_v5  ;;  %vm8549_vm6 = vcmp.ne.s16.totalorder %v7427_v60, 0  ;;  %v2395_v37 = vsel %vm8548_vm7, %v2010_v27, 0  ;;  %v2905_v50 = vrot.slane %v2903_v18, 3  ;;  %v3354_v31 = vld [vmem:[#allocation2 + $0x8] sm:$0xf0]  ;;  %v7439_v18 = vld [vmem:[#allocation2 + $0x20] sm:$0xff] }
  0xb7   : > { %6314 = vmatprep.mubr.msk.bf16.mxu0 %vm376_vm3, %v2522_v51  ;;  %v2530_v54 = vor.u32 %v2529_v8, %v2526_v22  ;;  %v2394_v45 = vsel %vm8549_vm6, %v7070_v44, 0  ;;  %v2542_v58 = vshrl.u32 %v2395_v37, 16  ;;  %v2545_v3 = vshll.u32 %v2395_v37, 16 }
  0xb8   : > { %v2533_v15 = vshrl.u32 %v2394_v45, 16  ;;  %v2536_v13 = vshll.u32 %v2394_v45, 16  ;;  %v2908_v38 = vrot.slane %v2906_v56, 4  ;;  %v2914_v7 = vrot.slane %v2912_v30, 3  ;;  %v7444_v30 = vld [vmem:[#allocation2 + $0x28] sm:$0xff] }
  0xb9   : > { %v2531_v1 = vsel %vm1038_vm8, %v2521_v5, %v2530_v54  ;;  %v2544_v21 = vrot.slane %v2542_v58, 4  ;;  %v2547_v32 = vrot.slane %v2545_v3, 5  ;;  %v2917_v27 = vrot.slane %v2915_v33, 4 }
  0xba   : > { %v2535_v51 = vrot.slane %v2533_v15, 4  ;;  %v2538_v22 = vrot.slane %v2536_v13, 5  ;;  %v2909_v8 = vor.u32 %v2908_v38, %v2905_v50  ;;  %v3968_v37 = vsel %vm1418_vm0, %v7166_v19, 0  ;;  %v7453_v13 = vld [vmem:[#allocation2 + $0x30] sm:$0xff]  ;;  %v7458_v19 = vld [vmem:[%s8500_s1 + $0x1c] sm:$0xf] }
  0xbb   : > { %6315 = vmatmul.mubr.msk.bf16.gmra.mrb[40].mxu0 %vm376_vm3, %v2531_v1  ;;  %v2548_v44 = vor.u32 %v2547_v32, %v2544_v21  ;;  %v2918_v14 = vor.u32 %v2917_v27, %v2914_v7  ;;  %v3390_v56 = vrot.slane %v3354_v31, 4  ;;  %v3391_v33 = vrot.slane %v7373_v55, 4  ;;  %v7466_v1 = vld [vmem:[#allocation2 + $0x18] sm:$0xff] }
  0xbc   : > { %v2539_v45 = vor.u32 %v2538_v22, %v2535_v51  ;;  %v2910_v5 = vsel %vm1217_vm2, %v2901_v2, %v2909_v8  ;;  %v2878_v58 = vsel %vm1185_vm4, %v7439_v18, 0  ;;  %v2879_v38 = vsel %vm1186_vm10, %v7444_v30, 0  ;;  %v7468_v27 = vld [vmem:[#allocation2 + $0x38] sm:$0xff] }
  0xbd   : > { %6324 = vmatprep.mubr.msk.bf16.mxu1 %vm376_vm3, %v2910_v5  ;;  %v2919_v50 = vsel %vm1217_vm2, %v2909_v8, %v2918_v14  ;;  %v2921_v3 = vshrl.u32 %v2878_v58, 16  ;;  %v2924_v15 = vshll.u32 %v2878_v58, 16  ;;  %v2930_v21 = vshrl.u32 %v2879_v38, 16 }
  0xbe   : > { %v2540_v2 = vsel %vm1038_vm8, %v2530_v54, %v2539_v45  ;;  %6325 = vmatmul.mubr.msk.bf16.vlgmr.msra.gmra.mrb[48].mxu1 %vm376_vm3, %v2919_v50  ;;  %v2933_v32 = vshll.u32 %v2879_v38, 16  ;;  %v2549_v51 = vsel %vm1038_vm8, %v2539_v45, %v2548_v44  ;;  %v3392_v54 = vsel %vm1418_vm0, %v3390_v56, %v3391_v33 }
  0xbf   : > { %6318 = vmatprep.mubr.msk.bf16.mxu0 %vm376_vm3, %v2540_v2  ;;  %6391 = vmatpush3.bf16.msra.mxu1 %v3968_v37  ;;  %v2923_v7 = vrot.slane %v2921_v3, 3  ;;  %v2926_v31 = vrot.slane %v2924_v15, 4  ;;  %v2880_v22 = vsel %vm1187_vm5, %v7453_v13, 0  ;;  %v2932_v37 = vrot.slane %v2930_v21, 3 }
  0xc0   : > { %6536 = vmatprep.subr.msk.bf16.mxu1 %vm1418_vm0, %v7458_v19  ;;  %v2935_v5 = vrot.slane %v2933_v32, 4  ;;  %v2939_v58 = vshrl.u32 %v2880_v22, 16  ;;  %v3393_v50 = vrot.slane %v7466_v1, 4  ;;  %v2942_v3 = vshll.u32 %v2880_v22, 16 }
  0xc1   : > { %v2927_v8 = vor.u32 %v2926_v31, %v2923_v7  ;;  %v2881_v44 = vsel %vm1188_vm1, %v7468_v27, 0  ;;  %v3395_v38 = vrot.slane %v7439_v18, 4  ;;  %vm8599_vm7 = vcmp.ne.s16.totalorder %v7074_v47, 0 }
  0xc2   : > { %v2936_v45 = vor.u32 %v2935_v5, %v2932_v37  ;;  %v2941_v15 = vrot.slane %v2939_v58, 3  ;;  %v2948_v2 = vshrl.u32 %v2881_v44, 16  ;;  %v2944_v7 = vrot.slane %v2942_v3, 4 }
  0xc3   : > { %6319 = vmatmul.mubr.msk.bf16.gmra.mrb[44].mxu0 %vm376_vm3, %v2549_v51  ;;  %v2928_v56 = vsel %vm1217_vm2, %v2918_v14, %v2927_v8  ;;  %v2951_v31 = vshll.u32 %v2881_v44, 16  ;;  %v2882_v21 = vsel %vm8599_vm7, %v7207_v25, 0  ;;  %v3394_v37 = vsel %vm1418_vm0, %v3391_v33, %v3393_v50 }
  0xc4   : > { %6358 = vmatprep.mubr.msk.bf16.mxu0 %vm376_vm3, %v3392_v54  ;;  %6328 = vmatprep.mubr.msk.bf16.mxu1 %vm376_vm3, %v2928_v56  ;;  %v2937_v32 = vsel %vm1217_vm2, %v2927_v8, %v2936_v45  ;;  %v2950_v51 = vrot.slane %v2948_v2, 3  ;;  %v2957_v22 = vshrl.u32 %v2882_v21, 16  ;;  %v2960_v14 = vshll.u32 %v2882_v21, 16 }
  0xc5   : > { %v2945_v54 = vor.u32 %v2944_v7, %v2941_v15  ;;  %v2953_v5 = vrot.slane %v2951_v31, 4  ;;  %vm8600_vm6 = vcmp.ne.s16.totalorder %v6773_v12, 0  ;;  %vm8601_vm7 = vcmp.ne.s16.totalorder %v6779_v17, 0 }
  0xc6   : > { %6329 = vmatmul.mubr.msk.bf16.gmra.mrb[52].mxu1 %vm376_vm3, %v2937_v32  ;;  %v2959_v58 = vrot.slane %v2957_v22, 3  ;;  %v2962_v56 = vrot.slane %v2960_v14, 4  ;;  %v2883_v3 = vsel %vm8600_vm6, %v7243_v34, 0  ;;  %v2884_v25 = vsel %vm8601_vm7, %v7250_v39, 0  ;;  %v7507_v39 = vld [vmem:[%s8500_s1 + $0x20] sm:$0xf] }
  0xc7   : > { %v4464_v8 = vsel %vm1418_vm0, %v7216_v26, 0  ;;  %v2946_v44 = vsel %vm1217_vm2, %v2936_v45, %v2945_v54  ;;  %v2954_v33 = vor.u32 %v2953_v5, %v2950_v51  ;;  %v2966_v2 = vshrl.u32 %v2883_v3, 16 }
  0xc8   : > { %v3396_v15 = vsel %vm1418_vm0, %v3393_v50, %v3395_v38  ;;  %6332 = vmatprep.mubr.msk.bf16.mxu1 %vm376_vm3, %v2946_v44  ;;  %v2963_v7 = vor.u32 %v2962_v56, %v2959_v58  ;;  %v2969_v31 = vshll.u32 %v2883_v3, 16  ;;  %v2975_v21 = vshrl.u32 %v2884_v25, 16 }
  0xc9   : > { %v3397_v34 = vrot.slane %v7444_v30, 4  ;;  %v2978_v32 = vshll.u32 %v2884_v25, 16  ;;  %v2955_v26 = vsel %vm1217_vm2, %v2945_v54, %v2954_v33  ;;  %v2968_v45 = vrot.slane %v2966_v2, 3 }
  0xca   : > { %v2971_v51 = vrot.slane %v2969_v31, 4  ;;  %vm8602_vm6 = vcmp.ne.s16.totalorder %v6789_v23, 0  ;;  %v2964_v22 = vsel %vm1217_vm2, %v2954_v33, %v2963_v7  ;;  %v2977_v14 = vrot.slane %v2975_v21, 3  ;;  %v7531_v21 = vld [vmem:[#allocation2 + $0x70] sm:$0xff] }
  0xcb   : > { %6359 = vmatmul.mubr.msk.bf16.vlgmr.msra.gmra.mrb[48].mxu0 %vm376_vm3, %v3394_v37  ;;  %v2885_v50 = vsel %vm8602_vm6, %v7255_v61, 0  ;;  %v2980_v5 = vrot.slane %v2978_v32, 4  ;;  %vm8603_vm7 = vcmp.ne.s16.totalorder %v6889_v46, 0  ;;  %v3399_v37 = vrot.slane %v7453_v13, 4 }
  0xcc   : > { %6425 = vmatpush3.bf16.msra.mxu0 %v4464_v8  ;;  %6362 = vmatprep.mubr.msk.bf16.mxu0 %vm376_vm3, %v3396_v15  ;;  %v2886_v58 = vsel %vm8603_vm7, %v7284_v42, 0  ;;  %v2984_v54 = vshrl.u32 %v2885_v50, 16  ;;  %v2987_v61 = vshll.u32 %v2885_v50, 16  ;;  %v2972_v56 = vor.u32 %v2971_v51, %v2968_v45  ;;  %v7524_v8 = vld [vmem:[#allocation2 + $0x68] sm:$0xff] }
  0xcd   : > { %6537 = vmatprep.subr.msk.bf16.mxu0 %vm1418_vm0, %v7507_v39  ;;  %v2993_v3 = vshrl.u32 %v2886_v58, 16  ;;  %v2996_v25 = vshll.u32 %v2886_v58, 16  ;;  %v3398_v44 = vsel %vm1418_vm0, %v3395_v38, %v3397_v34  ;;  %v2981_v33 = vor.u32 %v2980_v5, %v2977_v14  ;;  %v7543_v14 = vld [vmem:[#allocation2 + $0x80] sm:$0xff]  ;;  %v2874_v5 = vld [vmem:[#allocation2 + $0x88] sm:$0xf] }
  0xce   : > { %6333 = vmatmul.mubr.msk.bf16.gmra.mrb[56].mxu1 %vm376_vm3, %v2955_v26  ;;  %v3400_v42 = vsel %vm1418_vm0, %v3397_v34, %v3399_v37  ;;  %v2986_v2 = vrot.slane %v2984_v54, 3  ;;  %v2989_v15 = vrot.slane %v2987_v61, 4  ;;  %vm8604_vm6 = vcmp.ne.s16.totalorder %v6951_v49, 0  ;;  %v7538_v34 = vld [vmem:[#allocation2 + $0x78] sm:$0xff] }
  0xcf   : > { %6336 = vmatprep.mubr.msk.bf16.mxu1 %vm376_vm3, %v2964_v22  ;;  %v2887_v31 = vsel %vm8604_vm6, %v7524_v8, 0  ;;  %v3401_v32 = vrot.slane %v7468_v27, 4  ;;  %v2973_v26 = vsel %vm1217_vm2, %v2963_v7, %v2972_v56  ;;  %v2995_v45 = vrot.slane %v2993_v3, 3 }
  0xd0   : > { %v2998_v51 = vrot.slane %v2996_v25, 4  ;;  %v2982_v38 = vsel %vm1217_vm2, %v2972_v56, %v2981_v33  ;;  %v3002_v50 = vshrl.u32 %v2887_v31, 16  ;;  %vm8605_vm7 = vcmp.ne.s16.totalorder %v6973_v0, 0 }
  0xd1   : > { %v2888_v22 = vsel %vm8605_vm7, %v7531_v21, 0  ;;  %v2990_v58 = vor.u32 %v2989_v15, %v2986_v2  ;;  %v3005_v7 = vshll.u32 %v2887_v31, 16  ;;  %v3402_v54 = vsel %vm1418_vm0, %v3399_v37, %v3401_v32 }
  0xd2   : > { %v2999_v61 = vor.u32 %v2998_v51, %v2995_v45  ;;  %vm8606_vm6 = vcmp.ne.s16.totalorder %v6999_v16, 0  ;;  %v3011_v3 = vshrl.u32 %v2888_v22, 16  ;;  %v3014_v25 = vshll.u32 %v2888_v22, 16 }
  0xd3   : > { %6363 = vmatmul.mubr.msk.bf16.gmra.mrb[52].mxu0 %vm376_vm3, %v3398_v44  ;;  %v2889_v56 = vsel %vm8606_vm6, %v7538_v34, 0  ;;  %vm8607_vm7 = vcmp.ne.s16.totalorder %v7088_v28, 0  ;;  %vm8608_vm11 = vcmp.ne.s16.totalorder %v7063_v24, 0  ;;  %v3404_v2 = vsel %vm1418_vm0, %v3401_v32, %v7225_v52  ;;  %v3731_v28 = vld [vmem:[#allocation2 + $0x8] sm:$0xf0] }
  0xd4   : > { %6366 = vmatprep.mubr.msk.bf16.mxu0 %vm376_vm3, %v3400_v42  ;;  %v2890_v44 = vsel %vm8607_vm7, %v7543_v14, 0  ;;  %v2891_v42 = vsel %vm8608_vm11, %v2874_v5, 0  ;;  %v3004_v37 = vrot.slane %v3002_v50, 3  ;;  %v2991_v15 = vsel %vm1217_vm2, %v2981_v33, %v2990_v58 }
  0xd5   : > { %v3007_v31 = vrot.slane %v3005_v7, 4  ;;  %v3023_v45 = vshll.u32 %v2889_v56, 16  ;;  %v3029_v51 = vshrl.u32 %v2890_v44, 16  ;;  %v3038_v22 = vshrl.u32 %v2891_v42, 16 }
  0xd6   : > { %6337 = vmatmul.mubr.msk.bf16.gmra.mrb[60].mxu1 %vm376_vm3, %v2973_v26  ;;  %v3020_v26 = vshrl.u32 %v2889_v56, 16  ;;  %v3041_v23 = vshll.u32 %v2891_v42, 16  ;;  %v3000_v5 = vsel %vm1217_vm2, %v2990_v58, %v2999_v61  ;;  %v3013_v24 = vrot.slane %v3011_v3, 3  ;;  %v6584_v3 = vld [vmem:[#allocation2 + $0x20] sm:$0xff] }
  0xd7   : > { %6340 = vmatprep.mubr.msk.bf16.mxu1 %vm376_vm3, %v2982_v38  ;;  %v3032_v38 = vshll.u32 %v2890_v44, 16  ;;  %v3016_v17 = vrot.slane %v3014_v25, 4  ;;  %v3413_v52 = vrot.slane %v7524_v8, 4  ;;  %v3008_v33 = vor.u32 %v3007_v31, %v3004_v37  ;;  %v8610_v25 = vld [vmem:[#allocation6_spill] sm:$0xff] }
  0xd8   : > { %v3022_v32 = vrot.slane %v3020_v26, 3  ;;  %v3025_v50 = vrot.slane %v3023_v45, 4  ;;  %vm8609_vm11 = vcmp.ne.s16.totalorder %v7133_v11, 0  ;;  %v3040_v44 = vrot.slane %v3038_v22, 3 }
  0xd9   : > { %v3748_v7 = vsel %vm8609_vm11, %v3731_v28, 0  ;;  %v3034_v56 = vrot.slane %v3032_v38, 4  ;;  %v3043_v42 = vrot.slane %v3041_v23, 4  ;;  %v3415_v58 = vrot.slane %v7531_v21, 4  ;;  %v7582_v38 = vld [vmem:[#allocation2 + $0x88] sm:$0xf] }
  0xda   : > { %vm8611_vm6 = vcmp.ne.s16.totalorder %v8610_v25, 0  ;;  %vm8612_vm7 = vcmp.ne.s16.totalorder %v7153_v53, 0  ;;  %v3771_v31 = vshll.u32 %v3748_v7, 16  ;;  %v3009_v28 = vsel %vm1217_vm2, %v2999_v61, %v3008_v33 }
  0xdb   : > { %6367 = vmatmul.mubr.msk.bf16.gmra.mrb[56].mxu0 %vm376_vm3, %v3402_v54  ;;  %v3031_v54 = vrot.slane %v3029_v51, 3  ;;  %v4246_v16 = vsel %vm8611_vm6, %v6584_v3, 0  ;;  %v3749_v37 = vsel %vm8612_vm7, %v7373_v55, 0  ;;  %v7576_v26 = vsel %vm1418_vm0, %v7292_v4, %v3413_v52 }
  0xdc   : > { %6370 = vmatprep.mubr.msk.bf16.mxu0 %vm376_vm3, %v3404_v2  ;;  %v3017_v2 = vor.u32 %v3016_v17, %v3013_v24  ;;  %v3026_v23 = vor.u32 %v3025_v50, %v3022_v32  ;;  %v3417_v17 = vrot.slane %v7538_v34, 4  ;;  %v3044_v45 = vor.u32 %v3043_v42, %v3040_v44  ;;  %v4227_v42 = vld [vmem:[#allocation2 + $0x10] sm:$0xf8] }
  0xdd   : > { %v3035_v24 = vor.u32 %v3034_v56, %v3031_v54  ;;  %v3419_v51 = vrot.slane %v7543_v14, 4  ;;  %vm8613_vm11 = vcmp.ne.s16.totalorder %v7181_v29, 0  ;;  %v7591_v61 = vsel %vm1418_vm0, %v3413_v52, %v3415_v58 }
  0xde   : > { %6341 = vmatmul.mubr.msk.bf16.gmra.mrb[64].mxu1 %vm376_vm3, %v2991_v15  ;;  %v3768_v15 = vshrl.u32 %v3748_v7, 16  ;;  %v3750_v55 = vsel %vm8613_vm11, %v7466_v1, 0  ;;  %v3018_v4 = vsel %vm1217_vm2, %v3008_v33, %v3017_v2  ;;  %v3776_v22 = vshrl.u32 %v3749_v37, 16 }
  0xdf   : > { %6344 = vmatprep.mubr.msk.bf16.mxu1 %vm376_vm3, %v3000_v5  ;;  %v3773_v32 = vrot.slane %v3771_v31, 5  ;;  %v4281_v50 = vshrl.u32 %v4246_v16, 16  ;;  %v4284_v7 = vshll.u32 %v4246_v16, 16  ;;  %v3027_v54 = vsel %vm1217_vm2, %v3017_v2, %v3026_v23 }
  0xe0   : > { %v3770_v5 = vrot.slane %v3768_v15, 4  ;;  %v7596_v56 = vsel %vm1418_vm0, %v3415_v58, %v3417_v17  ;;  %v3785_v44 = vshrl.u32 %v3750_v55, 16  ;;  %v3036_v52 = vsel %vm1217_vm2, %v3026_v23, %v3035_v24 }
  0xe1   : > { %v7602_v33 = vsel %vm1217_vm2, %v3035_v24, %v3044_v45  ;;  %v7607_v16 = vsel %vm1418_vm0, %v3417_v17, %v3419_v51  ;;  %v4247_v2 = vsel %vm1185_vm4, %v7444_v30, 0  ;;  %v3778_v58 = vrot.slane %v3776_v22, 4 }
  0xe2   : > { %v3788_v25 = vshll.u32 %v3750_v55, 16  ;;  %v3774_v15 = vor.u32 %v3773_v32, %v3770_v5  ;;  %v4283_v31 = vrot.slane %v4281_v50, 3  ;;  %v4293_v23 = vshll.u32 %v4247_v2, 16 }
  0xe3   : > { %6371 = vmatmul.mubr.msk.bf16.gmra.mrb[60].mxu0 %vm376_vm3, %v7261_v35  ;;  %v3779_v35 = vshll.u32 %v3749_v37, 16  ;;  %v4290_v37 = vshrl.u32 %v4247_v2, 16  ;;  %v3787_v24 = vrot.slane %v3785_v44, 4  ;;  %v4244_v45 = vsel %vm1182_vm12, %v4227_v42, 0 }
  0xe4   : > { %6374 = vmatprep.mubr.msk.bf16.mxu0 %vm376_vm3, %v7267_v57  ;;  %v3421_v57 = vrot.slane %v7582_v38, 4  ;;  %v4248_v17 = vsel %vm1186_vm10, %v7453_v13, 0  ;;  %v4245_v9 = vsel %vm1183_vm13, %v7466_v1, 0  ;;  %vm8614_vm4 = vcmp.ne.s16.totalorder %v7200_v48, 0 }
  0xe5   : > { %v3781_v3 = vrot.slane %v3779_v35, 5  ;;  %v3751_v55 = vsel %vm8614_vm4, %v7439_v18, 0  ;;  %v4295_v22 = vrot.slane %v4293_v23, 4  ;;  %v4299_v35 = vshrl.u32 %v4248_v17, 16 }
  0xe6   : > { %6345 = vmatmul.mubr.msk.bf16.gmra.mrb[68].mxu1 %vm376_vm3, %v3009_v28  ;;  %v4286_v28 = vrot.slane %v4284_v7, 4  ;;  %v3790_v10 = vrot.slane %v3788_v25, 5  ;;  %v4302_v5 = vshll.u32 %v4248_v17, 16  ;;  %v4264_v32 = vshrl.u32 %v4244_v45, 16 }
  0xe7   : > { %6348 = vmatprep.mubr.msk.bf16.mxu1 %vm376_vm3, %v3018_v4  ;;  %v4292_v4 = vrot.slane %v4290_v37, 3  ;;  %v7627_v40 = vor.u32 %v3781_v3, %v3778_v58  ;;  %v4301_v50 = vrot.slane %v4299_v35, 3  ;;  %v3794_v18 = vshrl.u32 %v3751_v55, 16  ;;  %v8615_v3 = vld [vmem:[#allocation10_spill] sm:$0xff] }
  0xe8   : > { %v7632_v63 = vor.u32 %v4286_v28, %v4283_v31  ;;  %v4304_v7 = vrot.slane %v4302_v5, 4  ;;  %v4272_v2 = vshrl.u32 %v4245_v9, 16  ;;  %v3797_v58 = vshll.u32 %v3751_v55, 16  ;;  %v7643_v28 = vld [vmem:[#allocation2 + $0x40] sm:$0xff] }
  0xe9   : > { %v4296_v1 = vor.u32 %v4295_v22, %v4292_v4  ;;  %vm8616_vm12 = vcmp.ne.s16.totalorder %v8615_v3, 0  ;;  %v3783_v23 = vsel %vm1038_vm8, %v3774_v15, %v7627_v40  ;;  %v8617_v4 = vld [vmem:[#allocation11_spill] sm:$0xff]  ;;  %v3796_v55 = vrot.slane %v3794_v18, 4 }
  0xea   : > { %v3752_v25 = vsel %vm8616_vm12, %v7444_v30, 0  ;;  %v4305_v37 = vor.u32 %v4304_v7, %v4301_v50  ;;  %vm8618_vm13 = vcmp.ne.s16.totalorder %v8617_v4, 0  ;;  %v8619_v30 = vld [vmem:[#allocation12_spill] sm:$0xff]  ;;  %v3799_v15 = vrot.slane %v3797_v58, 5  ;;  %v7669_v7 = vld [vmem:[#allocation2 + $0x48] sm:$0xff]  ;;  %v8624_v4 = vld [vmem:[#allocation15_spill] sm:$0xff] }
  0xeb   : > { %6375 = vmatmul.mubr.msk.bf16.gmra.mrb[64].mxu0 %vm376_vm3, %v7282_v62  ;;  %v4249_v62 = vsel %vm1187_vm5, %v7468_v27, 0  ;;  %v7638_v41 = vsel %vm1217_vm2, %v7632_v63, %v4296_v1  ;;  %v3753_v17 = vsel %vm8618_vm13, %v7453_v13, 0  ;;  %vm8620_vm10 = vcmp.ne.s16.totalorder %v8619_v30, 0 }
  0xec   : > { %6378 = vmatprep.mubr.msk.bf16.mxu0 %vm376_vm3, %v7304_v59  ;;  %v4308_v44 = vshrl.u32 %v4249_v62, 16  ;;  %v4311_v42 = vshll.u32 %v4249_v62, 16  ;;  %v4267_v59 = vshll.u32 %v4244_v45, 16  ;;  %v4275_v45 = vshll.u32 %v4245_v9, 16 }
  0xed   : > { %v7651_v22 = vsel %vm1217_vm2, %v4296_v1, %v4305_v37  ;;  %v3754_v35 = vsel %vm8620_vm10, %v7468_v27, 0  ;;  %v3803_v62 = vshrl.u32 %v3752_v25, 16  ;;  %v3806_v9 = vshll.u32 %v3752_v25, 16 }
  0xee   : > { %6349 = vmatmul.mubr.msk.bf16.gmra.mrb[72].mxu1 %vm376_vm3, %v3027_v54  ;;  %v4310_v31 = vrot.slane %v4308_v44, 3  ;;  %v4313_v54 = vrot.slane %v4311_v42, 4  ;;  %v3755_v13 = vsel %vm2369_vm14, %v7643_v28, 0  ;;  %v4269_v1 = vrot.slane %v4267_v59, 4 }
  0xef   : > { %6352 = vmatprep.mubr.msk.bf16.mxu1 %vm376_vm3, %v3036_v52  ;;  %v4266_v52 = vrot.slane %v4264_v32, 3  ;;  %v3812_v50 = vshrl.u32 %v3753_v17, 16  ;;  %v3815_v18 = vshll.u32 %v3753_v17, 16  ;;  %v4277_v44 = vrot.slane %v4275_v45, 4  ;;  %v8622_v17 = vld [vmem:[#allocation14_spill] sm:$0xff] }
  0xf0   : > { %v7656_v5 = vor.u32 %v4313_v54, %v4310_v31  ;;  %v3821_v42 = vshrl.u32 %v3754_v35, 16  ;;  %v3824_v58 = vshll.u32 %v3754_v35, 16  ;;  %v3791_v59 = vor.u32 %v3790_v10, %v3787_v24  ;;  %v7680_v31 = vld [vmem:[#allocation2 + $0x50] sm:$0xff] }
  0xf1   : > { %v3830_v25 = vshrl.u32 %v3755_v13, 16  ;;  %v3805_v54 = vrot.slane %v3803_v62, 4  ;;  %v3808_v45 = vrot.slane %v3806_v9, 5  ;;  %vm8623_vm5 = vcmp.ne.s16.totalorder %v8622_v17, 0 }
  0xf2   : > { %v7667_v27 = vsel %vm1217_vm2, %v4305_v37, %v7656_v5  ;;  %v3833_v37 = vshll.u32 %v3755_v13, 16  ;;  %v4841_v38 = vsel %vm1418_vm0, %v7458_v19, 0  ;;  %v4270_v35 = vor.u32 %v4269_v1, %v4266_v52 }
  0xf3   : > { %6379 = vmatmul.mubr.msk.bf16.gmra.mrb[68].mxu0 %vm376_vm3, %v7576_v26  ;;  %v4274_v26 = vrot.slane %v4272_v2, 3  ;;  %v3800_v2 = vor.u32 %v3799_v15, %v3796_v55  ;;  %v3823_v10 = vrot.slane %v3821_v42, 4  ;;  %v3826_v13 = vrot.slane %v3824_v58, 5 }
  0xf4   : > { %6382 = vmatprep.mubr.msk.bf16.mxu0 %vm376_vm3, %v7591_v61  ;;  %v7678_v61 = vsel %vm1418_vm0, %v3419_v51, %v3421_v57  ;;  %v3814_v51 = vrot.slane %v3812_v50, 4  ;;  %v3817_v57 = vrot.slane %v3815_v18, 5  ;;  %vm8625_vm6 = vcmp.ne.s16.totalorder %v8624_v4, 0 }
  0xf5   : > { %v4278_v24 = vor.u32 %v4277_v44, %v4274_v26  ;;  %v3832_v55 = vrot.slane %v3830_v25, 4  ;;  %v3835_v15 = vrot.slane %v3833_v37, 5  ;;  %v4250_v62 = vsel %vm1188_vm1, %v7643_v28, 0  ;;  %v7716_v37 = vld [vmem:[#allocation2 + $0x58] sm:$0xff] }
  0xf6   : > { %6353 = vmatmul.mubr.msk.bf16.gmra.mrb[76].mxu1 %vm376_vm3, %v7602_v33  ;;  %v3756_v33 = vsel %vm8623_vm5, %v7669_v7, 0  ;;  %v3792_v19 = vsel %vm1038_vm8, %v7627_v40, %v3791_v59  ;;  %v3801_v52 = vsel %vm1038_vm8, %v3791_v59, %v3800_v2  ;;  %v3809_v1 = vor.u32 %v3808_v45, %v3805_v54 }
  0xf7   : > { %6392 = vmatprep.mubr.msk.bf16.mxu1 %vm376_vm3, %v3783_v23  ;;  %v3757_v23 = vsel %vm8625_vm6, %v7680_v31, 0  ;;  %v3839_v9 = vshrl.u32 %v3756_v33, 16  ;;  %v3842_v50 = vshll.u32 %v3756_v33, 16  ;;  %v3818_v18 = vor.u32 %v3817_v57, %v3814_v51 }
  0xf8   : > { %vm8626_vm7 = vcmp.ne.s16.totalorder %v7074_v47, 0  ;;  %v3848_v26 = vshrl.u32 %v3757_v23, 16  ;;  %v3851_v44 = vshll.u32 %v3757_v23, 16  ;;  %v4279_v42 = vsel %vm1217_vm2, %v4270_v35, %v4278_v24 }
  0xf9   : > { %v4251_v43 = vsel %vm8626_vm7, %v7669_v7, 0  ;;  %v3827_v40 = vor.u32 %v3826_v13, %v3823_v10  ;;  %v4317_v58 = vshrl.u32 %v4250_v62, 16  ;;  %v7714_v59 = vor.u32 %v3835_v15, %v3832_v55  ;;  %v8627_v13 = vld [vmem:[#allocation16_spill] sm:$0xff] }
  0xfa   : > { %v4320_v47 = vshll.u32 %v4250_v62, 16  ;;  %v3841_v25 = vrot.slane %v3839_v9, 4  ;;  %v3844_v54 = vrot.slane %v3842_v50, 5  ;;  %v4329_v45 = vshll.u32 %v4251_v43, 16 }
  0xfb   : > { %6383 = vmatmul.mubr.msk.bf16.gmra.mrb[72].mxu0 %vm376_vm3, %v7596_v56  ;;  %v7707_v56 = vsel %vm1418_vm0, %v7507_v39, 0  ;;  %v4326_v39 = vshrl.u32 %v4251_v43, 16  ;;  %v3760_v33 = vsel %vm2374_vm9, %v7524_v8, 0  ;;  %v3810_v35 = vsel %vm1038_vm8, %v3800_v2, %v3809_v1 }
  0xfc   : > { %6386 = vmatprep.mubr.msk.bf16.mxu0 %vm376_vm3, %v7607_v16  ;;  %v7712_v16 = vsel %vm1217_vm2, %v4278_v24, %v7632_v63  ;;  %v3819_v63 = vsel %vm1038_vm8, %v3809_v1, %v3818_v18  ;;  %v3850_v51 = vrot.slane %v3848_v26, 4  ;;  %v3853_v57 = vrot.slane %v3851_v44, 5 }
  0xfd   : > { %v7725_v10 = vsel %vm1038_vm8, %v3818_v18, %v3827_v40  ;;  %vm8628_vm1 = vcmp.ne.s16.totalorder %v8627_v13, 0  ;;  %v3875_v55 = vshrl.u32 %v3760_v33, 16  ;;  %v7736_v2 = vsel %vm1038_vm8, %v3827_v40, %v7714_v59  ;;  %v7760_v40 = vld [vmem:[#allocation2 + $0x60] sm:$0xff] }
  0xfe   : > { %6393 = vmatmul.mubr.msk.bf16.vlgmr.msra.gmra.mrb[80].mxu1 %vm376_vm3, %v3792_v19  ;;  %v7732_v23 = vsel %vm8628_vm1, %v7716_v37, 0  ;;  %v7738_v62 = vrot.slane %v4320_v47, 4  ;;  %v3878_v9 = vshll.u32 %v3760_v33, 16  ;;  %vm8629_vm11 = vcmp.ne.s16.totalorder %v6889_v46, 0 }
  0xff   : > { %6459 = vmatpush3.bf16.msra.mxu1 %v4841_v38  ;;  %6396 = vmatprep.mubr.msk.bf16.mxu1 %vm376_vm3, %v3801_v52  ;;  %v7727_v38 = vrot.slane %v4317_v58, 3  ;;  %v4255_v19 = vsel %vm8629_vm11, %v7524_v8, 0  ;;  %v7745_v1 = vor.u32 %v3844_v54, %v3841_v25  ;;  %v7747_v50 = vrot.slane %v4326_v39, 3 }
 0x100   : > { %v7749_v18 = vrot.slane %v4329_v45, 4  ;;  %v4362_v43 = vshrl.u32 %v4255_v19, 16  ;;  %v7752_v44 = vor.u32 %v3853_v57, %v3850_v51  ;;  %vm8630_vm4 = vcmp.ne.s16.totalorder %v6773_v12, 0 }
 0x101   : > { %v6240_v24 = vpop.f32.mrb[0].mxu1  ;;  %v7757_v46 = vsel %vm8630_vm4, %v7680_v31, 0  ;;  %v3877_v58 = vrot.slane %v3875_v55, 4  ;;  %v3761_v25 = vsel %vm2375_vm15, %v7531_v21, 0  ;;  %vm8631_vm12 = vcmp.ne.s16.totalorder %v6951_v49, 0 }
 0x102   : > { %v1520_v15 = vpop.f32.mrb[1].mxu1  ;;  %v4364_v47 = vrot.slane %v4362_v43, 3  ;;  %v3880_v12 = vrot.slane %v3878_v9, 5  ;;  %v3884_v39 = vshrl.u32 %v3761_v25, 16  ;;  %v3887_v45 = vshll.u32 %v3761_v25, 16 }
 0x103   : > { %v6241_v52 = vpop.f32.mrb[2].mxu1  ;;  %6387 = vmatmul.mubr.msk.bf16.gmra.mrb[76].mxu0 %vm376_vm3, %v7678_v61  ;;  %v4365_v61 = vshll.u32 %v4255_v19, 16  ;;  %vm8632_vm13 = vcmp.ne.s16.totalorder %v7408_v6, 0  ;;  %v8633_v19 = vld [vmem:[#allocation17_spill] sm:$0xff]  ;;  %vm1583_vm5 = vcmask 523264   ;;  %vm8635_vm6 = vcmp.ne.s16.totalorder %v6973_v0, 0 }
 0x104   : > { %v1523_v26 = vpop.f32.mrb[3].mxu1  ;;  %6426 = vmatprep.mubr.msk.bf16.mxu0 %vm376_vm3, %v4279_v42  ;;  %v4256_v42 = vsel %vm8631_vm12, %v7531_v21, 0  ;;  %v3762_v55 = vsel %vm8632_vm13, %v7538_v34, 0  ;;  %vm8634_vm10 = vcmp.ne.s16.totalorder %v8633_v19, 0  ;;  %v3889_v9 = vrot.slane %v3887_v45, 5  ;;  %1602 = vst.msk [vmem:[#allocation3 + $0x90] sm:$0xff] %vm1583_vm5, %v6240_v24 }
 0x105   : > { %v4367_v54 = vrot.slane %v4365_v61, 4  ;;  %v4371_v51 = vshrl.u32 %v4256_v42, 16  ;;  %v4374_v57 = vshll.u32 %v4256_v42, 16  ;;  %v7777_v49 = vsel %vm8634_vm10, %v7760_v40, 0  ;;  %1600 = vst.msk [vmem:[#allocation3 + $0x80] sm:$0xff] %vm1583_vm5, %v1520_v15  ;;  %1603 = vst.msk [vmem:[#allocation3 + $0x98] sm:$0xff] %vm1583_vm5, %v6241_v52 }
 0x106   : > { %6397 = vmatmul.mubr.msk.bf16.gmra.mrb[84].mxu1 %vm376_vm3, %v3810_v35  ;;  %v3886_v35 = vrot.slane %v3884_v39, 4  ;;  %v3896_v25 = vshll.u32 %v3762_v55, 16  ;;  %v7781_v33 = vor.u32 %v3880_v12, %v3877_v58  ;;  %v4257_v8 = vsel %vm8635_vm6, %v7538_v34, 0  ;;  %1601 = vst.msk [vmem:[#allocation3 + $0x88] sm:$0xff] %vm1583_vm5, %v1523_v26  ;;  %v8637_v24 = vld [vmem:[#allocation7_spill] sm:$0xff] }
 0x107   : > { %6400 = vmatprep.mubr.msk.bf16.mxu1 %vm376_vm3, %v3819_v63  ;;  %v7779_v21 = vor.u32 %v4367_v54, %v4364_v47  ;;  %v4373_v43 = vrot.slane %v4371_v51, 3  ;;  %v4376_v61 = vrot.slane %v4374_v57, 4  ;;  %v3893_v63 = vshrl.u32 %v3762_v55, 16 }
 0x108   : > { %v3890_v42 = vor.u32 %v3889_v9, %v3886_v35  ;;  %v3898_v54 = vrot.slane %v3896_v25, 5  ;;  %v4380_v58 = vshrl.u32 %v4257_v8, 16  ;;  %v4383_v34 = vshll.u32 %v4257_v8, 16 }
 0x109   : > { %v4377_v6 = vor.u32 %v4376_v61, %v4373_v43  ;;  %v3895_v47 = vrot.slane %v3893_v63, 4  ;;  %vm8636_vm7 = vcmp.ne.s16.totalorder %v7427_v60, 0  ;;  %vm8638_vm1 = vcmp.ne.s16.totalorder %v8637_v24, 0 }
 0x10a   : > { %v7797_v0 = vsel %vm1038_vm8, %v7781_v33, %v3890_v42  ;;  %v4258_v15 = vsel %vm8638_vm1, %v7543_v14, 0  ;;  %v4382_v26 = vrot.slane %v4380_v58, 3  ;;  %v4385_v12 = vrot.slane %v4383_v34, 4 }
 0x10b   : > { %6427 = vmatmul.mubr.msk.bf16.vlgmr.msra.gmra.mrb[80].mxu0 %vm376_vm3, %v7712_v16  ;;  %v3763_v16 = vsel %vm8636_vm7, %v7543_v14, 0  ;;  %v7807_v52 = vsel %vm1217_vm2, %v7779_v21, %v4377_v6  ;;  %v4389_v39 = vshrl.u32 %v4258_v15, 16  ;;  %v4392_v45 = vshll.u32 %v4258_v15, 16 }
 0x10c   : > { %6493 = vmatpush3.bf16.msra.mxu0 %v7707_v56  ;;  %6430 = vmatprep.mubr.msk.bf16.mxu0 %vm376_vm3, %v7638_v41  ;;  %v3899_v56 = vor.u32 %v3898_v54, %v3895_v47  ;;  %v3902_v41 = vshrl.u32 %v3763_v16, 16  ;;  %v3905_v8 = vshll.u32 %v3763_v16, 16  ;;  %v3866_v51 = vshrl.u32 %v7777_v49, 16  ;;  %v8639_v54 = vld [vmem:[#allocation4_spill] sm:$0xff] }
 0x10d   : > { %v3869_v14 = vshll.u32 %v7777_v49, 16  ;;  %v4386_v9 = vor.u32 %v4385_v12, %v4382_v26  ;;  %v4391_v61 = vrot.slane %v4389_v39, 3  ;;  %v4323_v25 = vor.u32 %v7738_v62, %v7727_v38 }
 0x10e   : > { %6401 = vmatmul.mubr.msk.bf16.gmra.mrb[88].mxu1 %vm376_vm3, %v7725_v10  ;;  %v7816_v57 = vsel %vm1038_vm8, %v3890_v42, %v3899_v56  ;;  %v3904_v55 = vrot.slane %v3902_v41, 4  ;;  %v3907_v43 = vrot.slane %v3905_v8, 5  ;;  %v4394_v10 = vrot.slane %v4392_v45, 4 }
 0x10f   : > { %6404 = vmatprep.mubr.msk.bf16.mxu1 %vm376_vm3, %v7736_v2  ;;  %v6224_v35 = vpop.f32.mrb[0].mxu0  ;;  %v3846_v2 = vsel %vm1038_vm8, %v7714_v59, %v7745_v1  ;;  %v4332_v49 = vor.u32 %v7749_v18, %v7747_v50  ;;  %v4335_v42 = vshrl.u32 %v7757_v46, 16  ;;  %vm8640_vm11 = vcmp.ne.s16.totalorder %v8639_v54, 0 }
 0x110   : > { %1586 = vst.msk [vmem:[#allocation3 + $0x10] sm:$0xff] %vm1583_vm5, %v6224_v35  ;;  %v1456_v63 = vpop.f32.mrb[1].mxu0  ;;  %v4253_v58 = vsel %vm8640_vm11, %v7716_v37, 0  ;;  %v7832_v34 = vsel %vm1217_vm2, %v4377_v6, %v4386_v9  ;;  %v7834_v38 = vor.u32 %v3907_v43, %v3904_v55  ;;  %v7836_v62 = vor.u32 %v4394_v10, %v4391_v61 }
 0x111   : > { %1584 = vst.msk [vmem:[#allocation3] sm:$0xff] %vm1583_vm5, %v1456_v63  ;;  %v6225_v47 = vpop.f32.mrb[2].mxu0  ;;  %v3855_v50 = vsel %vm1038_vm8, %v7745_v1, %v7752_v44  ;;  %v4338_v18 = vshll.u32 %v7757_v46, 16  ;;  %v8641_v16 = vshrl.u32 %v7732_v23, 16  ;;  %v8642_v24 = vshll.u32 %v7732_v23, 16  ;;  %v8643_v23 = vld [vmem:[#allocation5_spill] sm:$0xff] }
 0x112   : > { %1587 = vst.msk [vmem:[#allocation3 + $0x18] sm:$0xff] %vm1583_vm5, %v6225_v47  ;;  %v1459_v59 = vpop.f32.mrb[3].mxu0  ;;  %v3868_v26 = vrot.slane %v3866_v51, 4  ;;  %v3871_v41 = vrot.slane %v3869_v14, 5  ;;  %v7858_v1 = vsel %vm1217_vm2, %v4386_v9, %v7836_v62  ;;  %v4344_v46 = vshrl.u32 %v4253_v58, 16 }
 0x113   : > { %6431 = vmatmul.mubr.msk.bf16.gmra.mrb[84].mxu0 %vm376_vm3, %v7651_v22  ;;  %v3859_v6 = vrot.slane %v8641_v16, 4  ;;  %v3862_v15 = vrot.slane %v8642_v24, 5  ;;  %1585 = vst.msk [vmem:[#allocation3 + $0x8] sm:$0xff] %vm1583_vm5, %v1459_v59  ;;  %v7854_v22 = vsel %vm1038_vm8, %v3899_v56, %v7834_v38  ;;  %v4347_v12 = vshll.u32 %v4253_v58, 16  ;;  %v3747_v58 = vld [vmem:[#allocation2 + $0x88] sm:$0x1f] }
 0x114   : > { %6434 = vmatprep.mubr.msk.bf16.mxu0 %vm376_vm3, %v7667_v27  ;;  %vm8644_vm4 = vcmp.ne.s16.totalorder %v8643_v23, 0  ;;  %v4324_v27 = vsel %vm1217_vm2, %v7656_v5, %v4323_v25  ;;  %v4333_v56 = vsel %vm1217_vm2, %v4323_v25, %v4332_v49  ;;  %v4337_v45 = vrot.slane %v4335_v42, 3  ;;  %v8645_v24 = vld [vmem:[#allocation19_spill] sm:$0xff] }
 0x115   : > { %v4254_v8 = vsel %vm8644_vm4, %v7760_v40, 0  ;;  %v3863_v39 = vor.u32 %v3862_v15, %v3859_v6  ;;  %v4340_v51 = vrot.slane %v4338_v18, 4  ;;  %v3872_v14 = vor.u32 %v3871_v41, %v3868_v26  ;;  %v7886_v15 = vld [vmem:[#allocation2 + $0x88] sm:$0xff] }
 0x116   : > { %6405 = vmatmul.mubr.msk.bf16.gmra.mrb[92].mxu1 %vm376_vm3, %v3846_v2  ;;  %v4346_v55 = vrot.slane %v4344_v46, 3  ;;  %v4349_v35 = vrot.slane %v4347_v12, 4  ;;  %v4353_v9 = vshrl.u32 %v4254_v8, 16  ;;  %v4356_v43 = vshll.u32 %v4254_v8, 16 }
 0x117   : > { %6408 = vmatprep.mubr.msk.bf16.mxu1 %vm376_vm3, %v3855_v50  ;;  %v3864_v61 = vsel %vm1038_vm8, %v7752_v44, %v3863_v39  ;;  %v4341_v5 = vor.u32 %v4340_v51, %v4337_v45  ;;  %v3873_v10 = vsel %vm1038_vm8, %v3863_v39, %v3872_v14  ;;  %v3882_v6 = vsel %vm1038_vm8, %v3872_v14, %v7781_v33 }
 0x118   : > { %v4350_v63 = vor.u32 %v4349_v35, %v4346_v55  ;;  %v4355_v2 = vrot.slane %v4353_v9, 3  ;;  %v4358_v25 = vrot.slane %v4356_v43, 4  ;;  %vm8646_vm12 = vcmp.ne.s16.totalorder %v8645_v24, 0 }
 0x119   : > { %v4342_v54 = vsel %vm1217_vm2, %v4332_v49, %v4341_v5  ;;  %v3764_v49 = vsel %vm8646_vm12, %v3747_v58, 0  ;;  %vm8647_vm13 = vcmp.ne.s16.totalorder %v8619_v30, 0  ;;  %vm8651_vm6 = vcmp.ne.s16.totalorder %v8624_v4, 0 }
 0x11a   : > { %v4351_v59 = vsel %vm1217_vm2, %v4341_v5, %v4350_v63  ;;  %v4359_v50 = vor.u32 %v4358_v25, %v4355_v2  ;;  %v5123_v41 = vsel %vm8647_vm13, %v7643_v28, 0  ;;  %v3911_v30 = vshrl.u32 %v3764_v49, 16 }
 0x11b   : > { %6435 = vmatmul.mubr.msk.bf16.gmra.mrb[88].mxu0 %vm376_vm3, %v4324_v27  ;;  %v5190_v12 = vshrl.u32 %v5123_v41, 16  ;;  %v5193_v8 = vshll.u32 %v5123_v41, 16  ;;  %v5124_v27 = vsel %vm2369_vm14, %v7669_v7, 0  ;;  %v3914_v39 = vshll.u32 %v3764_v49, 16  ;;  %v4723_v41 = vld [vmem:[#allocation2 + $0x10] sm:$0xf0] }
 0x11c   : > { %6438 = vmatprep.mubr.msk.bf16.mxu0 %vm376_vm3, %v4333_v56  ;;  %v4360_v33 = vsel %vm1217_vm2, %v4350_v63, %v4359_v50  ;;  %v8648_v56 = vld [vmem:[#allocation9_spill] sm:$0xff]  ;;  %v5199_v51 = vshrl.u32 %v5124_v27, 16  ;;  %v5202_v35 = vshll.u32 %v5124_v27, 16  ;;  %vm8650_vm14 = vcmp.ne.s16.totalorder %v8622_v17, 0  ;;  %v8653_v27 = vld [vmem:[#allocation8_spill] sm:$0xff] }
 0x11d   : > { %vm8649_vm10 = vcmp.ne.s16.totalorder %v8648_v56, 0  ;;  %v5192_v14 = vrot.slane %v5190_v12, 4  ;;  %v5195_v55 = vrot.slane %v5193_v8, 5  ;;  %v5125_v32 = vsel %vm8650_vm14, %v7680_v31, 0 }
 0x11e   : > { %6409 = vmatmul.mubr.msk.bf16.gmra.mrb[96].mxu1 %vm376_vm3, %v3864_v61  ;;  %v6244_v42 = vpop.f32.mrb[4].mxu1  ;;  %v4259_v45 = vsel %vm8649_vm10, %v7886_v15, 0  ;;  %v4369_v9 = vsel %vm1217_vm2, %v4359_v50, %v7779_v21  ;;  %v5201_v43 = vrot.slane %v5199_v51, 4  ;;  %v5208_v61 = vshrl.u32 %v5125_v32, 16  ;;  %v4243_v21 = vld [vmem:[#allocation2 + $0x90] sm:$0xf] }
 0x11f   : > { %6412 = vmatprep.mubr.msk.bf16.mxu1 %vm376_vm3, %v3873_v10  ;;  %1606 = vst.msk [vmem:[#allocation3 + $0xb0] sm:$0xff] %vm1583_vm5, %v6244_v42  ;;  %v1536_v47 = vpop.f32.mrb[5].mxu1  ;;  %v5211_v5 = vshll.u32 %v5125_v32, 16  ;;  %v4398_v10 = vshrl.u32 %v4259_v45, 16  ;;  %v4401_v63 = vshll.u32 %v4259_v45, 16  ;;  %v5204_v2 = vrot.slane %v5202_v35, 5 }
 0x120   : > { %1604 = vst.msk [vmem:[#allocation3 + $0xa0] sm:$0xff] %vm1583_vm5, %v1536_v47  ;;  %v6245_v44 = vpop.f32.mrb[6].mxu1  ;;  %v5210_v42 = vrot.slane %v5208_v61, 4  ;;  %v3913_v17 = vrot.slane %v3911_v30, 4  ;;  %v7916_v50 = vor.u32 %v5195_v55, %v5192_v14  ;;  %vm8652_vm7 = vcmp.ne.s16.totalorder %v8627_v13, 0 }
 0x121   : > { %1607 = vst.msk [vmem:[#allocation3 + $0xb8] sm:$0xff] %vm1583_vm5, %v6245_v44  ;;  %v1539_v18 = vpop.f32.mrb[7].mxu1  ;;  %v5213_v47 = vrot.slane %v5211_v5, 5  ;;  %v3916_v44 = vrot.slane %v3914_v39, 5  ;;  %vm8654_vm1 = vcmp.ne.s16.totalorder %v8653_v27, 0  ;;  %v4400_v45 = vrot.slane %v4398_v10, 3 }
 0x122   : > { %1605 = vst.msk [vmem:[#allocation3 + $0xa8] sm:$0xff] %vm1583_vm5, %v1539_v18  ;;  %v6228_v16 = vpop.f32.mrb[4].mxu0  ;;  %v5205_v18 = vor.u32 %v5204_v2, %v5201_v43  ;;  %v4260_v30 = vsel %vm8654_vm1, %v4243_v21, 0  ;;  %v5100_v51 = vld [vmem:[#allocation2 + $0x10] sm:$0xf0]  ;;  %v4403_v35 = vrot.slane %v4401_v63, 4 }
 0x123   : > { %6439 = vmatmul.mubr.msk.bf16.gmra.mrb[92].mxu0 %vm376_vm3, %v4342_v54  ;;  %1590 = vst.msk [vmem:[#allocation3 + $0x30] sm:$0xff] %vm1583_vm5, %v6228_v16  ;;  %v1472_v26 = vpop.f32.mrb[5].mxu0  ;;  %v5214_v16 = vor.u32 %v5213_v47, %v5210_v42  ;;  %v3917_v56 = vor.u32 %v3916_v44, %v3913_v17  ;;  %v4759_v32 = vrot.slane %v4723_v41, 4  ;;  %vm8655_vm11 = vcmp.ne.s16.totalorder %v7133_v11, 0  ;;  %v4727_v27 = vld [vmem:[#allocation2 + $0x30] sm:$0xff] }
 0x124   : > { %6442 = vmatprep.mubr.msk.bf16.mxu0 %vm376_vm3, %v4351_v59  ;;  %1588 = vst.msk [vmem:[#allocation3 + $0x20] sm:$0xff] %vm1583_vm5, %v1472_v26  ;;  %v6229_v46 = vpop.f32.mrb[6].mxu0  ;;  %v5127_v26 = vsel %vm8652_vm7, %v7760_v40, 0  ;;  %v5117_v61 = vsel %vm8655_vm11, %v5100_v51, 0  ;;  %vm8656_vm4 = vcmp.ne.s16.totalorder %v7153_v53, 0  ;;  %v4407_v10 = vshrl.u32 %v4260_v30, 16 }
 0x125   : > { %1591 = vst.msk [vmem:[#allocation3 + $0x38] sm:$0xff] %vm1583_vm5, %v6229_v46  ;;  %v1475_v23 = vpop.f32.mrb[7].mxu0  ;;  %v4724_v46 = vld [vmem:[#allocation2 + $0x18] sm:$0xff]  ;;  %v5229_v8 = vshll.u32 %v5127_v26, 16  ;;  %v7934_v13 = vsel %vm1038_vm8, %v5205_v18, %v5214_v16  ;;  %v4404_v2 = vor.u32 %v4403_v35, %v4400_v45  ;;  %v4410_v11 = vshll.u32 %v4260_v30, 16  ;;  %v4725_v53 = vld [vmem:[#allocation2 + $0x20] sm:$0xff] }
 0x126   : > { %6413 = vmatmul.mubr.msk.bf16.gmra.mrb[100].mxu1 %vm376_vm3, %v3882_v6  ;;  %1589 = vst.msk [vmem:[#allocation3 + $0x28] sm:$0xff] %vm1583_vm5, %v1475_v23  ;;  %v5226_v23 = vshrl.u32 %v5127_v26, 16  ;;  %v5118_v5 = vsel %vm8656_vm4, %v4724_v46, 0  ;;  %v5140_v42 = vshll.u32 %v5117_v61, 16  ;;  %vm8657_vm12 = vcmp.ne.s16.totalorder %v7181_v29, 0 }
 0x127   : > { %6416 = vmatprep.mubr.msk.bf16.mxu1 %vm376_vm3, %v7797_v0  ;;  %v5126_v0 = vsel %vm8651_vm6, %v7716_v37, 0  ;;  %v5231_v55 = vrot.slane %v5229_v8, 5  ;;  %v5145_v47 = vshrl.u32 %v5118_v5, 16  ;;  %v4405_v17 = vsel %vm1217_vm2, %v7836_v62, %v4404_v2 }
 0x128   : > { %v5217_v54 = vshrl.u32 %v5126_v0, 16  ;;  %v5220_v58 = vshll.u32 %v5126_v0, 16  ;;  %v5228_v14 = vrot.slane %v5226_v23, 4  ;;  %v5119_v21 = vsel %vm8657_vm12, %v4725_v53, 0 }
 0x129   : > { %v6248_v25 = vpop.f32.mrb[8].mxu1  ;;  %vm8658_vm13 = vcmp.ne.s16.totalorder %v7200_v48, 0  ;;  %v5154_v41 = vshrl.u32 %v5119_v21, 16  ;;  %vm8659_vm10 = vcmp.ne.s16.totalorder %v8615_v3, 0  ;;  %vm8666_vm6 = vcmp.ne.s16.totalorder %v8645_v24, 0 }
 0x12a   : > { %1610 = vst.msk [vmem:[#allocation3 + $0xd0] sm:$0xff] %vm1583_vm5, %v6248_v25  ;;  %v1552_v59 = vpop.f32.mrb[9].mxu1  ;;  %v5219_v6 = vrot.slane %v5217_v54, 4  ;;  %v5222_v49 = vrot.slane %v5220_v58, 5  ;;  %v7941_v43 = vor.u32 %v5231_v55, %v5228_v14  ;;  %v5137_v25 = vshrl.u32 %v5117_v61, 16  ;;  %v4726_v54 = vld [vmem:[#allocation2 + $0x28] sm:$0xff] }
 0x12b   : > { %6443 = vmatmul.mubr.msk.bf16.gmra.mrb[96].mxu0 %vm376_vm3, %v4360_v33  ;;  %1608 = vst.msk [vmem:[#allocation3 + $0xc0] sm:$0xff] %vm1583_vm5, %v1552_v59  ;;  %v6249_v4 = vpop.f32.mrb[10].mxu1  ;;  %v7926_v33 = vsel %vm1038_vm8, %v7916_v50, %v5205_v18  ;;  %v4762_v58 = vrot.slane %v4725_v53, 4  ;;  %v4764_v44 = vrot.slane %v4726_v54, 4  ;;  %v5142_v18 = vrot.slane %v5140_v42, 5  ;;  %v7977_v14 = vld [vmem:[#allocation2 + $0x38] sm:$0xff] }
 0x12c   : > { %6446 = vmatprep.mubr.msk.bf16.mxu0 %vm376_vm3, %v4369_v9  ;;  %1611 = vst.msk [vmem:[#allocation3 + $0xd8] sm:$0xff] %vm1583_vm5, %v6249_v4  ;;  %v1555_v12 = vpop.f32.mrb[11].mxu1  ;;  %v5223_v39 = vor.u32 %v5222_v49, %v5219_v6  ;;  %v5139_v59 = vrot.slane %v5137_v25, 4  ;;  %v5147_v4 = vrot.slane %v5145_v47, 4  ;;  %v5120_v26 = vsel %vm8658_vm13, %v4726_v54, 0  ;;  %v8660_v42 = vld [vmem:[#allocation11_spill] sm:$0xff] }
 0x12d   : > { %1609 = vst.msk [vmem:[#allocation3 + $0xc8] sm:$0xff] %vm1583_vm5, %v1555_v12  ;;  %v4765_v8 = vsel %vm1418_vm0, %v4762_v58, %v4764_v44  ;;  %v5163_v45 = vshrl.u32 %v5120_v26, 16  ;;  %v5166_v51 = vshll.u32 %v5120_v26, 16  ;;  %v5156_v35 = vrot.slane %v5154_v41, 4 }
 0x12e   : > { %6417 = vmatmul.mubr.msk.bf16.gmra.mrb[104].mxu1 %vm376_vm3, %v7816_v57  ;;  %v4760_v57 = vrot.slane %v4724_v46, 4  ;;  %v7939_v9 = vsel %vm1038_vm8, %v5214_v16, %v5223_v39  ;;  %v7953_v63 = vsel %vm1038_vm8, %v5223_v39, %v7941_v43  ;;  %v5157_v46 = vshll.u32 %v5119_v21, 16 }
 0x12f   : > { %6420 = vmatprep.mubr.msk.bf16.mxu1 %vm376_vm3, %v7854_v22  ;;  %v3918_v22 = vsel %vm1038_vm8, %v7834_v38, %v3917_v56  ;;  %v4409_v38 = vrot.slane %v4407_v10, 3  ;;  %v5143_v30 = vor.u32 %v5142_v18, %v5139_v59  ;;  %v5165_v10 = vrot.slane %v5163_v45, 4  ;;  %v1898_v18 = vld [vmem:[#allocation3] sm:$0xff] }
 0x130   : > { %v4761_v0 = vsel %vm1418_vm0, %v4759_v32, %v4760_v57  ;;  %v4763_v62 = vsel %vm1418_vm0, %v4760_v57, %v4762_v58  ;;  %v5159_v32 = vrot.slane %v5157_v46, 5  ;;  %v4766_v57 = vrot.slane %v4727_v27, 4 }
 0x131   : > { %vm8661_vm14 = vcmp.ne.s16.totalorder %v8660_v42, 0  ;;  %v4774_v42 = vrot.slane %v7680_v31, 4 }
 0x132   : > { %v5122_v47 = vsel %vm8661_vm14, %v7977_v14, 0 }
 0x133   : > { %6447 = vmatmul.mubr.msk.bf16.gmra.mrb[100].mxu0 %vm376_vm3, %v7807_v52  ;;  %v5148_v52 = vshll.u32 %v5118_v5, 16  ;;  %v4768_v5 = vrot.slane %v7977_v14, 4  ;;  %v5181_v26 = vshrl.u32 %v5122_v47, 16  ;;  %v1904_v14 = vld [vmem:[#allocation3 + $0x30] sm:$0xff] }
 0x134   : > { %6450 = vmatprep.mubr.msk.bf16.mxu0 %vm376_vm3, %v7832_v34  ;;  %v4412_v34 = vrot.slane %v4410_v11, 4  ;;  %v5168_v11 = vrot.slane %v5166_v51, 5 }
 0x135   : > { %v5150_v16 = vrot.slane %v5148_v52, 5  ;;  %v4767_v52 = vsel %vm1418_vm0, %v4764_v44, %v4766_v57  ;;  %v4769_v3 = vsel %vm1418_vm0, %v4766_v57, %v4768_v5 }
 0x136   : > { %6421 = vmatmul.mubr.msk.bf16.gmra.mrb[108].mxu1 %vm376_vm3, %v3918_v22  ;;  %v4413_v23 = vor.u32 %v4412_v34, %v4409_v38  ;;  %v1900_v38 = vld [vmem:[#allocation3 + $0x10] sm:$0xff] }
 0x137   : > { %6460 = vmatprep.mubr.msk.bf16.mxu1 %vm376_vm3, %v4761_v0  ;;  %v5151_v39 = vor.u32 %v5150_v16, %v5147_v4  ;;  %v5121_v0 = vsel %vm8659_vm10, %v4727_v27, 0  ;;  %v5169_v16 = vor.u32 %v5168_v11, %v5165_v10  ;;  %v1905_v11 = vld [vmem:[#allocation3 + $0x38] sm:$0xff] }
 0x138   : > { %v6232_v6 = vpop.f32.mrb[8].mxu0  ;;  %v4414_v61 = vsel %vm1217_vm2, %v4404_v2, %v4413_v23  ;;  %v5160_v2 = vor.u32 %v5159_v32, %v5156_v35  ;;  %v5175_v34 = vshll.u32 %v5121_v0, 16  ;;  %vm8662_vm2 = vcmp.ne.s16.totalorder %v8633_v19, 0 }
 0x139   : > { %1594 = vst.msk [vmem:[#allocation3 + $0x50] sm:$0xff] %vm1583_vm5, %v6232_v6  ;;  %v1488_v49 = vpop.f32.mrb[9].mxu0  ;;  %v5152_v22 = vsel %vm1038_vm8, %v5143_v30, %v5151_v39 }
 0x13a   : > { %1592 = vst.msk [vmem:[#allocation3 + $0x40] sm:$0xff] %vm1583_vm5, %v1488_v49  ;;  %v6252_v29 = vpop.f32.mrb[12].mxu1  ;;  %v6233_v12 = vpop.f32.mrb[10].mxu0  ;;  %v1901_v49 = vld [vmem:[#allocation3 + $0x18] sm:$0xff]  ;;  %v5170_v30 = vsel %vm1038_vm8, %v5160_v2, %v5169_v16 }
 0x13b   : > { %6451 = vmatmul.mubr.msk.bf16.gmra.mrb[104].mxu0 %vm376_vm3, %v7858_v1  ;;  %1614 = vst.msk [vmem:[#allocation3 + $0xf0] sm:$0xff] %vm1583_vm5, %v6252_v29  ;;  %1595 = vst.msk [vmem:[#allocation3 + $0x58] sm:$0xff] %vm1583_vm5, %v6233_v12  ;;  %v1568_v48 = vpop.f32.mrb[13].mxu1  ;;  %v1491_v1 = vpop.f32.mrb[11].mxu0  ;;  %v1899_v29 = vld [vmem:[#allocation3 + $0x8] sm:$0xff]  ;;  %v4770_v12 = vrot.slane %v7643_v28, 4 }
 0x13c   : > { %6454 = vmatprep.mubr.msk.bf16.mxu0 %vm376_vm3, %v4405_v17  ;;  %1612 = vst.msk [vmem:[#allocation3 + $0xe0] sm:$0xff] %vm1583_vm5, %v1568_v48  ;;  %1593 = vst.msk [vmem:[#allocation3 + $0x48] sm:$0xff] %vm1583_vm5, %v1491_v1  ;;  %v6253_v56 = vpop.f32.mrb[14].mxu1  ;;  %v5172_v17 = vshrl.u32 %v5121_v0, 16  ;;  %v5177_v48 = vrot.slane %v5175_v34, 5  ;;  %v4772_v1 = vrot.slane %v7669_v7, 4 }
 0x13d   : > { %1615 = vst.msk [vmem:[#allocation3 + $0xf8] sm:$0xff] %vm1583_vm5, %v6253_v56  ;;  %v1571_v55 = vpop.f32.mrb[15].mxu1  ;;  %v5183_v56 = vrot.slane %v5181_v26, 4  ;;  %v4771_v28 = vsel %vm1418_vm0, %v4768_v5, %v4770_v12  ;;  %v1902_v7 = vld [vmem:[#allocation3 + $0x20] sm:$0xff] }
 0x13e   : > { %6461 = vmatmul.mubr.msk.bf16.vlgmr.msra.gmra.mrb[112].mxu1 %vm376_vm3, %v4763_v62  ;;  %1613 = vst.msk [vmem:[#allocation3 + $0xe8] sm:$0xff] %vm1583_vm5, %v1571_v55  ;;  %v5184_v62 = vshll.u32 %v5122_v47, 16  ;;  %v5174_v27 = vrot.slane %v5172_v17, 4  ;;  %v4773_v55 = vsel %vm1418_vm0, %v4770_v12, %v4772_v1  ;;  %v4776_v17 = vrot.slane %v7716_v37, 4 }
 0x13f   : > { %6464 = vmatprep.mubr.msk.bf16.mxu1 %vm376_vm3, %v4765_v8  ;;  %v5161_v8 = vsel %vm1038_vm8, %v5151_v39, %v5160_v2 }
 0x140   : > { %v6236_v53 = vpop.f32.mrb[12].mxu0  ;;  %v5186_v45 = vrot.slane %v5184_v62, 5  ;;  %v5178_v39 = vor.u32 %v5177_v48, %v5174_v27  ;;  %v4777_v37 = vsel %vm1418_vm0, %v4774_v42, %v4776_v17  ;;  %v4778_v48 = vrot.slane %v7760_v40, 4 }
 0x141   : > { %1598 = vst.msk [vmem:[#allocation3 + $0x70] sm:$0xff] %vm1583_vm5, %v6236_v53  ;;  %v1504_v25 = vpop.f32.mrb[13].mxu0  ;;  %v1906_v62 = vld [vmem:[#allocation3 + $0x40] sm:$0xff] }
 0x142   : > { %1596 = vst.msk [vmem:[#allocation3 + $0x60] sm:$0xff] %vm1583_vm5, %v1504_v25  ;;  %v6258_v54 = vpop.f32.mrb[16].mxu1  ;;  %v6237_v58 = vpop.f32.mrb[14].mxu0  ;;  %v5187_v57 = vor.u32 %v5186_v45, %v5183_v56  ;;  %v1903_v25 = vld [vmem:[#allocation3 + $0x28] sm:$0xff]  ;;  %v1909_v12 = vld [vmem:[#allocation3 + $0x58] sm:$0xff] }
 0x143   : > { %6455 = vmatmul.mubr.msk.bf16.gmra.mrb[108].mxu0 %vm376_vm3, %v4414_v61  ;;  %v1932_v21 = vadd.f32 %v6258_v54, %v1900_v38  ;;  %1599 = vst.msk [vmem:[#allocation3 + $0x78] sm:$0xff] %vm1583_vm5, %v6237_v58  ;;  %v1771_v59 = vpop.f32.mrb[17].mxu1  ;;  %v1507_v4 = vpop.f32.mrb[15].mxu0  ;;  %v5179_v54 = vsel %vm1038_vm8, %v5169_v16, %v5178_v39  ;;  %v1907_v27 = vld [vmem:[#allocation3 + $0x48] sm:$0xff] }
 0x144   : > { %6494 = vmatprep.mubr.msk.bf16.mxu0 %vm376_vm3, %v5152_v22  ;;  %v1930_v6 = vadd.f32 %v1898_v18, %v1771_v59  ;;  %1597 = vst.msk [vmem:[#allocation3 + $0x68] sm:$0xff] %vm1583_vm5, %v1507_v4  ;;  %v6259_v44 = vpop.f32.mrb[18].mxu1  ;;  %v5188_v34 = vsel %vm1038_vm8, %v5178_v39, %v5187_v57  ;;  %v4775_v4 = vsel %vm1418_vm0, %v4772_v1, %v4774_v42 }
 0x145   : > { %1964 = vst.msk [vmem:[#allocation3 + $0x10] sm:$0xff] %vm1583_vm5, %v1932_v21  ;;  %v1933_v41 = vadd.f32 %v6259_v44, %v1901_v49  ;;  %v1774_v46 = vpop.f32.mrb[19].mxu1  ;;  %v1908_v44 = vld [vmem:[#allocation3 + $0x50] sm:$0xff]  ;;  %v5197_v45 = vsel %vm1038_vm8, %v5187_v57, %v7916_v50 }
 0x146   : > { %6465 = vmatmul.mubr.msk.bf16.gmra.mrb[116].mxu1 %vm376_vm3, %v4767_v52  ;;  %1962 = vst.msk [vmem:[#allocation3] sm:$0xff] %vm1583_vm5, %v1930_v6  ;;  %v1931_v23 = vadd.f32 %v1899_v29, %v1774_v46 }
 0x147   : > { %6468 = vmatprep.mubr.msk.bf16.mxu1 %vm376_vm3, %v4769_v3  ;;  %1965 = vst.msk [vmem:[#allocation3 + $0x18] sm:$0xff] %vm1583_vm5, %v1933_v41  ;;  %v8030_v41 = vld [vmem:[#allocation2 + $0x68] sm:$0xff] }
 0x148   : > { %1963 = vst.msk [vmem:[#allocation3 + $0x8] sm:$0xff] %vm1583_vm5, %v1931_v23  ;;  %v4780_v56 = vrot.slane %v8030_v41, 4  ;;  %v5128_v40 = vsel %vm8662_vm2, %v8030_v41, 0 }
 0x149   : > { %v5238_v42 = vshll.u32 %v5128_v40, 16 }
 0x14a   : > { %v6262_v51 = vpop.f32.mrb[20].mxu1  ;;  %v4781_v57 = vsel %vm1418_vm0, %v4778_v48, %v4780_v56 }
 0x14b   : > { %6495 = vmatmul.mubr.msk.bf16.vlgmr.msra.gmra.mrb[112].mxu0 %vm376_vm3, %v5161_v8  ;;  %v1936_v35 = vadd.f32 %v6262_v51, %v1904_v14  ;;  %v1787_v32 = vpop.f32.mrb[21].mxu1 }
 0x14c   : > { %6498 = vmatprep.mubr.msk.bf16.mxu0 %vm376_vm3, %v5170_v30  ;;  %v2764_v61 = vld [vmem:[#allocation3 + $0x10] sm:$0xff]  ;;  %v1934_v22 = vadd.f32 %v1902_v7, %v1787_v32  ;;  %v6263_v10 = vpop.f32.mrb[22].mxu1  ;;  %v4779_v32 = vsel %vm1418_vm0, %v4776_v17, %v4778_v48  ;;  %v1917_v48 = vld [vmem:[#allocation3 + $0x98] sm:$0xff] }
 0x14d   : > { %1968 = vst.msk [vmem:[#allocation3 + $0x30] sm:$0xff] %vm1583_vm5, %v1936_v35  ;;  %v2762_v5 = vld [vmem:[#allocation3] sm:$0xff]  ;;  %v1937_v0 = vadd.f32 %v6263_v10, %v1905_v11  ;;  %v1790_v53 = vpop.f32.mrb[23].mxu1  ;;  %v4735_v11 = vld [vmem:[#allocation2 + $0x70] sm:$0xff] }
 0x14e   : > { %6469 = vmatmul.mubr.msk.bf16.gmra.mrb[120].mxu1 %vm376_vm3, %v4771_v28  ;;  %1966 = vst.msk [vmem:[#allocation3 + $0x20] sm:$0xff] %vm1583_vm5, %v1934_v22  ;;  %v2765_v2 = vld [vmem:[#allocation3 + $0x18] sm:$0xff]  ;;  %v1935_v52 = vadd.f32 %v1903_v25, %v1790_v53  ;;  %v1912_v22 = vld [vmem:[#allocation3 + $0x70] sm:$0xff]  ;;  %v1910_v53 = vld [vmem:[#allocation3 + $0x60] sm:$0xff]  ;;  %v5235_v25 = vshrl.u32 %v5128_v40, 16  ;;  %v4782_v17 = vrot.slane %v4735_v11, 4 }
 0x14f   : > { %6472 = vmatprep.mubr.msk.bf16.mxu1 %vm376_vm3, %v4773_v55  ;;  %v6292_v47 = vpop.f32.mrb[16].mxu0  ;;  %1969 = vst.msk [vmem:[#allocation3 + $0x38] sm:$0xff] %vm1583_vm5, %v1937_v0  ;;  %v2763_v3 = vld [vmem:[#allocation3 + $0x8] sm:$0xff] }
 0x150   : > { %v2796_v38 = vadd.f32 %v6292_v47, %v2764_v61  ;;  %v2635_v58 = vpop.f32.mrb[17].mxu0  ;;  %1967 = vst.msk [vmem:[#allocation3 + $0x28] sm:$0xff] %vm1583_vm5, %v1935_v52  ;;  %v1915_v40 = vld [vmem:[#allocation3 + $0x88] sm:$0xff] }
 0x151   : > { %v2794_v21 = vadd.f32 %v2762_v5, %v2635_v58  ;;  %v6293_v59 = vpop.f32.mrb[18].mxu0 }
 0x152   : > { %2828 = vst.msk [vmem:[#allocation3 + $0x10] sm:$0xff] %vm1583_vm5, %v2796_v38  ;;  %v2797_v31 = vadd.f32 %v6293_v59, %v2765_v2  ;;  %v2638_v18 = vpop.f32.mrb[19].mxu0  ;;  %v6266_v6 = vpop.f32.mrb[24].mxu1  ;;  %v8053_v38 = vld [vmem:[#allocation2 + $0x78] sm:$0xff]  ;;  %v5240_v59 = vrot.slane %v5238_v42, 5 }
 0x153   : > { %6499 = vmatmul.mubr.msk.bf16.gmra.mrb[116].mxu0 %vm376_vm3, %v5179_v54  ;;  %2826 = vst.msk [vmem:[#allocation3] sm:$0xff] %vm1583_vm5, %v2794_v21  ;;  %v2795_v16 = vadd.f32 %v2763_v3, %v2638_v18  ;;  %v1940_v49 = vadd.f32 %v6266_v6, %v1908_v44  ;;  %v1803_v26 = vpop.f32.mrb[25].mxu1  ;;  %v1913_v54 = vld [vmem:[#allocation3 + $0x78] sm:$0xff]  ;;  %v1911_v3 = vld [vmem:[#allocation3 + $0x68] sm:$0xff]  ;;  %v5237_v21 = vrot.slane %v5235_v25, 4  ;;  %v5129_v18 = vsel %vm2374_vm9, %v4735_v11, 0 }
 0x154   : > { %6502 = vmatprep.mubr.msk.bf16.mxu0 %vm376_vm3, %v5188_v34  ;;  %2829 = vst.msk [vmem:[#allocation3 + $0x18] sm:$0xff] %vm1583_vm5, %v2797_v31  ;;  %v1938_v46 = vadd.f32 %v1906_v62, %v1803_v26  ;;  %v6267_v29 = vpop.f32.mrb[26].mxu1  ;;  %v2768_v1 = vld [vmem:[#allocation3 + $0x30] sm:$0xff]  ;;  %v4784_v31 = vrot.slane %v8053_v38, 4  ;;  %v5244_v44 = vshrl.u32 %v5129_v18, 16 }
 0x155   : > { %2827 = vst.msk [vmem:[#allocation3 + $0x8] sm:$0xff] %vm1583_vm5, %v2795_v16  ;;  %1972 = vst.msk [vmem:[#allocation3 + $0x50] sm:$0xff] %vm1583_vm5, %v1940_v49  ;;  %v1941_v23 = vadd.f32 %v6267_v29, %v1909_v12  ;;  %v1806_v8 = vpop.f32.mrb[27].mxu1  ;;  %v2766_v28 = vld [vmem:[#allocation3 + $0x20] sm:$0xff]  ;;  %v4783_v16 = vsel %vm1418_vm0, %v4780_v56, %v4782_v17  ;;  %v4737_v49 = vld [vmem:[#allocation2 + $0x80] sm:$0xff]  ;;  %v8074_v41 = vor.u32 %v5240_v59, %v5237_v21 }
 0x156   : > { %6473 = vmatmul.mubr.msk.bf16.gmra.mrb[124].mxu1 %vm376_vm3, %v4775_v4  ;;  %1970 = vst.msk [vmem:[#allocation3 + $0x40] sm:$0xff] %vm1583_vm5, %v1938_v46  ;;  %v1939_v30 = vadd.f32 %v1907_v27, %v1806_v8  ;;  %v2769_v14 = vld [vmem:[#allocation3 + $0x38] sm:$0xff]  ;;  %v5130_v4 = vsel %vm2375_vm15, %v8053_v38, 0  ;;  %v1916_v62 = vld [vmem:[#allocation3 + $0x90] sm:$0xff]  ;;  %v4785_v20 = vsel %vm1418_vm0, %v4782_v17, %v4784_v31  ;;  %v1914_v12 = vld [vmem:[#allocation3 + $0x80] sm:$0xff]  ;;  %vm8665_vm15 = vcmp.ne.s16.totalorder %v7427_v60, 0 }
 0x157   : > { %6476 = vmatprep.mubr.msk.bf16.mxu1 %vm376_vm3, %v4777_v37  ;;  %1973 = vst.msk [vmem:[#allocation3 + $0x58] sm:$0xff] %vm1583_vm5, %v1941_v23  ;;  %v2767_v35 = vld [vmem:[#allocation3 + $0x28] sm:$0xff]  ;;  %v5247_v37 = vshll.u32 %v5129_v18, 16  ;;  %v4739_v38 = vld [vmem:[#allocation2 + $0x90] sm:$0xf] }
 0x158   : > { %1971 = vst.msk [vmem:[#allocation3 + $0x48] sm:$0xff] %vm1583_vm5, %v1939_v30  ;;  %v5256_v30 = vshll.u32 %v5130_v4, 16  ;;  %v1921_v17 = vld [vmem:[#allocation3 + $0xb8] sm:$0xff] }
 0x159   : > { %v6296_v51 = vpop.f32.mrb[20].mxu0  ;;  %v5116_v59 = vld [vmem:[#allocation2 + $0x90] sm:$0x1f] }
 0x15a   : > { %v2800_v39 = vadd.f32 %v6296_v51, %v2768_v1  ;;  %v2651_v55 = vpop.f32.mrb[21].mxu0  ;;  %v6270_v61 = vpop.f32.mrb[28].mxu1  ;;  %v5253_v1 = vshrl.u32 %v5130_v4, 16  ;;  %v5258_v11 = vrot.slane %v5256_v30, 5  ;;  %v1919_v4 = vld [vmem:[#allocation3 + $0xa8] sm:$0xff] }
 0x15b   : > { %6503 = vmatmul.mubr.msk.bf16.gmra.mrb[120].mxu0 %vm376_vm3, %v5197_v45  ;;  %v2798_v7 = vadd.f32 %v2766_v28, %v2651_v55  ;;  %v6297_v50 = vpop.f32.mrb[22].mxu0  ;;  %v1944_v5 = vadd.f32 %v6270_v61, %v1912_v22  ;;  %v1819_v0 = vpop.f32.mrb[29].mxu1  ;;  %v4786_v28 = vrot.slane %v4737_v49, 4  ;;  %v5242_v61 = vsel %vm1038_vm8, %v7941_v43, %v8074_v41 }
 0x15c   : > { %6506 = vmatprep.mubr.msk.bf16.mxu0 %vm376_vm3, %v7926_v33  ;;  %2832 = vst.msk [vmem:[#allocation3 + $0x30] sm:$0xff] %vm1583_vm5, %v2800_v39  ;;  %v2801_v19 = vadd.f32 %v6297_v50, %v2769_v14  ;;  %v2654_v10 = vpop.f32.mrb[23].mxu0  ;;  %v1942_v2 = vadd.f32 %v1910_v53, %v1819_v0  ;;  %v6271_v52 = vpop.f32.mrb[30].mxu1  ;;  %v2772_v6 = vld [vmem:[#allocation3 + $0x50] sm:$0xff]  ;;  %v4788_v22 = vrot.slane %v7886_v15, 4  ;;  %v5132_v43 = vsel %vm8665_vm15, %v7886_v15, 0 }
 0x15d   : > { %2830 = vst.msk [vmem:[#allocation3 + $0x20] sm:$0xff] %vm1583_vm5, %v2798_v7  ;;  %v2799_v47 = vadd.f32 %v2767_v35, %v2654_v10  ;;  %1976 = vst.msk [vmem:[#allocation3 + $0x70] sm:$0xff] %vm1583_vm5, %v1944_v5  ;;  %v1945_v33 = vadd.f32 %v6271_v52, %v1913_v54  ;;  %v1822_v58 = vpop.f32.mrb[31].mxu1  ;;  %v2770_v36 = vld [vmem:[#allocation3 + $0x40] sm:$0xff]  ;;  %v5246_v35 = vrot.slane %v5244_v44, 4  ;;  %v5255_v10 = vrot.slane %v5253_v1, 4 }
 0x15e   : > { %6477 = vmatmul.mubr.msk.bf16.gmra.mrb[128].mxu1 %vm376_vm3, %v4779_v32  ;;  %2833 = vst.msk [vmem:[#allocation3 + $0x38] sm:$0xff] %vm1583_vm5, %v2801_v19  ;;  %1974 = vst.msk [vmem:[#allocation3 + $0x60] sm:$0xff] %vm1583_vm5, %v1942_v2  ;;  %v1943_v34 = vadd.f32 %v1911_v3, %v1822_v58  ;;  %v2773_v23 = vld [vmem:[#allocation3 + $0x58] sm:$0xff]  ;;  %v5249_v32 = vrot.slane %v5247_v37, 5  ;;  %v8663_v5 = vld [vmem:[#allocation18_spill] sm:$0xff]  ;;  %v4787_v25 = vsel %vm1418_vm0, %v4784_v31, %v4786_v28  ;;  %v5274_v21 = vshll.u32 %v5132_v43, 16 }
 0x15f   : > { %2831 = vst.msk [vmem:[#allocation3 + $0x28] sm:$0xff] %vm1583_vm5, %v2799_v47  ;;  %6480 = vmatprep.mubr.msk.bf16.mxu1 %vm376_vm3, %v4781_v57  ;;  %1977 = vst.msk [vmem:[#allocation3 + $0x78] sm:$0xff] %vm1583_vm5, %v1945_v33  ;;  %vm8664_vm9 = vcmp.ne.s16.totalorder %v8663_v5, 0  ;;  %v1920_v47 = vld [vmem:[#allocation3 + $0xb0] sm:$0xff]  ;;  %v4789_v2 = vsel %vm1418_vm0, %v4786_v28, %v4788_v22  ;;  %v1918_v15 = vld [vmem:[#allocation3 + $0xa0] sm:$0xff]  ;;  %v8101_v58 = vor.u32 %v5258_v11, %v5255_v10 }
 0x160   : > { %1975 = vst.msk [vmem:[#allocation3 + $0x68] sm:$0xff] %vm1583_vm5, %v1943_v34  ;;  %v5131_v0 = vsel %vm8664_vm9, %v4737_v49, 0  ;;  %v5250_v53 = vor.u32 %v5249_v32, %v5246_v35  ;;  %v5271_v34 = vshrl.u32 %v5132_v43, 16 }
 0x161   : > { %v5262_v52 = vshrl.u32 %v5131_v0, 16  ;;  %v5265_v54 = vshll.u32 %v5131_v0, 16 }
 0x162   : > { %v6274_v26 = vpop.f32.mrb[32].mxu1  ;;  %v5251_v37 = vsel %vm1038_vm8, %v8074_v41, %v5250_v53 }
 0x163   : > { %6507 = vmatmul.mubr.msk.bf16.gmra.mrb[124].mxu0 %vm376_vm3, %v7934_v13  ;;  %v1948_v46 = vadd.f32 %v6274_v26, %v1916_v62  ;;  %v1835_v29 = vpop.f32.mrb[33].mxu1  ;;  %v5264_v26 = vrot.slane %v5262_v52, 4  ;;  %v5267_v62 = vrot.slane %v5265_v54, 5 }
 0x164   : > { %6510 = vmatprep.mubr.msk.bf16.mxu0 %vm376_vm3, %v7939_v9  ;;  %v1946_v8 = vadd.f32 %v1914_v12, %v1835_v29  ;;  %v6275_v27 = vpop.f32.mrb[34].mxu1  ;;  %v2771_v9 = vld [vmem:[#allocation3 + $0x48] sm:$0xff]  ;;  %v5260_v29 = vsel %vm1038_vm8, %v5250_v53, %v8101_v58  ;;  %v5273_v12 = vrot.slane %v5271_v34, 4  ;;  %v1926_v34 = vld [vmem:[#allocation3 + $0xe0] sm:$0xff] }
 0x165   : > { %v6300_v13 = vpop.f32.mrb[24].mxu0  ;;  %1980 = vst.msk [vmem:[#allocation3 + $0x90] sm:$0xff] %vm1583_vm5, %v1948_v46  ;;  %v1949_v51 = vadd.f32 %v6275_v27, %v1917_v48  ;;  %v1838_v14 = vpop.f32.mrb[35].mxu1  ;;  %v2774_v49 = vld [vmem:[#allocation3 + $0x60] sm:$0xff]  ;;  %v5268_v28 = vor.u32 %v5267_v62, %v5264_v26 }
 0x166   : > { %6481 = vmatmul.mubr.msk.bf16.gmra.mrb[132].mxu1 %vm376_vm3, %v4783_v16  ;;  %v2804_v56 = vadd.f32 %v6300_v13, %v2772_v6  ;;  %v2667_v45 = vpop.f32.mrb[25].mxu0  ;;  %1978 = vst.msk [vmem:[#allocation3 + $0x80] sm:$0xff] %vm1583_vm5, %v1946_v8  ;;  %v1947_v7 = vadd.f32 %v1915_v40, %v1838_v14  ;;  %v2776_v16 = vld [vmem:[#allocation3 + $0x70] sm:$0xff]  ;;  %v4790_v6 = vrot.slane %v4739_v38, 4  ;;  %v2777_v46 = vld [vmem:[#allocation3 + $0x78] sm:$0xff]  ;;  %v5276_v13 = vrot.slane %v5274_v21, 5 }
 0x167   : > { %v2802_v39 = vadd.f32 %v2770_v36, %v2667_v45  ;;  %v6301_v55 = vpop.f32.mrb[26].mxu0  ;;  %6484 = vmatprep.mubr.msk.bf16.mxu1 %vm376_vm3, %v4785_v20  ;;  %1981 = vst.msk [vmem:[#allocation3 + $0x98] sm:$0xff] %vm1583_vm5, %v1949_v51  ;;  %v5133_v36 = vsel %vm8666_vm6, %v5116_v59, 0  ;;  %v2775_v41 = vld [vmem:[#allocation3 + $0x68] sm:$0xff]  ;;  %v5269_v11 = vsel %vm1038_vm8, %v8101_v58, %v5268_v28 }
 0x168   : > { %2836 = vst.msk [vmem:[#allocation3 + $0x50] sm:$0xff] %vm1583_vm5, %v2804_v56  ;;  %v2805_v50 = vadd.f32 %v6301_v55, %v2773_v23  ;;  %v2670_v57 = vpop.f32.mrb[27].mxu0  ;;  %1979 = vst.msk [vmem:[#allocation3 + $0x88] sm:$0xff] %vm1583_vm5, %v1947_v7  ;;  %v4791_v1 = vsel %vm1418_vm0, %v4788_v22, %v4790_v6  ;;  %v5280_v24 = vshrl.u32 %v5133_v36, 16  ;;  %v1924_v56 = vld [vmem:[#allocation3 + $0xd0] sm:$0xff]  ;;  %v5283_v51 = vshll.u32 %v5133_v36, 16 }
 0x169   : > { %2834 = vst.msk [vmem:[#allocation3 + $0x40] sm:$0xff] %vm1583_vm5, %v2802_v39  ;;  %v2803_v19 = vadd.f32 %v2771_v9, %v2670_v57  ;;  %v1922_v39 = vld [vmem:[#allocation3 + $0xc0] sm:$0xff]  ;;  %v5277_v35 = vor.u32 %v5276_v13, %v5273_v12  ;;  %v1923_v22 = vld [vmem:[#allocation3 + $0xc8] sm:$0xff] }
 0x16a   : > { %2837 = vst.msk [vmem:[#allocation3 + $0x58] sm:$0xff] %vm1583_vm5, %v2805_v50  ;;  %v6278_v42 = vpop.f32.mrb[36].mxu1  ;;  %v1925_v50 = vld [vmem:[#allocation3 + $0xd8] sm:$0xff]  ;;  %v5282_v0 = vrot.slane %v5280_v24, 4  ;;  %v5285_v43 = vrot.slane %v5283_v51, 5  ;;  %v1927_v6 = vld [vmem:[#allocation3 + $0xe8] sm:$0xff] }
 0x16b   : > { %6511 = vmatmul.mubr.msk.bf16.gmra.mrb[128].mxu0 %vm376_vm3, %v7953_v63  ;;  %2835 = vst.msk [vmem:[#allocation3 + $0x48] sm:$0xff] %vm1583_vm5, %v2803_v19  ;;  %v1952_v33 = vadd.f32 %v6278_v42, %v1920_v47  ;;  %v1851_v60 = vpop.f32.mrb[37].mxu1  ;;  %v5278_v42 = vsel %vm1038_vm8, %v5268_v28, %v5277_v35 }
 0x16c   : > { %6514 = vmatprep.mubr.msk.bf16.mxu0 %vm376_vm3, %v5242_v61  ;;  %v1950_v63 = vadd.f32 %v1918_v15, %v1851_v60  ;;  %v6279_v3 = vpop.f32.mrb[38].mxu1  ;;  %v2780_v19 = vld [vmem:[#allocation3 + $0x90] sm:$0xff] }
 0x16d   : > { %1984 = vst.msk [vmem:[#allocation3 + $0xb0] sm:$0xff] %vm1583_vm5, %v1952_v33  ;;  %v1953_v31 = vadd.f32 %v6279_v3, %v1921_v17  ;;  %v1854_v18 = vpop.f32.mrb[39].mxu1  ;;  %v2778_v5 = vld [vmem:[#allocation3 + $0x80] sm:$0xff]  ;;  %v1928_v60 = vld [vmem:[#allocation3 + $0xf0] sm:$0xff] }
 0x16e   : > { %6485 = vmatmul.mubr.msk.bf16.gmra.mrb[136].mxu1 %vm376_vm3, %v4787_v25  ;;  %1982 = vst.msk [vmem:[#allocation3 + $0xa0] sm:$0xff] %vm1583_vm5, %v1950_v63  ;;  %v1951_v44 = vadd.f32 %v1919_v4, %v1854_v18  ;;  %v2781_v25 = vld [vmem:[#allocation3 + $0x98] sm:$0xff]  ;;  %v5286_v63 = vor.u32 %v5285_v43, %v5282_v0 }
 0x16f   : > { %6488 = vmatprep.mubr.msk.bf16.mxu1 %vm376_vm3, %v4789_v2  ;;  %1985 = vst.msk [vmem:[#allocation3 + $0xb8] sm:$0xff] %vm1583_vm5, %v1953_v31  ;;  %v2779_v52 = vld [vmem:[#allocation3 + $0x88] sm:$0xff]  ;;  %v1929_v18 = vld [vmem:[#allocation3 + $0xf8] sm:$0xff] }
 0x170   : > { %1983 = vst.msk [vmem:[#allocation3 + $0xa8] sm:$0xff] %vm1583_vm5, %v1951_v44 }
 0x171   : > { %v6304_v20 = vpop.f32.mrb[28].mxu0 }
 0x172   : > { %v2808_v23 = vadd.f32 %v6304_v20, %v2776_v16  ;;  %v2683_v8 = vpop.f32.mrb[29].mxu0  ;;  %v6282_v30 = vpop.f32.mrb[40].mxu1 }
 0x173   : > { %6515 = vmatmul.mubr.msk.bf16.gmra.mrb[132].mxu0 %vm376_vm3, %v5251_v37  ;;  %v2806_v27 = vadd.f32 %v2774_v49, %v2683_v8  ;;  %v6305_v48 = vpop.f32.mrb[30].mxu0  ;;  %v1956_v14 = vadd.f32 %v6282_v30, %v1924_v56  ;;  %v1867_v40 = vpop.f32.mrb[41].mxu1  ;;  %v5287_v37 = vsel %vm1038_vm8, %v5277_v35, %v5286_v63 }
 0x174   : > { %2840 = vst.msk [vmem:[#allocation3 + $0x70] sm:$0xff] %vm1583_vm5, %v2808_v23  ;;  %v2809_v45 = vadd.f32 %v6305_v48, %v2777_v46  ;;  %v2686_v9 = vpop.f32.mrb[31].mxu0  ;;  %6518 = vmatprep.mubr.msk.bf16.mxu0 %vm376_vm3, %v5260_v29  ;;  %v1954_v32 = vadd.f32 %v1922_v39, %v1867_v40  ;;  %v6283_v7 = vpop.f32.mrb[42].mxu1  ;;  %v2784_v49 = vld [vmem:[#allocation3 + $0xb0] sm:$0xff] }
 0x175   : > { %2838 = vst.msk [vmem:[#allocation3 + $0x60] sm:$0xff] %vm1583_vm5, %v2806_v27  ;;  %v2807_v55 = vadd.f32 %v2775_v41, %v2686_v9  ;;  %1988 = vst.msk [vmem:[#allocation3 + $0xd0] sm:$0xff] %vm1583_vm5, %v1956_v14  ;;  %v1957_v57 = vadd.f32 %v6283_v7, %v1925_v50  ;;  %v1870_v61 = vpop.f32.mrb[43].mxu1  ;;  %v2782_v26 = vld [vmem:[#allocation3 + $0xa0] sm:$0xff]  ;;  %v3260_v39 = vld [vmem:[#allocation3 + $0x10] sm:$0xff] }
 0x176   : > { %2841 = vst.msk [vmem:[#allocation3 + $0x78] sm:$0xff] %vm1583_vm5, %v2809_v45  ;;  %6489 = vmatmul.mubr.msk.bf16.gmra.mrb[140].mxu1 %vm376_vm3, %v4791_v1  ;;  %1986 = vst.msk [vmem:[#allocation3 + $0xc0] sm:$0xff] %vm1583_vm5, %v1954_v32  ;;  %v1955_v10 = vadd.f32 %v1923_v22, %v1870_v61  ;;  %v2785_v36 = vld [vmem:[#allocation3 + $0xb8] sm:$0xff]  ;;  %v3258_v7 = vld [vmem:[#allocation3] sm:$0xff] }
 0x177   : > { %2839 = vst.msk [vmem:[#allocation3 + $0x68] sm:$0xff] %vm1583_vm5, %v2807_v55  ;;  %1989 = vst.msk [vmem:[#allocation3 + $0xd8] sm:$0xff] %vm1583_vm5, %v1957_v57  ;;  %v2783_v29 = vld [vmem:[#allocation3 + $0xa8] sm:$0xff]  ;;  %v3261_v61 = vld [vmem:[#allocation3 + $0x18] sm:$0xff] }
 0x178   : > { %1987 = vst.msk [vmem:[#allocation3 + $0xc8] sm:$0xff] %vm1583_vm5, %v1955_v10 }
 0x179   : > { %v6308_v53 = vpop.f32.mrb[32].mxu0 }
 0x17a   : > { %v2812_v47 = vadd.f32 %v6308_v53, %v2780_v19  ;;  %v2699_v2 = vpop.f32.mrb[33].mxu0  ;;  %v6286_v33 = vpop.f32.mrb[44].mxu1 }
 0x17b   : > { %6519 = vmatmul.mubr.msk.bf16.gmra.mrb[136].mxu0 %vm376_vm3, %v5269_v11  ;;  %v2810_v54 = vadd.f32 %v2778_v5, %v2699_v2  ;;  %v6309_v38 = vpop.f32.mrb[34].mxu0  ;;  %v1960_v3 = vadd.f32 %v6286_v33, %v1928_v60  ;;  %v1883_v17 = vpop.f32.mrb[45].mxu1  ;;  %v3259_v11 = vld [vmem:[#allocation3 + $0x8] sm:$0xff]  ;;  %v3264_v60 = vld [vmem:[#allocation3 + $0x30] sm:$0xff] }
 0x17c   : > { %2844 = vst.msk [vmem:[#allocation3 + $0x90] sm:$0xff] %vm1583_vm5, %v2812_v47  ;;  %v2813_v15 = vadd.f32 %v6309_v38, %v2781_v25  ;;  %v2702_v58 = vpop.f32.mrb[35].mxu0  ;;  %6522 = vmatprep.mubr.msk.bf16.mxu0 %vm376_vm3, %v5278_v42  ;;  %v1958_v59 = vadd.f32 %v1926_v34, %v1883_v17  ;;  %v6287_v31 = vpop.f32.mrb[46].mxu1  ;;  %v2788_v27 = vld [vmem:[#allocation3 + $0xd0] sm:$0xff] }
 0x17d   : > { %2842 = vst.msk [vmem:[#allocation3 + $0x80] sm:$0xff] %vm1583_vm5, %v2810_v54  ;;  %v2811_v21 = vadd.f32 %v2779_v52, %v2702_v58  ;;  %1992 = vst.msk [vmem:[#allocation3 + $0xf0] sm:$0xff] %vm1583_vm5, %v1960_v3  ;;  %v1961_v4 = vadd.f32 %v6287_v31, %v1929_v18  ;;  %v1886_v16 = vpop.f32.mrb[47].mxu1  ;;  %v2786_v48 = vld [vmem:[#allocation3 + $0xc0] sm:$0xff] }
 0x17e   : > { %2845 = vst.msk [vmem:[#allocation3 + $0x98] sm:$0xff] %vm1583_vm5, %v2813_v15  ;;  %1990 = vst.msk [vmem:[#allocation3 + $0xe0] sm:$0xff] %vm1583_vm5, %v1958_v59  ;;  %v1959_v44 = vadd.f32 %v1927_v6, %v1886_v16  ;;  %v2789_v24 = vld [vmem:[#allocation3 + $0xd8] sm:$0xff]  ;;  %v3262_v3 = vld [vmem:[#allocation3 + $0x20] sm:$0xff] }
 0x17f   : > { %2843 = vst.msk [vmem:[#allocation3 + $0x88] sm:$0xff] %vm1583_vm5, %v2811_v21  ;;  %1993 = vst.msk [vmem:[#allocation3 + $0xf8] sm:$0xff] %vm1583_vm5, %v1961_v4  ;;  %v2787_v45 = vld [vmem:[#allocation3 + $0xc8] sm:$0xff]  ;;  %v3265_v21 = vld [vmem:[#allocation3 + $0x38] sm:$0xff] }
 0x180   : > { %1991 = vst.msk [vmem:[#allocation3 + $0xe8] sm:$0xff] %vm1583_vm5, %v1959_v44  ;;  %v3263_v4 = vld [vmem:[#allocation3 + $0x28] sm:$0xff] }
 0x183   : > { %6523 = vmatmul.mubr.msk.bf16.gmra.mrb[140].mxu0 %vm376_vm3, %v5287_v37 }
 0x184   : > { %v2792_v22 = vld [vmem:[#allocation3 + $0xf0] sm:$0xff] }
 0x185   : > { %v2790_v5 = vld [vmem:[#allocation3 + $0xe0] sm:$0xff] }
 0x186   : > { %v6312_v62 = vpop.f32.mrb[36].mxu0  ;;  %v2793_v53 = vld [vmem:[#allocation3 + $0xf8] sm:$0xff] }
 0x187   : > { %v2816_v20 = vadd.f32 %v6312_v62, %v2784_v49  ;;  %v2715_v46 = vpop.f32.mrb[37].mxu0  ;;  %v2791_v47 = vld [vmem:[#allocation3 + $0xe8] sm:$0xff] }
 0x188   : > { %v2814_v12 = vadd.f32 %v2782_v26, %v2715_v46  ;;  %v6313_v13 = vpop.f32.mrb[38].mxu0 }
 0x189   : > { %2848 = vst.msk [vmem:[#allocation3 + $0xb0] sm:$0xff] %vm1583_vm5, %v2816_v20  ;;  %v2817_v23 = vadd.f32 %v6313_v13, %v2785_v36  ;;  %v2718_v8 = vpop.f32.mrb[39].mxu0  ;;  %v3268_v13 = vld [vmem:[#allocation3 + $0x50] sm:$0xff] }
 0x18a   : > { %2846 = vst.msk [vmem:[#allocation3 + $0xa0] sm:$0xff] %vm1583_vm5, %v2814_v12  ;;  %v2815_v41 = vadd.f32 %v2783_v29, %v2718_v8 }
 0x18b   : > { %2849 = vst.msk [vmem:[#allocation3 + $0xb8] sm:$0xff] %vm1583_vm5, %v2817_v23 }
 0x18c   : > { %2847 = vst.msk [vmem:[#allocation3 + $0xa8] sm:$0xff] %vm1583_vm5, %v2815_v41 }
 0x18e   : > { %v6316_v1 = vpop.f32.mrb[40].mxu0 }
 0x18f   : > { %v2820_v30 = vadd.f32 %v6316_v1, %v2788_v27  ;;  %v2731_v56 = vpop.f32.mrb[41].mxu0  ;;  %v3266_v27 = vld [vmem:[#allocation3 + $0x40] sm:$0xff] }
 0x190   : > { %v2818_v9 = vadd.f32 %v2786_v48, %v2731_v56  ;;  %v6317_v28 = vpop.f32.mrb[42].mxu0 }
 0x191   : > { %2852 = vst.msk [vmem:[#allocation3 + $0xd0] sm:$0xff] %vm1583_vm5, %v2820_v30  ;;  %v2821_v51 = vadd.f32 %v6317_v28, %v2789_v24  ;;  %v2734_v14 = vpop.f32.mrb[43].mxu0  ;;  %v6326_v40 = vpop.f32.mrb[48].mxu1  ;;  %v3269_v24 = vld [vmem:[#allocation3 + $0x58] sm:$0xff] }
 0x192   : > { %2850 = vst.msk [vmem:[#allocation3 + $0xc0] sm:$0xff] %vm1583_vm5, %v2818_v9  ;;  %v2819_v55 = vadd.f32 %v2787_v45, %v2734_v14  ;;  %v3292_v35 = vadd.f32 %v6326_v40, %v3260_v39  ;;  %v3131_v32 = vpop.f32.mrb[49].mxu1  ;;  %v3267_v9 = vld [vmem:[#allocation3 + $0x48] sm:$0xff] }
 0x193   : > { %2853 = vst.msk [vmem:[#allocation3 + $0xd8] sm:$0xff] %vm1583_vm5, %v2821_v51  ;;  %v3290_v50 = vadd.f32 %v3258_v7, %v3131_v32  ;;  %v6327_v57 = vpop.f32.mrb[50].mxu1 }
 0x194   : > { %2851 = vst.msk [vmem:[#allocation3 + $0xc8] sm:$0xff] %vm1583_vm5, %v2819_v55  ;;  %3324 = vst.msk [vmem:[#allocation3 + $0x10] sm:$0xff] %vm1583_vm5, %v3292_v35  ;;  %v3293_v19 = vadd.f32 %v6327_v57, %v3261_v61  ;;  %v3134_v10 = vpop.f32.mrb[51].mxu1 }
 0x195   : > { %3322 = vst.msk [vmem:[#allocation3] sm:$0xff] %vm1583_vm5, %v3290_v50  ;;  %v3291_v0 = vadd.f32 %v3259_v11, %v3134_v10 }
 0x196   : > { %v6320_v43 = vpop.f32.mrb[44].mxu0  ;;  %3325 = vst.msk [vmem:[#allocation3 + $0x18] sm:$0xff] %vm1583_vm5, %v3293_v19 }
 0x197   : > { %v2824_v25 = vadd.f32 %v6320_v43, %v2792_v22  ;;  %v2747_v42 = vpop.f32.mrb[45].mxu0  ;;  %3323 = vst.msk [vmem:[#allocation3 + $0x8] sm:$0xff] %vm1583_vm5, %v3291_v0  ;;  %v3272_v22 = vld [vmem:[#allocation3 + $0x70] sm:$0xff] }
 0x198   : > { %v2822_v2 = vadd.f32 %v2790_v5, %v2747_v42  ;;  %v6321_v52 = vpop.f32.mrb[46].mxu0  ;;  %v3270_v5 = vld [vmem:[#allocation3 + $0x60] sm:$0xff] }
 0x199   : > { %2856 = vst.msk [vmem:[#allocation3 + $0xf0] sm:$0xff] %vm1583_vm5, %v2824_v25  ;;  %v2825_v54 = vadd.f32 %v6321_v52, %v2793_v53  ;;  %v2750_v38 = vpop.f32.mrb[47].mxu0  ;;  %v6330_v33 = vpop.f32.mrb[52].mxu1  ;;  %v3273_v53 = vld [vmem:[#allocation3 + $0x78] sm:$0xff] }
 0x19a   : > { %2854 = vst.msk [vmem:[#allocation3 + $0xe0] sm:$0xff] %vm1583_vm5, %v2822_v2  ;;  %v2823_v15 = vadd.f32 %v2791_v47, %v2750_v38  ;;  %v3296_v58 = vadd.f32 %v6330_v33, %v3264_v60  ;;  %v3147_v63 = vpop.f32.mrb[53].mxu1  ;;  %v3271_v2 = vld [vmem:[#allocation3 + $0x68] sm:$0xff] }
 0x19b   : > { %2857 = vst.msk [vmem:[#allocation3 + $0xf8] sm:$0xff] %vm1583_vm5, %v2825_v54  ;;  %v3294_v17 = vadd.f32 %v3262_v3, %v3147_v63  ;;  %v6331_v34 = vpop.f32.mrb[54].mxu1  ;;  %v3637_v59 = vld [vmem:[#allocation3 + $0x10] sm:$0xff] }
 0x19c   : > { %2855 = vst.msk [vmem:[#allocation3 + $0xe8] sm:$0xff] %vm1583_vm5, %v2823_v15  ;;  %3328 = vst.msk [vmem:[#allocation3 + $0x30] sm:$0xff] %vm1583_vm5, %v3296_v58  ;;  %v3297_v31 = vadd.f32 %v6331_v34, %v3265_v21  ;;  %v3150_v18 = vpop.f32.mrb[55].mxu1  ;;  %v3635_v16 = vld [vmem:[#allocation3] sm:$0xff] }
 0x19d   : > { %3326 = vst.msk [vmem:[#allocation3 + $0x20] sm:$0xff] %vm1583_vm5, %v3294_v17  ;;  %v3295_v6 = vadd.f32 %v3263_v4, %v3150_v18  ;;  %v3638_v37 = vld [vmem:[#allocation3 + $0x18] sm:$0xff] }
 0x19e   : > { %v6360_v44 = vpop.f32.mrb[48].mxu0  ;;  %3329 = vst.msk [vmem:[#allocation3 + $0x38] sm:$0xff] %vm1583_vm5, %v3297_v31  ;;  %v3636_v62 = vld [vmem:[#allocation3 + $0x8] sm:$0xff] }
 0x19f   : > { %v3669_v49 = vadd.f32 %v6360_v44, %v3637_v59  ;;  %v3508_v26 = vpop.f32.mrb[49].mxu0  ;;  %3327 = vst.msk [vmem:[#allocation3 + $0x28] sm:$0xff] %vm1583_vm5, %v3295_v6  ;;  %v3276_v59 = vld [vmem:[#allocation3 + $0x90] sm:$0xff] }
 0x1a0   : > { %v3667_v36 = vadd.f32 %v3635_v16, %v3508_v26  ;;  %v6361_v20 = vpop.f32.mrb[50].mxu0  ;;  %v3274_v16 = vld [vmem:[#allocation3 + $0x80] sm:$0xff] }
 0x1a1   : > { %3701 = vst.msk [vmem:[#allocation3 + $0x10] sm:$0xff] %vm1583_vm5, %v3669_v49  ;;  %v3670_v46 = vadd.f32 %v6361_v20, %v3638_v37  ;;  %v3511_v29 = vpop.f32.mrb[51].mxu0  ;;  %v6334_v12 = vpop.f32.mrb[56].mxu1  ;;  %v3277_v37 = vld [vmem:[#allocation3 + $0x98] sm:$0xff] }
 0x1a2   : > { %3699 = vst.msk [vmem:[#allocation3] sm:$0xff] %vm1583_vm5, %v3667_v36  ;;  %v3668_v23 = vadd.f32 %v3636_v62, %v3511_v29  ;;  %v3300_v8 = vadd.f32 %v6334_v12, %v3268_v13  ;;  %v3163_v41 = vpop.f32.mrb[57].mxu1  ;;  %v3275_v36 = vld [vmem:[#allocation3 + $0x88] sm:$0xff] }
 0x1a3   : > { %3702 = vst.msk [vmem:[#allocation3 + $0x18] sm:$0xff] %vm1583_vm5, %v3670_v46  ;;  %v3298_v48 = vadd.f32 %v3266_v27, %v3163_v41  ;;  %v6335_v1 = vpop.f32.mrb[58].mxu1  ;;  %v3641_v30 = vld [vmem:[#allocation3 + $0x30] sm:$0xff] }
 0x1a4   : > { %3700 = vst.msk [vmem:[#allocation3 + $0x8] sm:$0xff] %vm1583_vm5, %v3668_v23  ;;  %3332 = vst.msk [vmem:[#allocation3 + $0x50] sm:$0xff] %vm1583_vm5, %v3300_v8  ;;  %v3301_v56 = vadd.f32 %v6335_v1, %v3269_v24  ;;  %v3166_v45 = vpop.f32.mrb[59].mxu1  ;;  %v3639_v28 = vld [vmem:[#allocation3 + $0x20] sm:$0xff] }
 0x1a5   : > { %3330 = vst.msk [vmem:[#allocation3 + $0x40] sm:$0xff] %vm1583_vm5, %v3298_v48  ;;  %v3299_v51 = vadd.f32 %v3267_v9, %v3166_v45  ;;  %v3642_v40 = vld [vmem:[#allocation3 + $0x38] sm:$0xff] }
 0x1a6   : > { %v6364_v14 = vpop.f32.mrb[52].mxu0  ;;  %3333 = vst.msk [vmem:[#allocation3 + $0x58] sm:$0xff] %vm1583_vm5, %v3301_v56  ;;  %v3640_v35 = vld [vmem:[#allocation3 + $0x28] sm:$0xff] }
 0x1a7   : > { %v3673_v39 = vadd.f32 %v6364_v14, %v3641_v30  ;;  %v3524_v55 = vpop.f32.mrb[53].mxu0  ;;  %3331 = vst.msk [vmem:[#allocation3 + $0x48] sm:$0xff] %vm1583_vm5, %v3299_v51  ;;  %v3280_v30 = vld [vmem:[#allocation3 + $0xb0] sm:$0xff] }
 0x1a8   : > { %v3671_v32 = vadd.f32 %v3639_v28, %v3524_v55  ;;  %v6365_v7 = vpop.f32.mrb[54].mxu0  ;;  %v3278_v28 = vld [vmem:[#allocation3 + $0xa0] sm:$0xff] }
 0x1a9   : > { %3705 = vst.msk [vmem:[#allocation3 + $0x30] sm:$0xff] %vm1583_vm5, %v3673_v39  ;;  %v3674_v50 = vadd.f32 %v6365_v7, %v3642_v40  ;;  %v3527_v57 = vpop.f32.mrb[55].mxu0  ;;  %v6338_v61 = vpop.f32.mrb[60].mxu1  ;;  %v3281_v40 = vld [vmem:[#allocation3 + $0xb8] sm:$0xff] }
 0x1aa   : > { %3703 = vst.msk [vmem:[#allocation3 + $0x20] sm:$0xff] %vm1583_vm5, %v3671_v32  ;;  %v3672_v19 = vadd.f32 %v3640_v35, %v3527_v57  ;;  %v3304_v10 = vadd.f32 %v6338_v61, %v3272_v22  ;;  %v3179_v11 = vpop.f32.mrb[61].mxu1  ;;  %v3279_v32 = vld [vmem:[#allocation3 + $0xa8] sm:$0xff] }
 0x1ab   : > { %3706 = vst.msk [vmem:[#allocation3 + $0x38] sm:$0xff] %vm1583_vm5, %v3674_v50  ;;  %v3302_v0 = vadd.f32 %v3270_v5, %v3179_v11  ;;  %v6339_v43 = vpop.f32.mrb[62].mxu1  ;;  %v3645_v25 = vld [vmem:[#allocation3 + $0x50] sm:$0xff] }
 0x1ac   : > { %3704 = vst.msk [vmem:[#allocation3 + $0x28] sm:$0xff] %vm1583_vm5, %v3672_v19  ;;  %3336 = vst.msk [vmem:[#allocation3 + $0x70] sm:$0xff] %vm1583_vm5, %v3304_v10  ;;  %v3305_v42 = vadd.f32 %v6339_v43, %v3273_v53  ;;  %v3182_v47 = vpop.f32.mrb[63].mxu1  ;;  %v3643_v52 = vld [vmem:[#allocation3 + $0x40] sm:$0xff] }
 0x1ad   : > { %3334 = vst.msk [vmem:[#allocation3 + $0x60] sm:$0xff] %vm1583_vm5, %v3302_v0  ;;  %v3303_v54 = vadd.f32 %v3271_v2, %v3182_v47  ;;  %v3646_v33 = vld [vmem:[#allocation3 + $0x58] sm:$0xff] }
 0x1ae   : > { %v6368_v38 = vpop.f32.mrb[56].mxu0  ;;  %3337 = vst.msk [vmem:[#allocation3 + $0x78] sm:$0xff] %vm1583_vm5, %v3305_v42  ;;  %v3644_v58 = vld [vmem:[#allocation3 + $0x48] sm:$0xff] }
 0x1af   : > { %v3677_v60 = vadd.f32 %v6368_v38, %v3645_v25  ;;  %v3540_v15 = vpop.f32.mrb[57].mxu0  ;;  %3335 = vst.msk [vmem:[#allocation3 + $0x68] sm:$0xff] %vm1583_vm5, %v3303_v54  ;;  %v3284_v25 = vld [vmem:[#allocation3 + $0xd0] sm:$0xff] }
 0x1b0   : > { %v3675_v63 = vadd.f32 %v3643_v52, %v3540_v15  ;;  %v6369_v3 = vpop.f32.mrb[58].mxu0  ;;  %v3282_v52 = vld [vmem:[#allocation3 + $0xc0] sm:$0xff] }
 0x1b1   : > { %3709 = vst.msk [vmem:[#allocation3 + $0x50] sm:$0xff] %vm1583_vm5, %v3677_v60  ;;  %v3678_v17 = vadd.f32 %v6369_v3, %v3646_v33  ;;  %v3543_v34 = vpop.f32.mrb[59].mxu0  ;;  %v6342_v21 = vpop.f32.mrb[64].mxu1  ;;  %v3285_v33 = vld [vmem:[#allocation3 + $0xd8] sm:$0xff] }
 0x1b2   : > { %3707 = vst.msk [vmem:[#allocation3 + $0x40] sm:$0xff] %vm1583_vm5, %v3675_v63  ;;  %v3676_v31 = vadd.f32 %v3644_v58, %v3543_v34  ;;  %v3308_v18 = vadd.f32 %v6342_v21, %v3276_v59  ;;  %v3195_v4 = vpop.f32.mrb[65].mxu1  ;;  %v3283_v63 = vld [vmem:[#allocation3 + $0xc8] sm:$0xff] }
 0x1b3   : > { %3710 = vst.msk [vmem:[#allocation3 + $0x58] sm:$0xff] %vm1583_vm5, %v3678_v17  ;;  %v3306_v6 = vadd.f32 %v3274_v16, %v3195_v4  ;;  %v6343_v44 = vpop.f32.mrb[66].mxu1  ;;  %v3649_v49 = vld [vmem:[#allocation3 + $0x70] sm:$0xff] }
 0x1b4   : > { %3708 = vst.msk [vmem:[#allocation3 + $0x48] sm:$0xff] %vm1583_vm5, %v3676_v31  ;;  %3340 = vst.msk [vmem:[#allocation3 + $0x90] sm:$0xff] %vm1583_vm5, %v3308_v18  ;;  %v3309_v26 = vadd.f32 %v6343_v44, %v3277_v37  ;;  %v3198_v62 = vpop.f32.mrb[67].mxu1  ;;  %v3647_v20 = vld [vmem:[#allocation3 + $0x60] sm:$0xff] }
 0x1b5   : > { %3338 = vst.msk [vmem:[#allocation3 + $0x80] sm:$0xff] %vm1583_vm5, %v3306_v6  ;;  %v3307_v46 = vadd.f32 %v3275_v36, %v3198_v62  ;;  %v3650_v12 = vld [vmem:[#allocation3 + $0x78] sm:$0xff] }
 0x1b6   : > { %v6372_v29 = vpop.f32.mrb[60].mxu0  ;;  %3341 = vst.msk [vmem:[#allocation3 + $0x98] sm:$0xff] %vm1583_vm5, %v3309_v26  ;;  %v3648_v8 = vld [vmem:[#allocation3 + $0x68] sm:$0xff] }
 0x1b7   : > { %v3681_v13 = vadd.f32 %v6372_v29, %v3649_v49  ;;  %v3556_v23 = vpop.f32.mrb[61].mxu0  ;;  %3339 = vst.msk [vmem:[#allocation3 + $0x88] sm:$0xff] %vm1583_vm5, %v3307_v46  ;;  %v3288_v49 = vld [vmem:[#allocation3 + $0xf0] sm:$0xff] }
 0x1b8   : > { %v3679_v41 = vadd.f32 %v3647_v20, %v3556_v23  ;;  %v6373_v27 = vpop.f32.mrb[62].mxu0  ;;  %v3286_v20 = vld [vmem:[#allocation3 + $0xe0] sm:$0xff] }
 0x1b9   : > { %3713 = vst.msk [vmem:[#allocation3 + $0x70] sm:$0xff] %vm1583_vm5, %v3681_v13  ;;  %v3682_v48 = vadd.f32 %v6373_v27, %v3650_v12  ;;  %v3559_v1 = vpop.f32.mrb[63].mxu0  ;;  %v6346_v24 = vpop.f32.mrb[68].mxu1  ;;  %v3289_v12 = vld [vmem:[#allocation3 + $0xf8] sm:$0xff] }
 0x1ba   : > { %3711 = vst.msk [vmem:[#allocation3 + $0x60] sm:$0xff] %vm1583_vm5, %v3679_v41  ;;  %v3680_v56 = vadd.f32 %v3648_v8, %v3559_v1  ;;  %v3312_v45 = vadd.f32 %v6346_v24, %v3280_v30  ;;  %v3211_v9 = vpop.f32.mrb[69].mxu1  ;;  %v3287_v41 = vld [vmem:[#allocation3 + $0xe8] sm:$0xff] }
 0x1bb   : > { %3714 = vst.msk [vmem:[#allocation3 + $0x78] sm:$0xff] %vm1583_vm5, %v3682_v48  ;;  %v3310_v51 = vadd.f32 %v3278_v28, %v3211_v9  ;;  %v6347_v14 = vpop.f32.mrb[70].mxu1  ;;  %v3653_v39 = vld [vmem:[#allocation3 + $0x90] sm:$0xff] }
 0x1bc   : > { %3712 = vst.msk [vmem:[#allocation3 + $0x68] sm:$0xff] %vm1583_vm5, %v3680_v56  ;;  %3344 = vst.msk [vmem:[#allocation3 + $0xb0] sm:$0xff] %vm1583_vm5, %v3312_v45  ;;  %v3313_v55 = vadd.f32 %v6347_v14, %v3281_v40  ;;  %v3214_v35 = vpop.f32.mrb[71].mxu1  ;;  %v3651_v7 = vld [vmem:[#allocation3 + $0x80] sm:$0xff] }
 0x1bd   : > { %3342 = vst.msk [vmem:[#allocation3 + $0xa0] sm:$0xff] %vm1583_vm5, %v3310_v51  ;;  %v3311_v50 = vadd.f32 %v3279_v32, %v3214_v35  ;;  %v3654_v61 = vld [vmem:[#allocation3 + $0x98] sm:$0xff] }
 0x1be   : > { %v6376_v57 = vpop.f32.mrb[64].mxu0  ;;  %3345 = vst.msk [vmem:[#allocation3 + $0xb8] sm:$0xff] %vm1583_vm5, %v3313_v55  ;;  %v3652_v10 = vld [vmem:[#allocation3 + $0x88] sm:$0xff] }
 0x1bf   : > { %v3685_v22 = vadd.f32 %v6376_v57, %v3653_v39  ;;  %v3572_v19 = vpop.f32.mrb[65].mxu0  ;;  %3343 = vst.msk [vmem:[#allocation3 + $0xa8] sm:$0xff] %vm1583_vm5, %v3311_v50  ;;  %v4133_v39 = vld [vmem:[#allocation3 + $0x10] sm:$0xff] }
 0x1c0   : > { %v3683_v11 = vadd.f32 %v3651_v7, %v3572_v19  ;;  %v6377_v5 = vpop.f32.mrb[66].mxu0  ;;  %v4131_v7 = vld [vmem:[#allocation3] sm:$0xff] }
 0x1c1   : > { %3717 = vst.msk [vmem:[#allocation3 + $0x90] sm:$0xff] %vm1583_vm5, %v3685_v22  ;;  %v3686_v0 = vadd.f32 %v6377_v5, %v3654_v61  ;;  %v3575_v43 = vpop.f32.mrb[67].mxu0  ;;  %v6350_v53 = vpop.f32.mrb[72].mxu1  ;;  %v4134_v61 = vld [vmem:[#allocation3 + $0x18] sm:$0xff] }
 0x1c2   : > { %3715 = vst.msk [vmem:[#allocation3 + $0x80] sm:$0xff] %vm1583_vm5, %v3683_v11  ;;  %v3684_v42 = vadd.f32 %v3652_v10, %v3575_v43  ;;  %v3316_v47 = vadd.f32 %v6350_v53, %v3284_v25  ;;  %v3227_v2 = vpop.f32.mrb[73].mxu1  ;;  %v4132_v11 = vld [vmem:[#allocation3 + $0x8] sm:$0xff] }
 0x1c3   : > { %3718 = vst.msk [vmem:[#allocation3 + $0x98] sm:$0xff] %vm1583_vm5, %v3686_v0  ;;  %v3314_v54 = vadd.f32 %v3282_v52, %v3227_v2  ;;  %v6351_v38 = vpop.f32.mrb[74].mxu1  ;;  %v3657_v60 = vld [vmem:[#allocation3 + $0xb0] sm:$0xff] }
 0x1c4   : > { %3716 = vst.msk [vmem:[#allocation3 + $0x88] sm:$0xff] %vm1583_vm5, %v3684_v42  ;;  %3348 = vst.msk [vmem:[#allocation3 + $0xd0] sm:$0xff] %vm1583_vm5, %v3316_v47  ;;  %v3317_v15 = vadd.f32 %v6351_v38, %v3285_v33  ;;  %v3230_v58 = vpop.f32.mrb[75].mxu1  ;;  %v3655_v3 = vld [vmem:[#allocation3 + $0xa0] sm:$0xff] }
 0x1c5   : > { %3346 = vst.msk [vmem:[#allocation3 + $0xc0] sm:$0xff] %vm1583_vm5, %v3314_v54  ;;  %v3315_v17 = vadd.f32 %v3283_v63, %v3230_v58  ;;  %v3658_v21 = vld [vmem:[#allocation3 + $0xb8] sm:$0xff] }
 0x1c6   : > { %v6380_v34 = vpop.f32.mrb[68].mxu0  ;;  %3349 = vst.msk [vmem:[#allocation3 + $0xd8] sm:$0xff] %vm1583_vm5, %v3317_v15  ;;  %v3656_v18 = vld [vmem:[#allocation3 + $0xa8] sm:$0xff] }
 0x1c7   : > { %v3689_v59 = vadd.f32 %v6380_v34, %v3657_v60  ;;  %v3588_v31 = vpop.f32.mrb[69].mxu0  ;;  %3347 = vst.msk [vmem:[#allocation3 + $0xc8] sm:$0xff] %vm1583_vm5, %v3315_v17  ;;  %v4137_v60 = vld [vmem:[#allocation3 + $0x30] sm:$0xff] }
 0x1c8   : > { %v3687_v4 = vadd.f32 %v3655_v3, %v3588_v31  ;;  %v6381_v16 = vpop.f32.mrb[70].mxu0  ;;  %v4135_v3 = vld [vmem:[#allocation3 + $0x20] sm:$0xff] }
 0x1c9   : > { %3721 = vst.msk [vmem:[#allocation3 + $0xb0] sm:$0xff] %vm1583_vm5, %v3689_v59  ;;  %v3690_v6 = vadd.f32 %v6381_v16, %v3658_v21  ;;  %v3591_v44 = vpop.f32.mrb[71].mxu0  ;;  %v6354_v37 = vpop.f32.mrb[76].mxu1  ;;  %v4138_v21 = vld [vmem:[#allocation3 + $0x38] sm:$0xff] }
 0x1ca   : > { %3719 = vst.msk [vmem:[#allocation3 + $0xa0] sm:$0xff] %vm1583_vm5, %v3687_v4  ;;  %v3688_v26 = vadd.f32 %v3656_v18, %v3591_v44  ;;  %v3320_v62 = vadd.f32 %v6354_v37, %v3288_v49  ;;  %v3243_v36 = vpop.f32.mrb[77].mxu1  ;;  %v4136_v4 = vld [vmem:[#allocation3 + $0x28] sm:$0xff] }
 0x1cb   : > { %3722 = vst.msk [vmem:[#allocation3 + $0xb8] sm:$0xff] %vm1583_vm5, %v3690_v6  ;;  %v3318_v46 = vadd.f32 %v3286_v20, %v3243_v36  ;;  %v6355_v29 = vpop.f32.mrb[78].mxu1  ;;  %v3661_v13 = vld [vmem:[#allocation3 + $0xd0] sm:$0xff] }
 0x1cc   : > { %3720 = vst.msk [vmem:[#allocation3 + $0xa8] sm:$0xff] %vm1583_vm5, %v3688_v26  ;;  %3352 = vst.msk [vmem:[#allocation3 + $0xf0] sm:$0xff] %vm1583_vm5, %v3320_v62  ;;  %v3321_v23 = vadd.f32 %v6355_v29, %v3289_v12  ;;  %v3246_v8 = vpop.f32.mrb[79].mxu1  ;;  %v3659_v27 = vld [vmem:[#allocation3 + $0xc0] sm:$0xff] }
 0x1cd   : > { %3350 = vst.msk [vmem:[#allocation3 + $0xe0] sm:$0xff] %vm1583_vm5, %v3318_v46  ;;  %v3319_v48 = vadd.f32 %v3287_v41, %v3246_v8  ;;  %v3662_v24 = vld [vmem:[#allocation3 + $0xd8] sm:$0xff] }
 0x1ce   : > { %v6384_v1 = vpop.f32.mrb[72].mxu0  ;;  %3353 = vst.msk [vmem:[#allocation3 + $0xf8] sm:$0xff] %vm1583_vm5, %v3321_v23  ;;  %v3660_v45 = vld [vmem:[#allocation3 + $0xc8] sm:$0xff] }
 0x1cf   : > { %v3693_v30 = vadd.f32 %v6384_v1, %v3661_v13  ;;  %v3604_v56 = vpop.f32.mrb[73].mxu0  ;;  %3351 = vst.msk [vmem:[#allocation3 + $0xe8] sm:$0xff] %vm1583_vm5, %v3319_v48  ;;  %v4141_v13 = vld [vmem:[#allocation3 + $0x50] sm:$0xff] }
 0x1d0   : > { %v3691_v9 = vadd.f32 %v3659_v27, %v3604_v56  ;;  %v6385_v28 = vpop.f32.mrb[74].mxu0  ;;  %v4139_v27 = vld [vmem:[#allocation3 + $0x40] sm:$0xff] }
 0x1d1   : > { %3725 = vst.msk [vmem:[#allocation3 + $0xd0] sm:$0xff] %vm1583_vm5, %v3693_v30  ;;  %v3694_v51 = vadd.f32 %v6385_v28, %v3662_v24  ;;  %v3607_v14 = vpop.f32.mrb[75].mxu0  ;;  %v6394_v40 = vpop.f32.mrb[80].mxu1  ;;  %v4142_v24 = vld [vmem:[#allocation3 + $0x58] sm:$0xff] }
 0x1d2   : > { %3723 = vst.msk [vmem:[#allocation3 + $0xc0] sm:$0xff] %vm1583_vm5, %v3691_v9  ;;  %v3692_v55 = vadd.f32 %v3660_v45, %v3607_v14  ;;  %v4165_v35 = vadd.f32 %v6394_v40, %v4133_v39  ;;  %v4004_v32 = vpop.f32.mrb[81].mxu1  ;;  %v4140_v9 = vld [vmem:[#allocation3 + $0x48] sm:$0xff] }
 0x1d3   : > { %3726 = vst.msk [vmem:[#allocation3 + $0xd8] sm:$0xff] %vm1583_vm5, %v3694_v51  ;;  %v4163_v50 = vadd.f32 %v4131_v7, %v4004_v32  ;;  %v6395_v57 = vpop.f32.mrb[82].mxu1  ;;  %v3665_v22 = vld [vmem:[#allocation3 + $0xf0] sm:$0xff] }
 0x1d4   : > { %3724 = vst.msk [vmem:[#allocation3 + $0xc8] sm:$0xff] %vm1583_vm5, %v3692_v55  ;;  %4197 = vst.msk [vmem:[#allocation3 + $0x10] sm:$0xff] %vm1583_vm5, %v4165_v35  ;;  %v4166_v19 = vadd.f32 %v6395_v57, %v4134_v61  ;;  %v4007_v10 = vpop.f32.mrb[83].mxu1  ;;  %v3663_v5 = vld [vmem:[#allocation3 + $0xe0] sm:$0xff] }
 0x1d5   : > { %4195 = vst.msk [vmem:[#allocation3] sm:$0xff] %vm1583_vm5, %v4163_v50  ;;  %v4164_v0 = vadd.f32 %v4132_v11, %v4007_v10  ;;  %v3666_v53 = vld [vmem:[#allocation3 + $0xf8] sm:$0xff] }
 0x1d6   : > { %v6388_v43 = vpop.f32.mrb[76].mxu0  ;;  %4198 = vst.msk [vmem:[#allocation3 + $0x18] sm:$0xff] %vm1583_vm5, %v4166_v19  ;;  %v3664_v47 = vld [vmem:[#allocation3 + $0xe8] sm:$0xff] }
 0x1d7   : > { %v3697_v25 = vadd.f32 %v6388_v43, %v3665_v22  ;;  %v3620_v42 = vpop.f32.mrb[77].mxu0  ;;  %4196 = vst.msk [vmem:[#allocation3 + $0x8] sm:$0xff] %vm1583_vm5, %v4164_v0  ;;  %v4145_v22 = vld [vmem:[#allocation3 + $0x70] sm:$0xff] }
 0x1d8   : > { %v3695_v2 = vadd.f32 %v3663_v5, %v3620_v42  ;;  %v6389_v52 = vpop.f32.mrb[78].mxu0  ;;  %v4143_v5 = vld [vmem:[#allocation3 + $0x60] sm:$0xff] }
 0x1d9   : > { %3729 = vst.msk [vmem:[#allocation3 + $0xf0] sm:$0xff] %vm1583_vm5, %v3697_v25  ;;  %v3698_v54 = vadd.f32 %v6389_v52, %v3666_v53  ;;  %v3623_v38 = vpop.f32.mrb[79].mxu0  ;;  %v6398_v33 = vpop.f32.mrb[84].mxu1  ;;  %v4146_v53 = vld [vmem:[#allocation3 + $0x78] sm:$0xff] }
 0x1da   : > { %3727 = vst.msk [vmem:[#allocation3 + $0xe0] sm:$0xff] %vm1583_vm5, %v3695_v2  ;;  %v3696_v15 = vadd.f32 %v3664_v47, %v3623_v38  ;;  %v4169_v58 = vadd.f32 %v6398_v33, %v4137_v60  ;;  %v4020_v63 = vpop.f32.mrb[85].mxu1  ;;  %v4144_v2 = vld [vmem:[#allocation3 + $0x68] sm:$0xff] }
 0x1db   : > { %3730 = vst.msk [vmem:[#allocation3 + $0xf8] sm:$0xff] %vm1583_vm5, %v3698_v54  ;;  %v4167_v17 = vadd.f32 %v4135_v3, %v4020_v63  ;;  %v6399_v34 = vpop.f32.mrb[86].mxu1  ;;  %v4629_v59 = vld [vmem:[#allocation3 + $0x10] sm:$0xff] }
 0x1dc   : > { %3728 = vst.msk [vmem:[#allocation3 + $0xe8] sm:$0xff] %vm1583_vm5, %v3696_v15  ;;  %4201 = vst.msk [vmem:[#allocation3 + $0x30] sm:$0xff] %vm1583_vm5, %v4169_v58  ;;  %v4170_v31 = vadd.f32 %v6399_v34, %v4138_v21  ;;  %v4023_v18 = vpop.f32.mrb[87].mxu1  ;;  %v4627_v16 = vld [vmem:[#allocation3] sm:$0xff] }
 0x1dd   : > { %4199 = vst.msk [vmem:[#allocation3 + $0x20] sm:$0xff] %vm1583_vm5, %v4167_v17  ;;  %v4168_v6 = vadd.f32 %v4136_v4, %v4023_v18  ;;  %v4630_v37 = vld [vmem:[#allocation3 + $0x18] sm:$0xff] }
 0x1de   : > { %v6428_v44 = vpop.f32.mrb[80].mxu0  ;;  %4202 = vst.msk [vmem:[#allocation3 + $0x38] sm:$0xff] %vm1583_vm5, %v4170_v31  ;;  %v4628_v62 = vld [vmem:[#allocation3 + $0x8] sm:$0xff] }
 0x1df   : > { %v4661_v49 = vadd.f32 %v6428_v44, %v4629_v59  ;;  %v4500_v26 = vpop.f32.mrb[81].mxu0  ;;  %4200 = vst.msk [vmem:[#allocation3 + $0x28] sm:$0xff] %vm1583_vm5, %v4168_v6  ;;  %v4149_v59 = vld [vmem:[#allocation3 + $0x90] sm:$0xff] }
 0x1e0   : > { %v4659_v36 = vadd.f32 %v4627_v16, %v4500_v26  ;;  %v6429_v20 = vpop.f32.mrb[82].mxu0  ;;  %v4147_v16 = vld [vmem:[#allocation3 + $0x80] sm:$0xff] }
 0x1e1   : > { %4693 = vst.msk [vmem:[#allocation3 + $0x10] sm:$0xff] %vm1583_vm5, %v4661_v49  ;;  %v4662_v46 = vadd.f32 %v6429_v20, %v4630_v37  ;;  %v4503_v29 = vpop.f32.mrb[83].mxu0  ;;  %v6402_v12 = vpop.f32.mrb[88].mxu1  ;;  %v4150_v37 = vld [vmem:[#allocation3 + $0x98] sm:$0xff] }
 0x1e2   : > { %4691 = vst.msk [vmem:[#allocation3] sm:$0xff] %vm1583_vm5, %v4659_v36  ;;  %v4660_v23 = vadd.f32 %v4628_v62, %v4503_v29  ;;  %v4173_v8 = vadd.f32 %v6402_v12, %v4141_v13  ;;  %v4036_v41 = vpop.f32.mrb[89].mxu1  ;;  %v4148_v36 = vld [vmem:[#allocation3 + $0x88] sm:$0xff] }
 0x1e3   : > { %4694 = vst.msk [vmem:[#allocation3 + $0x18] sm:$0xff] %vm1583_vm5, %v4662_v46  ;;  %v4171_v48 = vadd.f32 %v4139_v27, %v4036_v41  ;;  %v6403_v1 = vpop.f32.mrb[90].mxu1  ;;  %v4633_v30 = vld [vmem:[#allocation3 + $0x30] sm:$0xff] }
 0x1e4   : > { %4692 = vst.msk [vmem:[#allocation3 + $0x8] sm:$0xff] %vm1583_vm5, %v4660_v23  ;;  %4205 = vst.msk [vmem:[#allocation3 + $0x50] sm:$0xff] %vm1583_vm5, %v4173_v8  ;;  %v4174_v56 = vadd.f32 %v6403_v1, %v4142_v24  ;;  %v4039_v45 = vpop.f32.mrb[91].mxu1  ;;  %v4631_v28 = vld [vmem:[#allocation3 + $0x20] sm:$0xff] }
 0x1e5   : > { %4203 = vst.msk [vmem:[#allocation3 + $0x40] sm:$0xff] %vm1583_vm5, %v4171_v48  ;;  %v4172_v51 = vadd.f32 %v4140_v9, %v4039_v45  ;;  %v4634_v40 = vld [vmem:[#allocation3 + $0x38] sm:$0xff] }
 0x1e6   : > { %v6432_v14 = vpop.f32.mrb[84].mxu0  ;;  %4206 = vst.msk [vmem:[#allocation3 + $0x58] sm:$0xff] %vm1583_vm5, %v4174_v56  ;;  %v4632_v35 = vld [vmem:[#allocation3 + $0x28] sm:$0xff] }
 0x1e7   : > { %v4665_v39 = vadd.f32 %v6432_v14, %v4633_v30  ;;  %v4516_v55 = vpop.f32.mrb[85].mxu0  ;;  %4204 = vst.msk [vmem:[#allocation3 + $0x48] sm:$0xff] %vm1583_vm5, %v4172_v51  ;;  %v4153_v30 = vld [vmem:[#allocation3 + $0xb0] sm:$0xff] }
 0x1e8   : > { %v4663_v32 = vadd.f32 %v4631_v28, %v4516_v55  ;;  %v6433_v7 = vpop.f32.mrb[86].mxu0  ;;  %v4151_v28 = vld [vmem:[#allocation3 + $0xa0] sm:$0xff] }
 0x1e9   : > { %4697 = vst.msk [vmem:[#allocation3 + $0x30] sm:$0xff] %vm1583_vm5, %v4665_v39  ;;  %v4666_v50 = vadd.f32 %v6433_v7, %v4634_v40  ;;  %v4519_v57 = vpop.f32.mrb[87].mxu0  ;;  %v6406_v61 = vpop.f32.mrb[92].mxu1  ;;  %v4154_v40 = vld [vmem:[#allocation3 + $0xb8] sm:$0xff] }
 0x1ea   : > { %4695 = vst.msk [vmem:[#allocation3 + $0x20] sm:$0xff] %vm1583_vm5, %v4663_v32  ;;  %v4664_v19 = vadd.f32 %v4632_v35, %v4519_v57  ;;  %v4177_v10 = vadd.f32 %v6406_v61, %v4145_v22  ;;  %v4052_v11 = vpop.f32.mrb[93].mxu1  ;;  %v4152_v32 = vld [vmem:[#allocation3 + $0xa8] sm:$0xff] }
 0x1eb   : > { %4698 = vst.msk [vmem:[#allocation3 + $0x38] sm:$0xff] %vm1583_vm5, %v4666_v50  ;;  %v4175_v0 = vadd.f32 %v4143_v5, %v4052_v11  ;;  %v6407_v43 = vpop.f32.mrb[94].mxu1  ;;  %v4637_v25 = vld [vmem:[#allocation3 + $0x50] sm:$0xff] }
 0x1ec   : > { %4696 = vst.msk [vmem:[#allocation3 + $0x28] sm:$0xff] %vm1583_vm5, %v4664_v19  ;;  %4209 = vst.msk [vmem:[#allocation3 + $0x70] sm:$0xff] %vm1583_vm5, %v4177_v10  ;;  %v4178_v42 = vadd.f32 %v6407_v43, %v4146_v53  ;;  %v4055_v47 = vpop.f32.mrb[95].mxu1  ;;  %v4635_v52 = vld [vmem:[#allocation3 + $0x40] sm:$0xff] }
 0x1ed   : > { %4207 = vst.msk [vmem:[#allocation3 + $0x60] sm:$0xff] %vm1583_vm5, %v4175_v0  ;;  %v4176_v54 = vadd.f32 %v4144_v2, %v4055_v47  ;;  %v4638_v33 = vld [vmem:[#allocation3 + $0x58] sm:$0xff] }
 0x1ee   : > { %v6436_v38 = vpop.f32.mrb[88].mxu0  ;;  %4210 = vst.msk [vmem:[#allocation3 + $0x78] sm:$0xff] %vm1583_vm5, %v4178_v42  ;;  %v4636_v58 = vld [vmem:[#allocation3 + $0x48] sm:$0xff] }
 0x1ef   : > { %v4669_v60 = vadd.f32 %v6436_v38, %v4637_v25  ;;  %v4532_v15 = vpop.f32.mrb[89].mxu0  ;;  %4208 = vst.msk [vmem:[#allocation3 + $0x68] sm:$0xff] %vm1583_vm5, %v4176_v54  ;;  %v4157_v25 = vld [vmem:[#allocation3 + $0xd0] sm:$0xff] }
 0x1f0   : > { %v4667_v63 = vadd.f32 %v4635_v52, %v4532_v15  ;;  %v6437_v3 = vpop.f32.mrb[90].mxu0  ;;  %v4155_v52 = vld [vmem:[#allocation3 + $0xc0] sm:$0xff] }
 0x1f1   : > { %4701 = vst.msk [vmem:[#allocation3 + $0x50] sm:$0xff] %vm1583_vm5, %v4669_v60  ;;  %v4670_v17 = vadd.f32 %v6437_v3, %v4638_v33  ;;  %v4535_v34 = vpop.f32.mrb[91].mxu0  ;;  %v6410_v21 = vpop.f32.mrb[96].mxu1  ;;  %v4158_v33 = vld [vmem:[#allocation3 + $0xd8] sm:$0xff] }
 0x1f2   : > { %4699 = vst.msk [vmem:[#allocation3 + $0x40] sm:$0xff] %vm1583_vm5, %v4667_v63  ;;  %v4668_v31 = vadd.f32 %v4636_v58, %v4535_v34  ;;  %v4181_v18 = vadd.f32 %v6410_v21, %v4149_v59  ;;  %v4068_v4 = vpop.f32.mrb[97].mxu1  ;;  %v4156_v63 = vld [vmem:[#allocation3 + $0xc8] sm:$0xff] }
 0x1f3   : > { %4702 = vst.msk [vmem:[#allocation3 + $0x58] sm:$0xff] %vm1583_vm5, %v4670_v17  ;;  %v4179_v6 = vadd.f32 %v4147_v16, %v4068_v4  ;;  %v6411_v44 = vpop.f32.mrb[98].mxu1  ;;  %v4641_v49 = vld [vmem:[#allocation3 + $0x70] sm:$0xff] }
 0x1f4   : > { %4700 = vst.msk [vmem:[#allocation3 + $0x48] sm:$0xff] %vm1583_vm5, %v4668_v31  ;;  %4213 = vst.msk [vmem:[#allocation3 + $0x90] sm:$0xff] %vm1583_vm5, %v4181_v18  ;;  %v4182_v26 = vadd.f32 %v6411_v44, %v4150_v37  ;;  %v4071_v62 = vpop.f32.mrb[99].mxu1  ;;  %v4639_v20 = vld [vmem:[#allocation3 + $0x60] sm:$0xff] }
 0x1f5   : > { %4211 = vst.msk [vmem:[#allocation3 + $0x80] sm:$0xff] %vm1583_vm5, %v4179_v6  ;;  %v4180_v46 = vadd.f32 %v4148_v36, %v4071_v62  ;;  %v4642_v12 = vld [vmem:[#allocation3 + $0x78] sm:$0xff] }
 0x1f6   : > { %v6440_v29 = vpop.f32.mrb[92].mxu0  ;;  %4214 = vst.msk [vmem:[#allocation3 + $0x98] sm:$0xff] %vm1583_vm5, %v4182_v26  ;;  %v4640_v8 = vld [vmem:[#allocation3 + $0x68] sm:$0xff] }
 0x1f7   : > { %v4673_v13 = vadd.f32 %v6440_v29, %v4641_v49  ;;  %v4548_v23 = vpop.f32.mrb[93].mxu0  ;;  %4212 = vst.msk [vmem:[#allocation3 + $0x88] sm:$0xff] %vm1583_vm5, %v4180_v46  ;;  %v4161_v49 = vld [vmem:[#allocation3 + $0xf0] sm:$0xff] }
 0x1f8   : > { %v4671_v41 = vadd.f32 %v4639_v20, %v4548_v23  ;;  %v6441_v27 = vpop.f32.mrb[94].mxu0  ;;  %v4159_v20 = vld [vmem:[#allocation3 + $0xe0] sm:$0xff] }
 0x1f9   : > { %4705 = vst.msk [vmem:[#allocation3 + $0x70] sm:$0xff] %vm1583_vm5, %v4673_v13  ;;  %v4674_v48 = vadd.f32 %v6441_v27, %v4642_v12  ;;  %v4551_v1 = vpop.f32.mrb[95].mxu0  ;;  %v6414_v24 = vpop.f32.mrb[100].mxu1  ;;  %v4162_v12 = vld [vmem:[#allocation3 + $0xf8] sm:$0xff] }
 0x1fa   : > { %4703 = vst.msk [vmem:[#allocation3 + $0x60] sm:$0xff] %vm1583_vm5, %v4671_v41  ;;  %v4672_v56 = vadd.f32 %v4640_v8, %v4551_v1  ;;  %v4185_v45 = vadd.f32 %v6414_v24, %v4153_v30  ;;  %v4084_v9 = vpop.f32.mrb[101].mxu1  ;;  %v4160_v41 = vld [vmem:[#allocation3 + $0xe8] sm:$0xff] }
 0x1fb   : > { %4706 = vst.msk [vmem:[#allocation3 + $0x78] sm:$0xff] %vm1583_vm5, %v4674_v48  ;;  %v4183_v51 = vadd.f32 %v4151_v28, %v4084_v9  ;;  %v6415_v14 = vpop.f32.mrb[102].mxu1  ;;  %v4645_v39 = vld [vmem:[#allocation3 + $0x90] sm:$0xff] }
 0x1fc   : > { %4704 = vst.msk [vmem:[#allocation3 + $0x68] sm:$0xff] %vm1583_vm5, %v4672_v56  ;;  %4217 = vst.msk [vmem:[#allocation3 + $0xb0] sm:$0xff] %vm1583_vm5, %v4185_v45  ;;  %v4186_v55 = vadd.f32 %v6415_v14, %v4154_v40  ;;  %v4087_v35 = vpop.f32.mrb[103].mxu1  ;;  %v4643_v7 = vld [vmem:[#allocation3 + $0x80] sm:$0xff] }
 0x1fd   : > { %4215 = vst.msk [vmem:[#allocation3 + $0xa0] sm:$0xff] %vm1583_vm5, %v4183_v51  ;;  %v4184_v50 = vadd.f32 %v4152_v32, %v4087_v35  ;;  %v4646_v61 = vld [vmem:[#allocation3 + $0x98] sm:$0xff] }
 0x1fe   : > { %v6444_v57 = vpop.f32.mrb[96].mxu0  ;;  %4218 = vst.msk [vmem:[#allocation3 + $0xb8] sm:$0xff] %vm1583_vm5, %v4186_v55  ;;  %v4644_v10 = vld [vmem:[#allocation3 + $0x88] sm:$0xff] }
 0x1ff   : > { %v4677_v22 = vadd.f32 %v6444_v57, %v4645_v39  ;;  %v4564_v19 = vpop.f32.mrb[97].mxu0  ;;  %4216 = vst.msk [vmem:[#allocation3 + $0xa8] sm:$0xff] %vm1583_vm5, %v4184_v50  ;;  %v5006_v39 = vld [vmem:[#allocation3 + $0x10] sm:$0xff] }
 0x200   : > { %v4675_v11 = vadd.f32 %v4643_v7, %v4564_v19  ;;  %v6445_v5 = vpop.f32.mrb[98].mxu0  ;;  %v5004_v7 = vld [vmem:[#allocation3] sm:$0xff] }
 0x201   : > { %4709 = vst.msk [vmem:[#allocation3 + $0x90] sm:$0xff] %vm1583_vm5, %v4677_v22  ;;  %v4678_v0 = vadd.f32 %v6445_v5, %v4646_v61  ;;  %v4567_v43 = vpop.f32.mrb[99].mxu0  ;;  %v6418_v53 = vpop.f32.mrb[104].mxu1  ;;  %v5007_v61 = vld [vmem:[#allocation3 + $0x18] sm:$0xff] }
 0x202   : > { %4707 = vst.msk [vmem:[#allocation3 + $0x80] sm:$0xff] %vm1583_vm5, %v4675_v11  ;;  %v4676_v42 = vadd.f32 %v4644_v10, %v4567_v43  ;;  %v4189_v47 = vadd.f32 %v6418_v53, %v4157_v25  ;;  %v4100_v2 = vpop.f32.mrb[105].mxu1  ;;  %v5005_v11 = vld [vmem:[#allocation3 + $0x8] sm:$0xff] }
 0x203   : > { %4710 = vst.msk [vmem:[#allocation3 + $0x98] sm:$0xff] %vm1583_vm5, %v4678_v0  ;;  %v4187_v54 = vadd.f32 %v4155_v52, %v4100_v2  ;;  %v6419_v38 = vpop.f32.mrb[106].mxu1  ;;  %v4649_v60 = vld [vmem:[#allocation3 + $0xb0] sm:$0xff] }
 0x204   : > { %4708 = vst.msk [vmem:[#allocation3 + $0x88] sm:$0xff] %vm1583_vm5, %v4676_v42  ;;  %4221 = vst.msk [vmem:[#allocation3 + $0xd0] sm:$0xff] %vm1583_vm5, %v4189_v47  ;;  %v4190_v15 = vadd.f32 %v6419_v38, %v4158_v33  ;;  %v4103_v58 = vpop.f32.mrb[107].mxu1  ;;  %v4647_v3 = vld [vmem:[#allocation3 + $0xa0] sm:$0xff] }
 0x205   : > { %4219 = vst.msk [vmem:[#allocation3 + $0xc0] sm:$0xff] %vm1583_vm5, %v4187_v54  ;;  %v4188_v17 = vadd.f32 %v4156_v63, %v4103_v58  ;;  %v4650_v21 = vld [vmem:[#allocation3 + $0xb8] sm:$0xff] }
 0x206   : > { %v6448_v34 = vpop.f32.mrb[100].mxu0  ;;  %4222 = vst.msk [vmem:[#allocation3 + $0xd8] sm:$0xff] %vm1583_vm5, %v4190_v15  ;;  %v4648_v18 = vld [vmem:[#allocation3 + $0xa8] sm:$0xff] }
 0x207   : > { %v4681_v59 = vadd.f32 %v6448_v34, %v4649_v60  ;;  %v4580_v31 = vpop.f32.mrb[101].mxu0  ;;  %4220 = vst.msk [vmem:[#allocation3 + $0xc8] sm:$0xff] %vm1583_vm5, %v4188_v17  ;;  %v5010_v60 = vld [vmem:[#allocation3 + $0x30] sm:$0xff] }
 0x208   : > { %v4679_v4 = vadd.f32 %v4647_v3, %v4580_v31  ;;  %v6449_v16 = vpop.f32.mrb[102].mxu0  ;;  %v5008_v3 = vld [vmem:[#allocation3 + $0x20] sm:$0xff] }
 0x209   : > { %4713 = vst.msk [vmem:[#allocation3 + $0xb0] sm:$0xff] %vm1583_vm5, %v4681_v59  ;;  %v4682_v6 = vadd.f32 %v6449_v16, %v4650_v21  ;;  %v4583_v44 = vpop.f32.mrb[103].mxu0  ;;  %v6422_v37 = vpop.f32.mrb[108].mxu1  ;;  %v5011_v21 = vld [vmem:[#allocation3 + $0x38] sm:$0xff] }
 0x20a   : > { %4711 = vst.msk [vmem:[#allocation3 + $0xa0] sm:$0xff] %vm1583_vm5, %v4679_v4  ;;  %v4680_v26 = vadd.f32 %v4648_v18, %v4583_v44  ;;  %v4193_v62 = vadd.f32 %v6422_v37, %v4161_v49  ;;  %v4116_v36 = vpop.f32.mrb[109].mxu1  ;;  %v5009_v4 = vld [vmem:[#allocation3 + $0x28] sm:$0xff] }
 0x20b   : > { %4714 = vst.msk [vmem:[#allocation3 + $0xb8] sm:$0xff] %vm1583_vm5, %v4682_v6  ;;  %v4191_v46 = vadd.f32 %v4159_v20, %v4116_v36  ;;  %v6423_v29 = vpop.f32.mrb[110].mxu1  ;;  %v4653_v13 = vld [vmem:[#allocation3 + $0xd0] sm:$0xff] }
 0x20c   : > { %4712 = vst.msk [vmem:[#allocation3 + $0xa8] sm:$0xff] %vm1583_vm5, %v4680_v26  ;;  %4225 = vst.msk [vmem:[#allocation3 + $0xf0] sm:$0xff] %vm1583_vm5, %v4193_v62  ;;  %v4194_v23 = vadd.f32 %v6423_v29, %v4162_v12  ;;  %v4119_v8 = vpop.f32.mrb[111].mxu1  ;;  %v4651_v27 = vld [vmem:[#allocation3 + $0xc0] sm:$0xff] }
 0x20d   : > { %4223 = vst.msk [vmem:[#allocation3 + $0xe0] sm:$0xff] %vm1583_vm5, %v4191_v46  ;;  %v4192_v48 = vadd.f32 %v4160_v41, %v4119_v8  ;;  %v4654_v24 = vld [vmem:[#allocation3 + $0xd8] sm:$0xff] }
 0x20e   : > { %v6452_v1 = vpop.f32.mrb[104].mxu0  ;;  %4226 = vst.msk [vmem:[#allocation3 + $0xf8] sm:$0xff] %vm1583_vm5, %v4194_v23  ;;  %v4652_v45 = vld [vmem:[#allocation3 + $0xc8] sm:$0xff] }
 0x20f   : > { %v4685_v30 = vadd.f32 %v6452_v1, %v4653_v13  ;;  %v4596_v56 = vpop.f32.mrb[105].mxu0  ;;  %4224 = vst.msk [vmem:[#allocation3 + $0xe8] sm:$0xff] %vm1583_vm5, %v4192_v48  ;;  %v5014_v13 = vld [vmem:[#allocation3 + $0x50] sm:$0xff] }
 0x210   : > { %v4683_v9 = vadd.f32 %v4651_v27, %v4596_v56  ;;  %v6453_v28 = vpop.f32.mrb[106].mxu0  ;;  %v5012_v27 = vld [vmem:[#allocation3 + $0x40] sm:$0xff] }
 0x211   : > { %4717 = vst.msk [vmem:[#allocation3 + $0xd0] sm:$0xff] %vm1583_vm5, %v4685_v30  ;;  %v4686_v51 = vadd.f32 %v6453_v28, %v4654_v24  ;;  %v4599_v14 = vpop.f32.mrb[107].mxu0  ;;  %v6462_v40 = vpop.f32.mrb[112].mxu1  ;;  %v5015_v24 = vld [vmem:[#allocation3 + $0x58] sm:$0xff] }
 0x212   : > { %4715 = vst.msk [vmem:[#allocation3 + $0xc0] sm:$0xff] %vm1583_vm5, %v4683_v9  ;;  %v4684_v55 = vadd.f32 %v4652_v45, %v4599_v14  ;;  %v5038_v35 = vadd.f32 %v6462_v40, %v5006_v39  ;;  %v4877_v32 = vpop.f32.mrb[113].mxu1  ;;  %v5013_v9 = vld [vmem:[#allocation3 + $0x48] sm:$0xff] }
 0x213   : > { %4718 = vst.msk [vmem:[#allocation3 + $0xd8] sm:$0xff] %vm1583_vm5, %v4686_v51  ;;  %v5036_v50 = vadd.f32 %v5004_v7, %v4877_v32  ;;  %v6463_v57 = vpop.f32.mrb[114].mxu1  ;;  %v4657_v22 = vld [vmem:[#allocation3 + $0xf0] sm:$0xff]  ;;  %v8299_v14 = vld [vmem:[%s8501_s2] ss:$0 sm:$0xff] }
 0x214   : > { %4716 = vst.msk [vmem:[#allocation3 + $0xc8] sm:$0xff] %vm1583_vm5, %v4684_v55  ;;  %5070 = vst.msk [vmem:[#allocation3 + $0x10] sm:$0xff] %vm1583_vm5, %v5038_v35  ;;  %v5039_v19 = vadd.f32 %v6463_v57, %v5007_v61  ;;  %v4880_v10 = vpop.f32.mrb[115].mxu1  ;;  %v4655_v5 = vld [vmem:[#allocation3 + $0xe0] sm:$0xff] }
 0x215   : > { %5068 = vst.msk [vmem:[#allocation3] sm:$0xff] %vm1583_vm5, %v5036_v50  ;;  %v5037_v0 = vadd.f32 %v5005_v11, %v4880_v10  ;;  %v4658_v53 = vld [vmem:[#allocation3 + $0xf8] sm:$0xff]  ;;  %v8306_v50 = vld [vmem:[%s8502_s3] ss:$0 sm:$0xff] }
 0x216   : > { %v6456_v43 = vpop.f32.mrb[108].mxu0  ;;  %5071 = vst.msk [vmem:[#allocation3 + $0x18] sm:$0xff] %vm1583_vm5, %v5039_v19  ;;  %v4656_v47 = vld [vmem:[#allocation3 + $0xe8] sm:$0xff] }
 0x217   : > { %v4689_v25 = vadd.f32 %v6456_v43, %v4657_v22  ;;  %v4612_v42 = vpop.f32.mrb[109].mxu0  ;;  %5069 = vst.msk [vmem:[#allocation3 + $0x8] sm:$0xff] %vm1583_vm5, %v5037_v0  ;;  %v5018_v0 = vld [vmem:[#allocation3 + $0x70] sm:$0xff] }
 0x218   : > { %v4687_v2 = vadd.f32 %v4655_v5, %v4612_v42  ;;  %v6457_v52 = vpop.f32.mrb[110].mxu0 }
 0x219   : > { %4721 = vst.msk [vmem:[#allocation3 + $0xf0] sm:$0xff] %vm1583_vm5, %v4689_v25  ;;  %v4690_v54 = vadd.f32 %v6457_v52, %v4658_v53  ;;  %v4615_v38 = vpop.f32.mrb[111].mxu0  ;;  %v6466_v33 = vpop.f32.mrb[116].mxu1 }
 0x21a   : > { %4719 = vst.msk [vmem:[#allocation3 + $0xe0] sm:$0xff] %vm1583_vm5, %v4687_v2  ;;  %v4688_v15 = vadd.f32 %v4656_v47, %v4615_v38  ;;  %v5042_v58 = vadd.f32 %v6466_v33, %v5010_v60  ;;  %v4893_v63 = vpop.f32.mrb[117].mxu1  ;;  %v5016_v2 = vld [vmem:[#allocation3 + $0x60] sm:$0xff] }
 0x21b   : > { %4722 = vst.msk [vmem:[#allocation3 + $0xf8] sm:$0xff] %vm1583_vm5, %v4690_v54  ;;  %v5040_v17 = vadd.f32 %v5008_v3, %v4893_v63  ;;  %v6467_v34 = vpop.f32.mrb[118].mxu1  ;;  %v5502_v59 = vld [vmem:[#allocation3 + $0x10] sm:$0xff] }
 0x21c   : > { %4720 = vst.msk [vmem:[#allocation3 + $0xe8] sm:$0xff] %vm1583_vm5, %v4688_v15  ;;  %5074 = vst.msk [vmem:[#allocation3 + $0x30] sm:$0xff] %vm1583_vm5, %v5042_v58  ;;  %v5043_v31 = vadd.f32 %v6467_v34, %v5011_v21  ;;  %v4896_v18 = vpop.f32.mrb[119].mxu1  ;;  %v5500_v16 = vld [vmem:[#allocation3] sm:$0xff]  ;;  %v5019_v15 = vld [vmem:[#allocation3 + $0x78] sm:$0xff] }
 0x21d   : > { %5072 = vst.msk [vmem:[#allocation3 + $0x20] sm:$0xff] %vm1583_vm5, %v5040_v17  ;;  %v5041_v6 = vadd.f32 %v5009_v4, %v4896_v18  ;;  %v5503_v37 = vld [vmem:[#allocation3 + $0x18] sm:$0xff]  ;;  %v5017_v21 = vld [vmem:[#allocation3 + $0x68] sm:$0xff] }
 0x21e   : > { %v6496_v44 = vpop.f32.mrb[112].mxu0  ;;  %5075 = vst.msk [vmem:[#allocation3 + $0x38] sm:$0xff] %vm1583_vm5, %v5043_v31  ;;  %v5501_v62 = vld [vmem:[#allocation3 + $0x8] sm:$0xff] }
 0x21f   : > { %v5534_v49 = vadd.f32 %v6496_v44, %v5502_v59  ;;  %v5373_v26 = vpop.f32.mrb[113].mxu0  ;;  %5073 = vst.msk [vmem:[#allocation3 + $0x28] sm:$0xff] %vm1583_vm5, %v5041_v6 }
 0x220   : > { %v5532_v36 = vadd.f32 %v5500_v16, %v5373_v26  ;;  %v6497_v20 = vpop.f32.mrb[114].mxu0 }
 0x221   : > { %5566 = vst.msk [vmem:[#allocation3 + $0x10] sm:$0xff] %vm1583_vm5, %v5534_v49  ;;  %v5535_v46 = vadd.f32 %v6497_v20, %v5503_v37  ;;  %v5376_v29 = vpop.f32.mrb[115].mxu0  ;;  %v6470_v12 = vpop.f32.mrb[120].mxu1 }
 0x222   : > { %5564 = vst.msk [vmem:[#allocation3] sm:$0xff] %vm1583_vm5, %v5532_v36  ;;  %v5533_v23 = vadd.f32 %v5501_v62, %v5376_v29  ;;  %v5046_v8 = vadd.f32 %v6470_v12, %v5014_v13  ;;  %v4909_v41 = vpop.f32.mrb[121].mxu1 }
 0x223   : > { %5567 = vst.msk [vmem:[#allocation3 + $0x18] sm:$0xff] %vm1583_vm5, %v5535_v46  ;;  %v5044_v48 = vadd.f32 %v5012_v27, %v4909_v41  ;;  %v6471_v1 = vpop.f32.mrb[122].mxu1  ;;  %v5506_v30 = vld [vmem:[#allocation3 + $0x30] sm:$0xff] }
 0x224   : > { %5565 = vst.msk [vmem:[#allocation3 + $0x8] sm:$0xff] %vm1583_vm5, %v5533_v23  ;;  %5078 = vst.msk [vmem:[#allocation3 + $0x50] sm:$0xff] %vm1583_vm5, %v5046_v8  ;;  %v5047_v56 = vadd.f32 %v6471_v1, %v5015_v24  ;;  %v4912_v45 = vpop.f32.mrb[123].mxu1  ;;  %v5504_v28 = vld [vmem:[#allocation3 + $0x20] sm:$0xff] }
 0x225   : > { %5076 = vst.msk [vmem:[#allocation3 + $0x40] sm:$0xff] %vm1583_vm5, %v5044_v48  ;;  %v5045_v51 = vadd.f32 %v5013_v9, %v4912_v45  ;;  %v5507_v39 = vld [vmem:[#allocation3 + $0x38] sm:$0xff]  ;;  %v5022_v48 = vld [vmem:[#allocation3 + $0x90] sm:$0xff]  ;;  %v5020_v9 = vld [vmem:[#allocation3 + $0x80] sm:$0xff] }
 0x226   : > { %v6500_v40 = vpop.f32.mrb[116].mxu0  ;;  %5079 = vst.msk [vmem:[#allocation3 + $0x58] sm:$0xff] %vm1583_vm5, %v5047_v56  ;;  %v5505_v32 = vld [vmem:[#allocation3 + $0x28] sm:$0xff] }
 0x227   : > { %v5538_v55 = vadd.f32 %v6500_v40, %v5506_v30  ;;  %v5389_v35 = vpop.f32.mrb[117].mxu0  ;;  %5077 = vst.msk [vmem:[#allocation3 + $0x48] sm:$0xff] %vm1583_vm5, %v5045_v51 }
 0x228   : > { %v5598_v7 = vld [vmem:[#allocation3 + $0x10] sm:$0xff]  ;;  %v5536_v57 = vadd.f32 %v5504_v28, %v5389_v35  ;;  %v6501_v61 = vpop.f32.mrb[118].mxu0  ;;  %v5023_v35 = vld [vmem:[#allocation3 + $0x98] sm:$0xff] }
 0x229   : > { %v5637_v22 = vmul.f32 %v8299_v14, %v5598_v7  ;;  %v5596_v19 = vld [vmem:[#allocation3] sm:$0xff]  ;;  %5570 = vst.msk [vmem:[#allocation3 + $0x30] sm:$0xff] %vm1583_vm5, %v5538_v55  ;;  %v5539_v10 = vadd.f32 %v6501_v61, %v5507_v39  ;;  %v5392_v11 = vpop.f32.mrb[119].mxu0  ;;  %v6474_v5 = vpop.f32.mrb[124].mxu1 }
 0x22a   : > { %v5635_v43 = vmul.f32 %v8299_v14, %v5596_v19  ;;  %v5599_v53 = vld [vmem:[#allocation3 + $0x18] sm:$0xff]  ;;  %5568 = vst.msk [vmem:[#allocation3 + $0x20] sm:$0xff] %vm1583_vm5, %v5536_v57  ;;  %v5537_v25 = vadd.f32 %v5505_v32, %v5392_v11  ;;  %v5050_v42 = vadd.f32 %v6474_v5, %v5018_v0  ;;  %v4925_v47 = vpop.f32.mrb[125].mxu1  ;;  %v5021_v19 = vld [vmem:[#allocation3 + $0x88] sm:$0xff] }
 0x22b   : > { %v5676_v52 = vadd.f32 %v8306_v50, %v5637_v22  ;;  %v5638_v54 = vmul.f32 %v8299_v14, %v5599_v53  ;;  %v5597_v38 = vld [vmem:[#allocation3 + $0x8] sm:$0xff]  ;;  %5571 = vst.msk [vmem:[#allocation3 + $0x38] sm:$0xff] %vm1583_vm5, %v5539_v10  ;;  %v5048_v33 = vadd.f32 %v5016_v2, %v4925_v47  ;;  %v6475_v60 = vpop.f32.mrb[126].mxu1  ;;  %v5510_v3 = vld [vmem:[#allocation3 + $0x50] sm:$0xff] }
 0x22c   : > { %v5674_v58 = vadd.f32 %v8306_v50, %v5635_v43  ;;  %v5636_v63 = vmul.f32 %v8299_v14, %v5597_v38  ;;  %5569 = vst.msk [vmem:[#allocation3 + $0x28] sm:$0xff] %vm1583_vm5, %v5537_v25  ;;  %5082 = vst.msk [vmem:[#allocation3 + $0x70] sm:$0xff] %vm1583_vm5, %v5050_v42  ;;  %v5051_v17 = vadd.f32 %v6475_v60, %v5019_v15  ;;  %v4928_v34 = vpop.f32.mrb[127].mxu1  ;;  %v5508_v18 = vld [vmem:[#allocation3 + $0x40] sm:$0xff] }
 0x22d   : > { %v5708_v59 = vmax.f32 %v5676_v52, 0.0  ;;  %v5677_v31 = vadd.f32 %v8306_v50, %v5638_v54  ;;  %5080 = vst.msk [vmem:[#allocation3 + $0x60] sm:$0xff] %vm1583_vm5, %v5048_v33  ;;  %v5049_v4 = vadd.f32 %v5017_v21, %v4928_v34  ;;  %v5511_v37 = vld [vmem:[#allocation3 + $0x58] sm:$0xff]  ;;  %v5026_v21 = vld [vmem:[#allocation3 + $0xb0] sm:$0xff] }
 0x22e   : > { %v5706_v16 = vmax.f32 %v5674_v58, 0.0  ;;  %v5675_v6 = vadd.f32 %v8306_v50, %v5636_v63  ;;  %v6504_v44 = vpop.f32.mrb[120].mxu0  ;;  %5083 = vst.msk [vmem:[#allocation3 + $0x78] sm:$0xff] %vm1583_vm5, %v5051_v17  ;;  %v5509_v36 = vld [vmem:[#allocation3 + $0x48] sm:$0xff] }
 0x22f   : > { %5740 = vst.msk [vmem:[%s8319_s25 + $0x10] sm:$0xff] %vm1583_vm5, %v5708_v59  ;;  %v5709_v49 = vmax.f32 %v5677_v31, 0.0  ;;  %v5542_v26 = vadd.f32 %v6504_v44, %v5510_v3  ;;  %v5405_v62 = vpop.f32.mrb[121].mxu0  ;;  %5081 = vst.msk [vmem:[#allocation3 + $0x68] sm:$0xff] %vm1583_vm5, %v5049_v4 }
 0x230   : > { %5738 = vst.msk [vmem:[%s8319_s25] sm:$0xff] %vm1583_vm5, %v5706_v16  ;;  %v5707_v20 = vmax.f32 %v5675_v6, 0.0  ;;  %v5602_v46 = vld [vmem:[#allocation3 + $0x30] sm:$0xff]  ;;  %v5540_v29 = vadd.f32 %v5508_v18, %v5405_v62  ;;  %v6505_v12 = vpop.f32.mrb[122].mxu0  ;;  %v5024_v6 = vld [vmem:[#allocation3 + $0xa0] sm:$0xff] }
 0x231   : > { %5741 = vst.msk [vmem:[%s8319_s25 + $0x18] sm:$0xff] %vm1583_vm5, %v5709_v49  ;;  %v5641_v13 = vmul.f32 %v8299_v14, %v5602_v46  ;;  %v5600_v23 = vld [vmem:[#allocation3 + $0x20] sm:$0xff]  ;;  %5574 = vst.msk [vmem:[#allocation3 + $0x50] sm:$0xff] %vm1583_vm5, %v5542_v26  ;;  %v5543_v8 = vadd.f32 %v6505_v12, %v5511_v37  ;;  %v5408_v41 = vpop.f32.mrb[123].mxu0  ;;  %v6478_v27 = vpop.f32.mrb[128].mxu1 }
 0x232   : > { %5739 = vst.msk [vmem:[%s8319_s25 + $0x8] sm:$0xff] %vm1583_vm5, %v5707_v20  ;;  %v5639_v1 = vmul.f32 %v8299_v14, %v5600_v23  ;;  %v5603_v24 = vld [vmem:[#allocation3 + $0x38] sm:$0xff]  ;;  %5572 = vst.msk [vmem:[#allocation3 + $0x40] sm:$0xff] %vm1583_vm5, %v5540_v29  ;;  %v5541_v30 = vadd.f32 %v5509_v36, %v5408_v41  ;;  %v5054_v56 = vadd.f32 %v6478_v27, %v5022_v48  ;;  %v4941_v45 = vpop.f32.mrb[129].mxu1  ;;  %v5025_v23 = vld [vmem:[#allocation3 + $0xa8] sm:$0xff] }
 0x233   : > { %v5680_v28 = vadd.f32 %v8306_v50, %v5641_v13  ;;  %v5642_v51 = vmul.f32 %v8299_v14, %v5603_v24  ;;  %v5601_v40 = vld [vmem:[#allocation3 + $0x28] sm:$0xff]  ;;  %5575 = vst.msk [vmem:[#allocation3 + $0x58] sm:$0xff] %vm1583_vm5, %v5543_v8  ;;  %v5052_v39 = vadd.f32 %v5020_v9, %v4941_v45  ;;  %v6479_v55 = vpop.f32.mrb[130].mxu1  ;;  %v5514_v57 = vld [vmem:[#allocation3 + $0x70] sm:$0xff]  ;;  %v5027_v36 = vld [vmem:[#allocation3 + $0xb8] sm:$0xff] }
 0x234   : > { %v5678_v32 = vadd.f32 %v8306_v50, %v5639_v1  ;;  %v5640_v7 = vmul.f32 %v8299_v14, %v5601_v40  ;;  %5573 = vst.msk [vmem:[#allocation3 + $0x48] sm:$0xff] %vm1583_vm5, %v5541_v30  ;;  %5086 = vst.msk [vmem:[#allocation3 + $0x90] sm:$0xff] %vm1583_vm5, %v5054_v56  ;;  %v5055_v61 = vadd.f32 %v6479_v55, %v5023_v35  ;;  %v4944_v22 = vpop.f32.mrb[131].mxu1  ;;  %v5512_v5 = vld [vmem:[#allocation3 + $0x60] sm:$0xff] }
 0x235   : > { %v5712_v10 = vmax.f32 %v5680_v28, 0.0  ;;  %v5681_v11 = vadd.f32 %v8306_v50, %v5642_v51  ;;  %5084 = vst.msk [vmem:[#allocation3 + $0x80] sm:$0xff] %vm1583_vm5, %v5052_v39  ;;  %v5053_v0 = vadd.f32 %v5021_v19, %v4944_v22  ;;  %v5515_v42 = vld [vmem:[#allocation3 + $0x78] sm:$0xff]  ;;  %v5030_v19 = vld [vmem:[#allocation3 + $0xd0] sm:$0xff] }
 0x236   : > { %v5710_v43 = vmax.f32 %v5678_v32, 0.0  ;;  %v5679_v53 = vadd.f32 %v8306_v50, %v5640_v7  ;;  %v6508_v25 = vpop.f32.mrb[124].mxu0  ;;  %5087 = vst.msk [vmem:[#allocation3 + $0x98] sm:$0xff] %vm1583_vm5, %v5055_v61  ;;  %v5513_v54 = vld [vmem:[#allocation3 + $0x68] sm:$0xff] }
 0x237   : > { %5744 = vst.msk [vmem:[%s8319_s25 + $0x30] sm:$0xff] %vm1583_vm5, %v5712_v10  ;;  %v5713_v47 = vmax.f32 %v5681_v11, 0.0  ;;  %v5546_v2 = vadd.f32 %v6508_v25, %v5514_v57  ;;  %v5421_v52 = vpop.f32.mrb[125].mxu0  ;;  %5085 = vst.msk [vmem:[#allocation3 + $0x88] sm:$0xff] %vm1583_vm5, %v5053_v0 }
 0x238   : > { %5742 = vst.msk [vmem:[%s8319_s25 + $0x20] sm:$0xff] %vm1583_vm5, %v5710_v43  ;;  %v5711_v38 = vmax.f32 %v5679_v53, 0.0  ;;  %v5606_v33 = vld [vmem:[#allocation3 + $0x50] sm:$0xff]  ;;  %v5544_v60 = vadd.f32 %v5512_v5, %v5421_v52  ;;  %v6509_v15 = vpop.f32.mrb[126].mxu0  ;;  %v5028_v53 = vld [vmem:[#allocation3 + $0xc0] sm:$0xff] }
 0x239   : > { %5745 = vst.msk [vmem:[%s8319_s25 + $0x38] sm:$0xff] %vm1583_vm5, %v5713_v47  ;;  %v5645_v58 = vmul.f32 %v8299_v14, %v5606_v33  ;;  %v5604_v63 = vld [vmem:[#allocation3 + $0x40] sm:$0xff]  ;;  %5578 = vst.msk [vmem:[#allocation3 + $0x70] sm:$0xff] %vm1583_vm5, %v5546_v2  ;;  %v5547_v3 = vadd.f32 %v6509_v15, %v5515_v42  ;;  %v5424_v17 = vpop.f32.mrb[127].mxu0  ;;  %v6482_v34 = vpop.f32.mrb[132].mxu1 }
 0x23a   : > { %5743 = vst.msk [vmem:[%s8319_s25 + $0x28] sm:$0xff] %vm1583_vm5, %v5711_v38  ;;  %v5643_v59 = vmul.f32 %v8299_v14, %v5604_v63  ;;  %v5607_v31 = vld [vmem:[#allocation3 + $0x58] sm:$0xff]  ;;  %5576 = vst.msk [vmem:[#allocation3 + $0x60] sm:$0xff] %vm1583_vm5, %v5544_v60  ;;  %v5545_v18 = vadd.f32 %v5513_v54, %v5424_v17  ;;  %v5058_v4 = vadd.f32 %v6482_v34, %v5026_v21  ;;  %v4957_v16 = vpop.f32.mrb[133].mxu1  ;;  %v5029_v63 = vld [vmem:[#allocation3 + $0xc8] sm:$0xff] }
 0x23b   : > { %v5684_v44 = vadd.f32 %v8306_v50, %v5645_v58  ;;  %v5646_v37 = vmul.f32 %v8299_v14, %v5607_v31  ;;  %v5605_v49 = vld [vmem:[#allocation3 + $0x48] sm:$0xff]  ;;  %5579 = vst.msk [vmem:[#allocation3 + $0x78] sm:$0xff] %vm1583_vm5, %v5547_v3  ;;  %v5056_v26 = vadd.f32 %v5024_v6, %v4957_v16  ;;  %v6483_v62 = vpop.f32.mrb[134].mxu1  ;;  %v5518_v29 = vld [vmem:[#allocation3 + $0x90] sm:$0xff]  ;;  %v5031_v54 = vld [vmem:[#allocation3 + $0xd8] sm:$0xff] }
 0x23c   : > { %v5682_v20 = vadd.f32 %v8306_v50, %v5643_v59  ;;  %v5644_v46 = vmul.f32 %v8299_v14, %v5605_v49  ;;  %5577 = vst.msk [vmem:[#allocation3 + $0x68] sm:$0xff] %vm1583_vm5, %v5545_v18  ;;  %5090 = vst.msk [vmem:[#allocation3 + $0xb0] sm:$0xff] %vm1583_vm5, %v5058_v4  ;;  %v5059_v12 = vadd.f32 %v6483_v62, %v5027_v36  ;;  %v4960_v13 = vpop.f32.mrb[135].mxu1  ;;  %v5516_v27 = vld [vmem:[#allocation3 + $0x80] sm:$0xff] }
 0x23d   : > { %v5716_v8 = vmax.f32 %v5684_v44, 0.0  ;;  %v5685_v41 = vadd.f32 %v8306_v50, %v5646_v37  ;;  %5088 = vst.msk [vmem:[#allocation3 + $0xa0] sm:$0xff] %vm1583_vm5, %v5056_v26  ;;  %v5057_v48 = vadd.f32 %v5025_v23, %v4960_v13  ;;  %v5519_v56 = vld [vmem:[#allocation3 + $0x98] sm:$0xff]  ;;  %v5034_v23 = vld [vmem:[#allocation3 + $0xf0] sm:$0xff] }
 0x23e   : > { %v5714_v1 = vmax.f32 %v5682_v20, 0.0  ;;  %v5683_v24 = vadd.f32 %v8306_v50, %v5644_v46  ;;  %v6512_v30 = vpop.f32.mrb[128].mxu0  ;;  %5091 = vst.msk [vmem:[#allocation3 + $0xb8] sm:$0xff] %vm1583_vm5, %v5059_v12  ;;  %v5517_v51 = vld [vmem:[#allocation3 + $0x88] sm:$0xff] }
 0x23f   : > { %5748 = vst.msk [vmem:[%s8319_s25 + $0x50] sm:$0xff] %vm1583_vm5, %v5716_v8  ;;  %v5717_v45 = vmax.f32 %v5685_v41, 0.0  ;;  %v5550_v9 = vadd.f32 %v6512_v30, %v5518_v29  ;;  %v5437_v28 = vpop.f32.mrb[129].mxu0  ;;  %5089 = vst.msk [vmem:[#allocation3 + $0xa8] sm:$0xff] %vm1583_vm5, %v5057_v48 }
 0x240   : > { %5746 = vst.msk [vmem:[%s8319_s25 + $0x40] sm:$0xff] %vm1583_vm5, %v5714_v1  ;;  %v5715_v40 = vmax.f32 %v5683_v24, 0.0  ;;  %v5610_v39 = vld [vmem:[#allocation3 + $0x70] sm:$0xff]  ;;  %v5548_v55 = vadd.f32 %v5516_v27, %v5437_v28  ;;  %v6513_v35 = vpop.f32.mrb[130].mxu0  ;;  %v5032_v24 = vld [vmem:[#allocation3 + $0xe0] sm:$0xff] }
 0x241   : > { %5749 = vst.msk [vmem:[%s8319_s25 + $0x58] sm:$0xff] %vm1583_vm5, %v5717_v45  ;;  %v5649_v32 = vmul.f32 %v8299_v14, %v5610_v39  ;;  %v5608_v7 = vld [vmem:[#allocation3 + $0x60] sm:$0xff]  ;;  %5582 = vst.msk [vmem:[#allocation3 + $0x90] sm:$0xff] %vm1583_vm5, %v5550_v9  ;;  %v5551_v57 = vadd.f32 %v6513_v35, %v5519_v56  ;;  %v5440_v61 = vpop.f32.mrb[131].mxu0  ;;  %v6486_v22 = vpop.f32.mrb[136].mxu1 }
 0x242   : > { %5747 = vst.msk [vmem:[%s8319_s25 + $0x48] sm:$0xff] %vm1583_vm5, %v5715_v40  ;;  %v5647_v10 = vmul.f32 %v8299_v14, %v5608_v7  ;;  %v5611_v11 = vld [vmem:[#allocation3 + $0x78] sm:$0xff]  ;;  %5580 = vst.msk [vmem:[#allocation3 + $0x80] sm:$0xff] %vm1583_vm5, %v5548_v55  ;;  %v5549_v5 = vadd.f32 %v5517_v51, %v5440_v61  ;;  %v5062_v0 = vadd.f32 %v6486_v22, %v5030_v19  ;;  %v4973_v43 = vpop.f32.mrb[137].mxu1  ;;  %v5033_v7 = vld [vmem:[#allocation3 + $0xe8] sm:$0xff] }
 0x243   : > { %v5688_v25 = vadd.f32 %v8306_v50, %v5649_v32  ;;  %v5650_v42 = vmul.f32 %v8299_v14, %v5611_v11  ;;  %v5609_v47 = vld [vmem:[#allocation3 + $0x68] sm:$0xff]  ;;  %5583 = vst.msk [vmem:[#allocation3 + $0x98] sm:$0xff] %vm1583_vm5, %v5551_v57  ;;  %v5060_v2 = vadd.f32 %v5028_v53, %v4973_v43  ;;  %v6487_v52 = vpop.f32.mrb[138].mxu1  ;;  %v5522_v60 = vld [vmem:[#allocation3 + $0xb0] sm:$0xff]  ;;  %v5035_v51 = vld [vmem:[#allocation3 + $0xf8] sm:$0xff] }
 0x244   : > { %v5686_v38 = vadd.f32 %v8306_v50, %v5647_v10  ;;  %v5648_v33 = vmul.f32 %v8299_v14, %v5609_v47  ;;  %5581 = vst.msk [vmem:[#allocation3 + $0x88] sm:$0xff] %vm1583_vm5, %v5549_v5  ;;  %5094 = vst.msk [vmem:[#allocation3 + $0xd0] sm:$0xff] %vm1583_vm5, %v5062_v0  ;;  %v5063_v15 = vadd.f32 %v6487_v52, %v5031_v54  ;;  %v4976_v58 = vpop.f32.mrb[139].mxu1  ;;  %v5520_v34 = vld [vmem:[#allocation3 + $0xa0] sm:$0xff] }
 0x245   : > { %v5720_v3 = vmax.f32 %v5688_v25, 0.0  ;;  %v5689_v17 = vadd.f32 %v8306_v50, %v5650_v42  ;;  %5092 = vst.msk [vmem:[#allocation3 + $0xc0] sm:$0xff] %vm1583_vm5, %v5060_v2  ;;  %v5061_v21 = vadd.f32 %v5029_v63, %v4976_v58  ;;  %v5523_v4 = vld [vmem:[#allocation3 + $0xb8] sm:$0xff] }
 0x246   : > { %v5718_v59 = vmax.f32 %v5686_v38, 0.0  ;;  %v5687_v31 = vadd.f32 %v8306_v50, %v5648_v33  ;;  %v6516_v18 = vpop.f32.mrb[132].mxu0  ;;  %5095 = vst.msk [vmem:[#allocation3 + $0xd8] sm:$0xff] %vm1583_vm5, %v5063_v15  ;;  %v5521_v37 = vld [vmem:[#allocation3 + $0xa8] sm:$0xff] }
 0x247   : > { %5752 = vst.msk [vmem:[%s8319_s25 + $0x70] sm:$0xff] %vm1583_vm5, %v5720_v3  ;;  %v5721_v16 = vmax.f32 %v5689_v17, 0.0  ;;  %v5554_v6 = vadd.f32 %v6516_v18, %v5522_v60  ;;  %v5453_v44 = vpop.f32.mrb[133].mxu0  ;;  %5093 = vst.msk [vmem:[#allocation3 + $0xc8] sm:$0xff] %vm1583_vm5, %v5061_v21 }
 0x248   : > { %5750 = vst.msk [vmem:[%s8319_s25 + $0x60] sm:$0xff] %vm1583_vm5, %v5718_v59  ;;  %v5719_v49 = vmax.f32 %v5687_v31, 0.0  ;;  %v5614_v26 = vld [vmem:[#allocation3 + $0x90] sm:$0xff]  ;;  %v5552_v62 = vadd.f32 %v5520_v34, %v5453_v44  ;;  %v6517_v36 = vpop.f32.mrb[134].mxu0 }
 0x249   : > { %5753 = vst.msk [vmem:[%s8319_s25 + $0x78] sm:$0xff] %vm1583_vm5, %v5721_v16  ;;  %v5653_v20 = vmul.f32 %v8299_v14, %v5614_v26  ;;  %v5612_v46 = vld [vmem:[#allocation3 + $0x80] sm:$0xff]  ;;  %5586 = vst.msk [vmem:[#allocation3 + $0xb0] sm:$0xff] %vm1583_vm5, %v5554_v6  ;;  %v5555_v29 = vadd.f32 %v6517_v36, %v5523_v4  ;;  %v5456_v12 = vpop.f32.mrb[135].mxu0  ;;  %v6490_v13 = vpop.f32.mrb[140].mxu1 }
 0x24a   : > { %5751 = vst.msk [vmem:[%s8319_s25 + $0x68] sm:$0xff] %vm1583_vm5, %v5719_v49  ;;  %v5651_v8 = vmul.f32 %v8299_v14, %v5612_v46  ;;  %v5615_v41 = vld [vmem:[#allocation3 + $0x98] sm:$0xff]  ;;  %5584 = vst.msk [vmem:[#allocation3 + $0xa0] sm:$0xff] %vm1583_vm5, %v5552_v62  ;;  %v5553_v27 = vadd.f32 %v5521_v37, %v5456_v12  ;;  %v5066_v48 = vadd.f32 %v6490_v13, %v5034_v23  ;;  %v4989_v1 = vpop.f32.mrb[141].mxu1 }
 0x24b   : > { %v5692_v30 = vadd.f32 %v8306_v50, %v5653_v20  ;;  %v5654_v56 = vmul.f32 %v8299_v14, %v5615_v41  ;;  %v5613_v45 = vld [vmem:[#allocation3 + $0x88] sm:$0xff]  ;;  %5587 = vst.msk [vmem:[#allocation3 + $0xb8] sm:$0xff] %vm1583_vm5, %v5555_v29  ;;  %v5064_v9 = vadd.f32 %v5032_v24, %v4989_v1  ;;  %v6491_v28 = vpop.f32.mrb[142].mxu1  ;;  %v5526_v55 = vld [vmem:[#allocation3 + $0xd0] sm:$0xff] }
 0x24c   : > { %v5690_v40 = vadd.f32 %v8306_v50, %v5651_v8  ;;  %v5652_v39 = vmul.f32 %v8299_v14, %v5613_v45  ;;  %5585 = vst.msk [vmem:[#allocation3 + $0xa8] sm:$0xff] %vm1583_vm5, %v5553_v27  ;;  %5098 = vst.msk [vmem:[#allocation3 + $0xf0] sm:$0xff] %vm1583_vm5, %v5066_v48  ;;  %v5067_v35 = vadd.f32 %v6491_v28, %v5035_v51  ;;  %v4992_v32 = vpop.f32.mrb[143].mxu1  ;;  %v5524_v22 = vld [vmem:[#allocation3 + $0xc0] sm:$0xff] }
 0x24d   : > { %v5724_v57 = vmax.f32 %v5692_v30, 0.0  ;;  %v5693_v61 = vadd.f32 %v8306_v50, %v5654_v56  ;;  %5096 = vst.msk [vmem:[#allocation3 + $0xe0] sm:$0xff] %vm1583_vm5, %v5064_v9  ;;  %v5065_v19 = vadd.f32 %v5033_v7, %v4992_v32  ;;  %v5527_v0 = vld [vmem:[#allocation3 + $0xd8] sm:$0xff] }
 0x24e   : > { %v5722_v10 = vmax.f32 %v5690_v40, 0.0  ;;  %v5691_v11 = vadd.f32 %v8306_v50, %v5652_v39  ;;  %v6520_v5 = vpop.f32.mrb[136].mxu0  ;;  %5099 = vst.msk [vmem:[#allocation3 + $0xf8] sm:$0xff] %vm1583_vm5, %v5067_v35  ;;  %v5525_v42 = vld [vmem:[#allocation3 + $0xc8] sm:$0xff] }
 0x24f   : > { %5756 = vst.msk [vmem:[%s8319_s25 + $0x90] sm:$0xff] %vm1583_vm5, %v5724_v57  ;;  %v5725_v43 = vmax.f32 %v5693_v61, 0.0  ;;  %v5558_v53 = vadd.f32 %v6520_v5, %v5526_v55  ;;  %v5469_v25 = vpop.f32.mrb[137].mxu0  ;;  %5097 = vst.msk [vmem:[#allocation3 + $0xe8] sm:$0xff] %vm1583_vm5, %v5065_v19 }
 0x250   : > { %5754 = vst.msk [vmem:[%s8319_s25 + $0x80] sm:$0xff] %vm1583_vm5, %v5722_v10  ;;  %v5723_v47 = vmax.f32 %v5691_v11, 0.0  ;;  %v5618_v2 = vld [vmem:[#allocation3 + $0xb0] sm:$0xff]  ;;  %v5556_v52 = vadd.f32 %v5524_v22, %v5469_v25  ;;  %v6521_v54 = vpop.f32.mrb[138].mxu0 }
 0x251   : > { %5757 = vst.msk [vmem:[%s8319_s25 + $0x98] sm:$0xff] %vm1583_vm5, %v5725_v43  ;;  %v5657_v38 = vmul.f32 %v8299_v14, %v5618_v2  ;;  %v5616_v33 = vld [vmem:[#allocation3 + $0xa0] sm:$0xff]  ;;  %5590 = vst.msk [vmem:[#allocation3 + $0xd0] sm:$0xff] %vm1583_vm5, %v5558_v53  ;;  %v5559_v60 = vadd.f32 %v6521_v54, %v5527_v0  ;;  %v5472_v15 = vpop.f32.mrb[139].mxu0 }
 0x252   : > { %5755 = vst.msk [vmem:[%s8319_s25 + $0x88] sm:$0xff] %vm1583_vm5, %v5723_v47  ;;  %v5655_v58 = vmul.f32 %v8299_v14, %v5616_v33  ;;  %v5619_v63 = vld [vmem:[#allocation3 + $0xb8] sm:$0xff]  ;;  %5588 = vst.msk [vmem:[#allocation3 + $0xc0] sm:$0xff] %vm1583_vm5, %v5556_v52  ;;  %v5557_v3 = vadd.f32 %v5525_v42, %v5472_v15 }
 0x253   : > { %v5696_v17 = vadd.f32 %v8306_v50, %v5657_v38  ;;  %v5658_v34 = vmul.f32 %v8299_v14, %v5619_v63  ;;  %v5617_v21 = vld [vmem:[#allocation3 + $0xa8] sm:$0xff]  ;;  %5591 = vst.msk [vmem:[#allocation3 + $0xd8] sm:$0xff] %vm1583_vm5, %v5559_v60  ;;  %v5530_v18 = vld [vmem:[#allocation3 + $0xf0] sm:$0xff] }
 0x254   : > { %v5694_v59 = vadd.f32 %v8306_v50, %v5655_v58  ;;  %v5656_v31 = vmul.f32 %v8299_v14, %v5617_v21  ;;  %5589 = vst.msk [vmem:[#allocation3 + $0xc8] sm:$0xff] %vm1583_vm5, %v5557_v3  ;;  %v5528_v6 = vld [vmem:[#allocation3 + $0xe0] sm:$0xff] }
 0x255   : > { %v5728_v4 = vmax.f32 %v5696_v17, 0.0  ;;  %v5697_v16 = vadd.f32 %v8306_v50, %v5658_v34  ;;  %v5531_v26 = vld [vmem:[#allocation3 + $0xf8] sm:$0xff] }
 0x256   : > { %v5726_v44 = vmax.f32 %v5694_v59, 0.0  ;;  %v5695_v37 = vadd.f32 %v8306_v50, %v5656_v31  ;;  %v6524_v49 = vpop.f32.mrb[140].mxu0  ;;  %v5529_v46 = vld [vmem:[#allocation3 + $0xe8] sm:$0xff] }
 0x257   : > { %5760 = vst.msk [vmem:[%s8319_s25 + $0xb0] sm:$0xff] %vm1583_vm5, %v5728_v4  ;;  %v5729_v62 = vmax.f32 %v5697_v16, 0.0  ;;  %v5562_v36 = vadd.f32 %v6524_v49, %v5530_v18  ;;  %v5485_v20 = vpop.f32.mrb[141].mxu0 }
 0x258   : > { %5758 = vst.msk [vmem:[%s8319_s25 + $0xa0] sm:$0xff] %vm1583_vm5, %v5726_v44  ;;  %v5727_v29 = vmax.f32 %v5695_v37, 0.0  ;;  %v5622_v12 = vld [vmem:[#allocation3 + $0xd0] sm:$0xff]  ;;  %v5560_v13 = vadd.f32 %v5528_v6, %v5485_v20  ;;  %v6525_v23 = vpop.f32.mrb[142].mxu0 }
 0x259   : > { %5761 = vst.msk [vmem:[%s8319_s25 + $0xb8] sm:$0xff] %vm1583_vm5, %v5729_v62  ;;  %v5661_v8 = vmul.f32 %v8299_v14, %v5622_v12  ;;  %v5620_v41 = vld [vmem:[#allocation3 + $0xc0] sm:$0xff]  ;;  %5594 = vst.msk [vmem:[#allocation3 + $0xf0] sm:$0xff] %vm1583_vm5, %v5562_v36  ;;  %v5563_v27 = vadd.f32 %v6525_v23, %v5531_v26  ;;  %v5488_v48 = vpop.f32.mrb[143].mxu0 }
 0x25a   : > { %5759 = vst.msk [vmem:[%s8319_s25 + $0xa8] sm:$0xff] %vm1583_vm5, %v5727_v29  ;;  %v5659_v1 = vmul.f32 %v8299_v14, %v5620_v41  ;;  %v5623_v24 = vld [vmem:[#allocation3 + $0xd8] sm:$0xff]  ;;  %5592 = vst.msk [vmem:[#allocation3 + $0xe0] sm:$0xff] %vm1583_vm5, %v5560_v13  ;;  %v5561_v30 = vadd.f32 %v5529_v46, %v5488_v48 }
 0x25b   : > { %v5700_v56 = vadd.f32 %v8306_v50, %v5661_v8  ;;  %v5662_v45 = vmul.f32 %v8299_v14, %v5623_v24  ;;  %v5621_v9 = vld [vmem:[#allocation3 + $0xc8] sm:$0xff]  ;;  %5595 = vst.msk [vmem:[#allocation3 + $0xf8] sm:$0xff] %vm1583_vm5, %v5563_v27 }
 0x25c   : > { %v5698_v28 = vadd.f32 %v8306_v50, %v5659_v1  ;;  %v5660_v51 = vmul.f32 %v8299_v14, %v5621_v9  ;;  %5593 = vst.msk [vmem:[#allocation3 + $0xe8] sm:$0xff] %vm1583_vm5, %v5561_v30 }
 0x25d   : > { %v5732_v40 = vmax.f32 %v5700_v56, 0.0  ;;  %v5701_v39 = vadd.f32 %v8306_v50, %v5662_v45 }
 0x25e   : > { %v5730_v55 = vmax.f32 %v5698_v28, 0.0  ;;  %v5699_v35 = vadd.f32 %v8306_v50, %v5660_v51 }
 0x25f   : > { %5764 = vst.msk [vmem:[%s8319_s25 + $0xd0] sm:$0xff] %vm1583_vm5, %v5732_v40  ;;  %v5733_v32 = vmax.f32 %v5701_v39, 0.0 }
 0x260   : > { %5762 = vst.msk [vmem:[%s8319_s25 + $0xc0] sm:$0xff] %vm1583_vm5, %v5730_v55  ;;  %v5731_v7 = vmax.f32 %v5699_v35, 0.0  ;;  %v5626_v57 = vld [vmem:[#allocation3 + $0xf0] sm:$0xff] }
 0x261   : > { %5765 = vst.msk [vmem:[%s8319_s25 + $0xd8] sm:$0xff] %vm1583_vm5, %v5733_v32  ;;  %v5665_v61 = vmul.f32 %v8299_v14, %v5626_v57  ;;  %v5624_v22 = vld [vmem:[#allocation3 + $0xe0] sm:$0xff] }
 0x262   : > { %5763 = vst.msk [vmem:[%s8319_s25 + $0xc8] sm:$0xff] %vm1583_vm5, %v5731_v7  ;;  %v5663_v19 = vmul.f32 %v8299_v14, %v5624_v22  ;;  %v5627_v10 = vld [vmem:[#allocation3 + $0xf8] sm:$0xff] }
 0x263   : > { %v5704_v11 = vadd.f32 %v8306_v50, %v5665_v61  ;;  %v5666_v5 = vmul.f32 %v8299_v14, %v5627_v10  ;;  %v5625_v0 = vld [vmem:[#allocation3 + $0xe8] sm:$0xff] }
 0x264   : > { %v5702_v43 = vadd.f32 %v8306_v50, %v5663_v19  ;;  %v5664_v53 = vmul.f32 %v8299_v14, %v5625_v0 }
 0x265   : > { %v5736_v25 = vmax.f32 %v5704_v11, 0.0  ;;  %v5705_v42 = vadd.f32 %v8306_v50, %v5666_v5 }
 0x266   : > { %v5734_v47 = vmax.f32 %v5702_v43, 0.0  ;;  %v5703_v2 = vadd.f32 %v8306_v50, %v5664_v53 }
 0x267   : > { %5768 = vst.msk [vmem:[%s8319_s25 + $0xf0] sm:$0xff] %vm1583_vm5, %v5736_v25  ;;  %v5737_v52 = vmax.f32 %v5705_v42, 0.0 }
 0x268   : > { %5766 = vst.msk [vmem:[%s8319_s25 + $0xe0] sm:$0xff] %vm1583_vm5, %v5734_v47  ;;  %v5735_v54 = vmax.f32 %v5703_v2, 0.0 }
 0x269   : > { %5769 = vst.msk [vmem:[%s8319_s25 + $0xf8] sm:$0xff] %vm1583_vm5, %v5737_v52 }
 0x26a   : > { %5767 = vst.msk [vmem:[%s8319_s25 + $0xe8] sm:$0xff] %vm1583_vm5, %v5735_v54 }
 0x26b PF: > { %s14_s17 = sadd.s32 1, %s6607_s17   ;;  %s8667_s15 = smov %s6603_s16 }
 0x26c   : > { %p11_p5 = scmp.ge.s32.totalorder %s14_s17, 4   ;;  %s8668_s16 = smov %s8670_s18 }
 0x26e   :  { %13 = sbr.rel (!%p11_p5) target bundleno = 2 (0x2), region = 74 }

</bundles_post_ra>
